<compile_context>
chip_gen: v7x
topology: tpu7x:2x2x1
jax: 0.10.0
libtpu: 0.0.40
codegen_flags: <defaults>
</compile_context>

<pallas_src>
import functools

import jax
import jax.numpy as jnp
import numpy as np
from jax.experimental import pallas as pl
from jax.experimental.pallas import tpu as pltpu

LANE = 128   # lane width; Cout is padded to a multiple of this
PADL = 8     # sublane-aligned halo in the stage-2 scratch (only 1 col is used)


def _round_up(x, m):
    return ((x + m - 1) // m) * m


# ----------------------------- Pallas kernel ------------------------------- #
def _make_fused_block_kernel(h, w, stride, coutp, identity):
    """Fused residual block for one NHWC image (channels padded to `coutp`):
         y   = relu(conv3x3_stride(x) @ (w1*s1) + b1)
         out = relu(conv3x3_1(y) @ (w2*s2) + b2 + shortcut(x))
       Each 3x3 conv = 9 shifted sub-matmuls accumulated in f32.
    """
    ho = (h - 1) // stride + 1
    wo = (w - 1) // stride + 1

    def kernel(*refs):
        if identity:
            x_ref, w1_ref, b1_ref, w2_ref, b2_ref, o_ref, ypad_ref = refs
        else:
            (x_ref, w1_ref, b1_ref, w2_ref, b2_ref,
             ws_ref, bs_ref, o_ref, ypad_ref) = refs

        xf = x_ref[0]                                  # (h+2, w+2, Cin_eff) f32

        # ---- stage 1: conv1 (stride) + folded-BN1 + ReLU ----
        acc1 = jnp.zeros((ho * wo, coutp), jnp.float32)
        for ky in range(3):
            for kx in range(3):
                sub = xf[ky:ky + (ho - 1) * stride + 1:stride,
                         kx:kx + (wo - 1) * stride + 1:stride, :]
                lhs = sub.reshape(ho * wo, sub.shape[-1]).astype(jnp.bfloat16)
                acc1 = acc1 + jnp.dot(lhs, w1_ref[ky * 3 + kx],
                                      preferred_element_type=jnp.float32)
        y = jnp.maximum(acc1 + b1_ref[...], 0.0)       # (ho*wo, coutp) f32

        # ---- zero-padded copy of y in VMEM (halo for conv2) ----
        ypad_ref[...] = jnp.zeros_like(ypad_ref)
        ypad_ref[1:ho + 1, PADL:PADL + wo, :] = y.reshape(ho, wo, coutp)

        # ---- stage 2: conv2 (stride 1) + folded-BN2 ----
        acc2 = jnp.zeros((ho * wo, coutp), jnp.float32)
        for ky in range(3):
            for kx in range(3):
                sub = ypad_ref[ky:ky + ho, PADL - 1 + kx:PADL - 1 + kx + wo, :]
                lhs = sub.reshape(ho * wo, coutp).astype(jnp.bfloat16)
                acc2 = acc2 + jnp.dot(lhs, w2_ref[ky * 3 + kx],
                                      preferred_element_type=jnp.float32)
        acc2 = acc2 + b2_ref[...]

        # ---- shortcut ----
        if identity:
            # pure f32 VPU add — no identity matmul, no extra weight stream
            sc = xf[1:h + 1, 1:w + 1, :].reshape(ho * wo, coutp)
        else:
            xs = xf[1:1 + (ho - 1) * stride + 1:stride,
                    1:1 + (wo - 1) * stride + 1:stride, :]
            lhs = xs.reshape(ho * wo, xs.shape[-1]).astype(jnp.bfloat16)
            sc = (jnp.dot(lhs, ws_ref[...], preferred_element_type=jnp.float32)
                  + bs_ref[...])

        out = jnp.maximum(acc2 + sc, 0.0)
        o_ref[...] = out.reshape(1, ho, wo, coutp)

    return kernel


# ------------------------------ JAX glue ----------------------------------- #
def _fold_bn(bn):
    scale = bn["gamma"] / jnp.sqrt(bn["var"] + bn["eps"])
    bias = bn["beta"] - bn["mean"] * scale
    return scale.astype(jnp.float32), bias.astype(jnp.float32)


def _prep_conv3x3(wt, scale, k_pad, n_pad):
    """(Cout,Cin,3,3) -> (9, k_pad, n_pad) bf16 with BN scale folded into cols."""
    cout, cin = wt.shape[0], wt.shape[1]
    wc = jnp.transpose(wt, (2, 3, 1, 0)).reshape(9, cin, cout).astype(jnp.float32)
    wc = wc * scale[None, None, :]
    wc = jnp.pad(wc, ((0, 0), (0, k_pad - cin), (0, n_pad - cout)))
    return wc.astype(jnp.bfloat16)


def simple_residual_block(x_nchw, params, stride=1):
    x = jnp.transpose(x_nchw, (0, 2, 3, 1)).astype(jnp.float32)     # NCHW -> NHWC
    n, h, w, cin = x.shape
    w1 = params["conv1_w"]                                          # (Cout,Cin,3,3)
    cout = w1.shape[0]
    coutp = _round_up(cout, LANE)
    identity = (stride == 1 and cin == cout)
    ho = (h - 1) // stride + 1
    wo = (w - 1) // stride + 1

    s1, b1 = _fold_bn(params["bn1"])
    s2, b2 = _fold_bn(params["bn2"])

    # spatial halo of 1; identity shortcut also pads channels so the residual
    # can be added directly inside the kernel
    xp = jnp.pad(x, ((0, 0), (1, 1), (1, 1), (0, 0)))
    cin_eff = coutp if identity else cin
    if identity and cin != coutp:
        xp = jnp.pad(xp, ((0, 0), (0, 0), (0, 0), (0, coutp - cin)))

    w1c = _prep_conv3x3(w1, s1, cin_eff, coutp)                     # (9,cin_eff,coutp)
    w2c = _prep_conv3x3(params["conv2_w"], s2, coutp, coutp)        # (9,coutp,coutp)
    b1p = jnp.pad(b1, (0, coutp - cout)).reshape(1, coutp)
    b2p = jnp.pad(b2, (0, coutp - cout)).reshape(1, coutp)

    kernel = _make_fused_block_kernel(h, w, stride, coutp, identity)

    in_arrays = [xp, w1c, b1p, w2c, b2p]
    in_specs = [
        pl.BlockSpec((1, h + 2, w + 2, cin_eff), lambda i: (i, 0, 0, 0)),
        pl.BlockSpec((9, cin_eff, coutp), lambda i: (0, 0, 0)),
        pl.BlockSpec((1, coutp), lambda i: (0, 0)),
        pl.BlockSpec((9, coutp, coutp), lambda i: (0, 0, 0)),
        pl.BlockSpec((1, coutp), lambda i: (0, 0)),
    ]
    flops = 2 * n * ho * wo * cout * (9 * cin + 9 * cout)

    if not identity:   # projection shortcut: 1x1 conv (stride) with folded BN
        s_sc, b_sc = _fold_bn(params["sc_bn"])
        wsc = jnp.transpose(params["sc_conv_w"][:, :, 0, 0], (1, 0)).astype(jnp.float32)
        wsc = wsc * s_sc[None, :]
        wsc = jnp.pad(wsc, ((0, 0), (0, coutp - cout))).astype(jnp.bfloat16)
        bscp = jnp.pad(b_sc, (0, coutp - cout)).reshape(1, coutp)
        in_arrays += [wsc, bscp]
        in_specs += [
            pl.BlockSpec((cin, coutp), lambda i: (0, 0)),
            pl.BlockSpec((1, coutp), lambda i: (0, 0)),
        ]
        flops += 2 * n * ho * wo * cin * cout

    bytes_accessed = (xp.size * 4 + w1c.size * 2 + w2c.size * 2
                      + (b1p.size + b2p.size) * 4 + n * ho * wo * coutp * 4)

    out_p = pl.pallas_call(
        kernel,
        out_shape=jax.ShapeDtypeStruct((n, ho, wo, coutp), jnp.float32),
        grid=(n,),
        in_specs=in_specs,
        out_specs=pl.BlockSpec((1, ho, wo, coutp), lambda i: (i, 0, 0, 0)),
        scratch_shapes=[pltpu.VMEM((ho + 2, wo + 2 * PADL, coutp), jnp.float32)],
        compiler_params=pltpu.CompilerParams(
            dimension_semantics=("parallel",),        # shards across v7x's 2 TCs
            vmem_limit_bytes=48 * 1024 * 1024,        # safe on v5e/v6e/v7x
        ),
        cost_estimate=pl.CostEstimate(
            flops=flops, transcendentals=0, bytes_accessed=bytes_accessed),
    )(*in_arrays)

    out = out_p[:, :, :, :cout]                       # drop lane padding
    return jnp.transpose(out, (0, 3, 1, 2))           # NHWC -> NCHW


# --------------------------- pure-JAX reference ----------------------------- #
def _ref_block(x, params, stride):
    def conv(a, wt, s, pad):
        return jax.lax.conv_general_dilated(
            a, wt, (s, s), [(pad, pad), (pad, pad)],
            dimension_numbers=("NCHW", "OIHW", "NCHW"))

    def bn(a, p):
        sc = p["gamma"] / jnp.sqrt(p["var"] + p["eps"])
        bi = p["beta"] - p["mean"] * sc
        return a * sc[None, :, None, None] + bi[None, :, None, None]

    out = jax.nn.relu(bn(conv(x, params["conv1_w"], stride, 1), params["bn1"]))
    out = bn(conv(out, params["conv2_w"], 1, 1), params["bn2"])
    cin, cout = x.shape[1], params["conv1_w"].shape[0]
    if stride != 1 or cin != cout:
        sc = bn(conv(x, params["sc_conv_w"], stride, 0), params["sc_bn"])
    else:
        sc = x
    return jax.nn.relu(out + sc)


# ---------------------------------- main ------------------------------------ #
def _make_params(key, cin, cout):
    ks = jax.random.split(key, 12)

    def bn_params(k):
        k1, k2, k3, k4 = jax.random.split(k, 4)
        return dict(
            gamma=1.0 + 0.1 * jax.random.normal(k1, (cout,), jnp.float32),
            beta=0.1 * jax.random.normal(k2, (cout,), jnp.float32),
            mean=0.1 * jax.random.normal(k3, (cout,), jnp.float32),
            var=jax.random.uniform(k4, (cout,), jnp.float32, 0.5, 1.5),
            eps=1e-5,
        )

    return dict(
        conv1_w=0.1 * jax.random.normal(ks[0], (cout, cin, 3, 3), jnp.float32),
        conv2_w=0.1 * jax.random.normal(ks[1], (cout, cout, 3, 3), jnp.float32),
        sc_conv_w=0.1 * jax.random.normal(ks[2], (cout, cin, 1, 1), jnp.float32),
        bn1=bn_params(ks[3]),
        bn2=bn_params(ks[4]),
        sc_bn=bn_params(ks[5]),
    )


if __name__ == "__main__":
    key = jax.random.PRNGKey(0)

    # (in_channels, out_channels, stride): projection shortcut and identity shortcut
    configs = [(4, 8, 1), (8, 8, 1)]
    for idx, (cin, cout, stride) in enumerate(configs):
        k_x, k_p = jax.random.split(jax.random.fold_in(key, idx))
        x = jax.random.normal(k_x, (2, cin, 16, 16), jnp.float32)   # NCHW
        params = _make_params(k_p, cin, cout)

        fwd = jax.jit(functools.partial(simple_residual_block, stride=stride))
        out = jax.block_until_ready(fwd(x, params))

        ref = jax.block_until_ready(_ref_block(x, params, stride))
        np.testing.assert_allclose(np.asarray(out), np.asarray(ref),
                                   rtol=2e-2, atol=2e-2)
        assert out.shape == ref.shape

    print("KERNEL_OK")
</pallas_src>

<mosaic_0001>
module attributes {stable_mosaic.version = 11 : i64} {
  func.func @kernel(%arg0: i32, %arg1: memref<1x18x18x4xf32, #tpu.memory_space<vmem>>, %arg2: memref<9x4x128xbf16, #tpu.memory_space<vmem>>, %arg3: memref<1x128xf32, #tpu.memory_space<vmem>>, %arg4: memref<9x128x128xbf16, #tpu.memory_space<vmem>>, %arg5: memref<1x128xf32, #tpu.memory_space<vmem>>, %arg6: memref<4x128xbf16, #tpu.memory_space<vmem>>, %arg7: memref<1x128xf32, #tpu.memory_space<vmem>>, %arg8: memref<1x16x16x128xf32, #tpu.memory_space<vmem>>, %arg9: memref<18x32x128xf32, #tpu.memory_space<vmem>>) attributes {dimension_semantics = [#tpu.dimension_semantics<parallel>], iteration_bounds = array<i64: 2>, scalar_prefetch = 0 : i64, scratch_operands = 1 : i64, tpu.core_type = #tpu.core_type<tc>, window_params = [{transform_indices = @transform_0, window_bounds = array<i64: 1, 18, 18, 4>}, {pipeline_mode = #tpu.pipeline_mode<synchronous>, transform_indices = @transform_1, window_bounds = array<i64: 9, 4, 128>}, {pipeline_mode = #tpu.pipeline_mode<synchronous>, transform_indices = @transform_2, window_bounds = array<i64: 1, 128>}, {pipeline_mode = #tpu.pipeline_mode<synchronous>, transform_indices = @transform_3, window_bounds = array<i64: 9, 128, 128>}, {pipeline_mode = #tpu.pipeline_mode<synchronous>, transform_indices = @transform_4, window_bounds = array<i64: 1, 128>}, {pipeline_mode = #tpu.pipeline_mode<synchronous>, transform_indices = @transform_5, window_bounds = array<i64: 4, 128>}, {pipeline_mode = #tpu.pipeline_mode<synchronous>, transform_indices = @transform_6, window_bounds = array<i64: 1, 128>}, {transform_indices = @transform_7, window_bounds = array<i64: 1, 16, 16, 128>}]} {
    %c0 = arith.constant 0 : index
    %c0_0 = arith.constant 0 : index
    %c0_1 = arith.constant 0 : index
    %c0_2 = arith.constant 0 : index
    %0 = vector.load %arg1[%c0, %c0_0, %c0_1, %c0_2] : memref<1x18x18x4xf32, #tpu.memory_space<vmem>>, vector<1x18x18x4xf32>
    %1 = vector.shape_cast %0 : vector<1x18x18x4xf32> to vector<18x18x4xf32>
    %cst = arith.constant 0.000000e+00 : f32
    %2 = vector.broadcast %cst : f32 to vector<256x128xf32>
    %3 = vector.extract_strided_slice %1 {offsets = [0, 0, 0], sizes = [16, 16, 4], strides = [1, 1, 1]} : vector<18x18x4xf32> to vector<16x16x4xf32>
    %4 = vector.shape_cast %3 : vector<16x16x4xf32> to vector<256x4xf32>
    %5 = arith.truncf %4 : vector<256x4xf32> to vector<256x4xbf16>
    %c0_3 = arith.constant 0 : index
    %c0_4 = arith.constant 0 : index
    %c0_5 = arith.constant 0 : index
    %6 = vector.load %arg2[%c0_3, %c0_4, %c0_5] : memref<9x4x128xbf16, #tpu.memory_space<vmem>>, vector<1x4x128xbf16>
    %7 = vector.shape_cast %6 : vector<1x4x128xbf16> to vector<4x128xbf16>
    %cst_6 = arith.constant dense<0.000000e+00> : vector<256x128xf32>
    %8 = tpu.matmul %5, %7, %cst_6 {dimension_numbers = #tpu.dot_dimension_numbers<[1], [0], [0], [1], [0, 0, 1, 1], [], []>} : vector<256x4xbf16>, vector<4x128xbf16>, vector<256x128xf32> -> vector<256x128xf32>
    %9 = arith.addf %2, %8 : vector<256x128xf32>
    %10 = vector.extract_strided_slice %1 {offsets = [0, 1, 0], sizes = [16, 16, 4], strides = [1, 1, 1]} : vector<18x18x4xf32> to vector<16x16x4xf32>
    %11 = vector.shape_cast %10 : vector<16x16x4xf32> to vector<256x4xf32>
    %12 = arith.truncf %11 : vector<256x4xf32> to vector<256x4xbf16>
    %c1 = arith.constant 1 : index
    %c0_7 = arith.constant 0 : index
    %c0_8 = arith.constant 0 : index
    %13 = vector.load %arg2[%c1, %c0_7, %c0_8] : memref<9x4x128xbf16, #tpu.memory_space<vmem>>, vector<1x4x128xbf16>
    %14 = vector.shape_cast %13 : vector<1x4x128xbf16> to vector<4x128xbf16>
    %cst_9 = arith.constant dense<0.000000e+00> : vector<256x128xf32>
    %15 = tpu.matmul %12, %14, %cst_9 {dimension_numbers = #tpu.dot_dimension_numbers<[1], [0], [0], [1], [0, 0, 1, 1], [], []>} : vector<256x4xbf16>, vector<4x128xbf16>, vector<256x128xf32> -> vector<256x128xf32>
    %16 = arith.addf %9, %15 : vector<256x128xf32>
    %17 = vector.extract_strided_slice %1 {offsets = [0, 2, 0], sizes = [16, 16, 4], strides = [1, 1, 1]} : vector<18x18x4xf32> to vector<16x16x4xf32>
    %18 = vector.shape_cast %17 : vector<16x16x4xf32> to vector<256x4xf32>
    %19 = arith.truncf %18 : vector<256x4xf32> to vector<256x4xbf16>
    %c2 = arith.constant 2 : index
    %c0_10 = arith.constant 0 : index
    %c0_11 = arith.constant 0 : index
    %20 = vector.load %arg2[%c2, %c0_10, %c0_11] : memref<9x4x128xbf16, #tpu.memory_space<vmem>>, vector<1x4x128xbf16>
    %21 = vector.shape_cast %20 : vector<1x4x128xbf16> to vector<4x128xbf16>
    %cst_12 = arith.constant dense<0.000000e+00> : vector<256x128xf32>
    %22 = tpu.matmul %19, %21, %cst_12 {dimension_numbers = #tpu.dot_dimension_numbers<[1], [0], [0], [1], [0, 0, 1, 1], [], []>} : vector<256x4xbf16>, vector<4x128xbf16>, vector<256x128xf32> -> vector<256x128xf32>
    %23 = arith.addf %16, %22 : vector<256x128xf32>
    %24 = vector.extract_strided_slice %1 {offsets = [1, 0, 0], sizes = [16, 16, 4], strides = [1, 1, 1]} : vector<18x18x4xf32> to vector<16x16x4xf32>
    %25 = vector.shape_cast %24 : vector<16x16x4xf32> to vector<256x4xf32>
    %26 = arith.truncf %25 : vector<256x4xf32> to vector<256x4xbf16>
    %c3 = arith.constant 3 : index
    %c0_13 = arith.constant 0 : index
    %c0_14 = arith.constant 0 : index
    %27 = vector.load %arg2[%c3, %c0_13, %c0_14] : memref<9x4x128xbf16, #tpu.memory_space<vmem>>, vector<1x4x128xbf16>
    %28 = vector.shape_cast %27 : vector<1x4x128xbf16> to vector<4x128xbf16>
    %cst_15 = arith.constant dense<0.000000e+00> : vector<256x128xf32>
    %29 = tpu.matmul %26, %28, %cst_15 {dimension_numbers = #tpu.dot_dimension_numbers<[1], [0], [0], [1], [0, 0, 1, 1], [], []>} : vector<256x4xbf16>, vector<4x128xbf16>, vector<256x128xf32> -> vector<256x128xf32>
    %30 = arith.addf %23, %29 : vector<256x128xf32>
    %31 = vector.extract_strided_slice %1 {offsets = [1, 1, 0], sizes = [16, 16, 4], strides = [1, 1, 1]} : vector<18x18x4xf32> to vector<16x16x4xf32>
    %32 = vector.shape_cast %31 : vector<16x16x4xf32> to vector<256x4xf32>
    %33 = arith.truncf %32 : vector<256x4xf32> to vector<256x4xbf16>
    %c4 = arith.constant 4 : index
    %c0_16 = arith.constant 0 : index
    %c0_17 = arith.constant 0 : index
    %34 = vector.load %arg2[%c4, %c0_16, %c0_17] : memref<9x4x128xbf16, #tpu.memory_space<vmem>>, vector<1x4x128xbf16>
    %35 = vector.shape_cast %34 : vector<1x4x128xbf16> to vector<4x128xbf16>
    %cst_18 = arith.constant dense<0.000000e+00> : vector<256x128xf32>
    %36 = tpu.matmul %33, %35, %cst_18 {dimension_numbers = #tpu.dot_dimension_numbers<[1], [0], [0], [1], [0, 0, 1, 1], [], []>} : vector<256x4xbf16>, vector<4x128xbf16>, vector<256x128xf32> -> vector<256x128xf32>
    %37 = arith.addf %30, %36 : vector<256x128xf32>
    %38 = vector.extract_strided_slice %1 {offsets = [1, 2, 0], sizes = [16, 16, 4], strides = [1, 1, 1]} : vector<18x18x4xf32> to vector<16x16x4xf32>
    %39 = vector.shape_cast %38 : vector<16x16x4xf32> to vector<256x4xf32>
    %40 = arith.truncf %39 : vector<256x4xf32> to vector<256x4xbf16>
    %c5 = arith.constant 5 : index
    %c0_19 = arith.constant 0 : index
    %c0_20 = arith.constant 0 : index
    %41 = vector.load %arg2[%c5, %c0_19, %c0_20] : memref<9x4x128xbf16, #tpu.memory_space<vmem>>, vector<1x4x128xbf16>
    %42 = vector.shape_cast %41 : vector<1x4x128xbf16> to vector<4x128xbf16>
    %cst_21 = arith.constant dense<0.000000e+00> : vector<256x128xf32>
    %43 = tpu.matmul %40, %42, %cst_21 {dimension_numbers = #tpu.dot_dimension_numbers<[1], [0], [0], [1], [0, 0, 1, 1], [], []>} : vector<256x4xbf16>, vector<4x128xbf16>, vector<256x128xf32> -> vector<256x128xf32>
    %44 = arith.addf %37, %43 : vector<256x128xf32>
    %45 = vector.extract_strided_slice %1 {offsets = [2, 0, 0], sizes = [16, 16, 4], strides = [1, 1, 1]} : vector<18x18x4xf32> to vector<16x16x4xf32>
    %46 = vector.shape_cast %45 : vector<16x16x4xf32> to vector<256x4xf32>
    %47 = arith.truncf %46 : vector<256x4xf32> to vector<256x4xbf16>
    %c6 = arith.constant 6 : index
    %c0_22 = arith.constant 0 : index
    %c0_23 = arith.constant 0 : index
    %48 = vector.load %arg2[%c6, %c0_22, %c0_23] : memref<9x4x128xbf16, #tpu.memory_space<vmem>>, vector<1x4x128xbf16>
    %49 = vector.shape_cast %48 : vector<1x4x128xbf16> to vector<4x128xbf16>
    %cst_24 = arith.constant dense<0.000000e+00> : vector<256x128xf32>
    %50 = tpu.matmul %47, %49, %cst_24 {dimension_numbers = #tpu.dot_dimension_numbers<[1], [0], [0], [1], [0, 0, 1, 1], [], []>} : vector<256x4xbf16>, vector<4x128xbf16>, vector<256x128xf32> -> vector<256x128xf32>
    %51 = arith.addf %44, %50 : vector<256x128xf32>
    %52 = vector.extract_strided_slice %1 {offsets = [2, 1, 0], sizes = [16, 16, 4], strides = [1, 1, 1]} : vector<18x18x4xf32> to vector<16x16x4xf32>
    %53 = vector.shape_cast %52 : vector<16x16x4xf32> to vector<256x4xf32>
    %54 = arith.truncf %53 : vector<256x4xf32> to vector<256x4xbf16>
    %c7 = arith.constant 7 : index
    %c0_25 = arith.constant 0 : index
    %c0_26 = arith.constant 0 : index
    %55 = vector.load %arg2[%c7, %c0_25, %c0_26] : memref<9x4x128xbf16, #tpu.memory_space<vmem>>, vector<1x4x128xbf16>
    %56 = vector.shape_cast %55 : vector<1x4x128xbf16> to vector<4x128xbf16>
    %cst_27 = arith.constant dense<0.000000e+00> : vector<256x128xf32>
    %57 = tpu.matmul %54, %56, %cst_27 {dimension_numbers = #tpu.dot_dimension_numbers<[1], [0], [0], [1], [0, 0, 1, 1], [], []>} : vector<256x4xbf16>, vector<4x128xbf16>, vector<256x128xf32> -> vector<256x128xf32>
    %58 = arith.addf %51, %57 : vector<256x128xf32>
    %59 = vector.extract_strided_slice %1 {offsets = [2, 2, 0], sizes = [16, 16, 4], strides = [1, 1, 1]} : vector<18x18x4xf32> to vector<16x16x4xf32>
    %60 = vector.shape_cast %59 : vector<16x16x4xf32> to vector<256x4xf32>
    %61 = arith.truncf %60 : vector<256x4xf32> to vector<256x4xbf16>
    %c8 = arith.constant 8 : index
    %c0_28 = arith.constant 0 : index
    %c0_29 = arith.constant 0 : index
    %62 = vector.load %arg2[%c8, %c0_28, %c0_29] : memref<9x4x128xbf16, #tpu.memory_space<vmem>>, vector<1x4x128xbf16>
    %63 = vector.shape_cast %62 : vector<1x4x128xbf16> to vector<4x128xbf16>
    %cst_30 = arith.constant dense<0.000000e+00> : vector<256x128xf32>
    %64 = tpu.matmul %61, %63, %cst_30 {dimension_numbers = #tpu.dot_dimension_numbers<[1], [0], [0], [1], [0, 0, 1, 1], [], []>} : vector<256x4xbf16>, vector<4x128xbf16>, vector<256x128xf32> -> vector<256x128xf32>
    %65 = arith.addf %58, %64 : vector<256x128xf32>
    %c0_31 = arith.constant 0 : index
    %c0_32 = arith.constant 0 : index
    %66 = vector.load %arg3[%c0_31, %c0_32] : memref<1x128xf32, #tpu.memory_space<vmem>>, vector<1x128xf32>
    %67 = vector.broadcast %66 : vector<1x128xf32> to vector<256x128xf32>
    %68 = arith.addf %65, %67 : vector<256x128xf32>
    %cst_33 = arith.constant 0.000000e+00 : f32
    %69 = vector.broadcast %cst_33 : f32 to vector<256x128xf32>
    %70 = arith.maximumf %68, %69 : vector<256x128xf32>
    %cst_34 = arith.constant 0.000000e+00 : f32
    %71 = vector.broadcast %cst_34 : f32 to vector<18x32x128xf32>
    %c0_35 = arith.constant 0 : index
    %c0_36 = arith.constant 0 : index
    %c0_37 = arith.constant 0 : index
    %72 = vector.load %arg9[%c0_35, %c0_36, %c0_37] : memref<18x32x128xf32, #tpu.memory_space<vmem>>, vector<18x32x128xf32>
    tpu.vector_store %arg9[%c0_35, %c0_36, %c0_37], %71 {strides = array<i32>} : memref<18x32x128xf32, #tpu.memory_space<vmem>>, vector<18x32x128xf32>,
    %73 = vector.shape_cast %70 : vector<256x128xf32> to vector<16x16x128xf32>
    %c1_38 = arith.constant 1 : index
    %c8_39 = arith.constant 8 : index
    %c0_40 = arith.constant 0 : index
    %74 = vector.load %arg9[%c1_38, %c8_39, %c0_40] : memref<18x32x128xf32, #tpu.memory_space<vmem>>, vector<16x16x128xf32>
    tpu.vector_store %arg9[%c1_38, %c8_39, %c0_40], %73 {strides = array<i32>} : memref<18x32x128xf32, #tpu.memory_space<vmem>>, vector<16x16x128xf32>,
    %cst_41 = arith.constant 0.000000e+00 : f32
    %75 = vector.broadcast %cst_41 : f32 to vector<256x128xf32>
    %c0_42 = arith.constant 0 : index
    %c7_43 = arith.constant 7 : index
    %c0_44 = arith.constant 0 : index
    %76 = vector.load %arg9[%c0_42, %c7_43, %c0_44] : memref<18x32x128xf32, #tpu.memory_space<vmem>>, vector<16x16x128xf32>
    %77 = vector.shape_cast %76 : vector<16x16x128xf32> to vector<256x128xf32>
    %78 = arith.truncf %77 : vector<256x128xf32> to vector<256x128xbf16>
    %c0_45 = arith.constant 0 : index
    %c0_46 = arith.constant 0 : index
    %c0_47 = arith.constant 0 : index
    %79 = vector.load %arg4[%c0_45, %c0_46, %c0_47] : memref<9x128x128xbf16, #tpu.memory_space<vmem>>, vector<1x128x128xbf16>
    %80 = vector.shape_cast %79 : vector<1x128x128xbf16> to vector<128x128xbf16>
    %cst_48 = arith.constant dense<0.000000e+00> : vector<256x128xf32>
    %81 = tpu.matmul %78, %80, %cst_48 {dimension_numbers = #tpu.dot_dimension_numbers<[1], [0], [0], [1], [0, 0, 1, 1], [], []>} : vector<256x128xbf16>, vector<128x128xbf16>, vector<256x128xf32> -> vector<256x128xf32>
    %82 = arith.addf %75, %81 : vector<256x128xf32>
    %c0_49 = arith.constant 0 : index
    %c8_50 = arith.constant 8 : index
    %c0_51 = arith.constant 0 : index
    %83 = vector.load %arg9[%c0_49, %c8_50, %c0_51] : memref<18x32x128xf32, #tpu.memory_space<vmem>>, vector<16x16x128xf32>
    %84 = vector.shape_cast %83 : vector<16x16x128xf32> to vector<256x128xf32>
    %85 = arith.truncf %84 : vector<256x128xf32> to vector<256x128xbf16>
    %c1_52 = arith.constant 1 : index
    %c0_53 = arith.constant 0 : index
    %c0_54 = arith.constant 0 : index
    %86 = vector.load %arg4[%c1_52, %c0_53, %c0_54] : memref<9x128x128xbf16, #tpu.memory_space<vmem>>, vector<1x128x128xbf16>
    %87 = vector.shape_cast %86 : vector<1x128x128xbf16> to vector<128x128xbf16>
    %cst_55 = arith.constant dense<0.000000e+00> : vector<256x128xf32>
    %88 = tpu.matmul %85, %87, %cst_55 {dimension_numbers = #tpu.dot_dimension_numbers<[1], [0], [0], [1], [0, 0, 1, 1], [], []>} : vector<256x128xbf16>, vector<128x128xbf16>, vector<256x128xf32> -> vector<256x128xf32>
    %89 = arith.addf %82, %88 : vector<256x128xf32>
    %c0_56 = arith.constant 0 : index
    %c9 = arith.constant 9 : index
    %c0_57 = arith.constant 0 : index
    %90 = vector.load %arg9[%c0_56, %c9, %c0_57] : memref<18x32x128xf32, #tpu.memory_space<vmem>>, vector<16x16x128xf32>
    %91 = vector.shape_cast %90 : vector<16x16x128xf32> to vector<256x128xf32>
    %92 = arith.truncf %91 : vector<256x128xf32> to vector<256x128xbf16>
    %c2_58 = arith.constant 2 : index
    %c0_59 = arith.constant 0 : index
    %c0_60 = arith.constant 0 : index
    %93 = vector.load %arg4[%c2_58, %c0_59, %c0_60] : memref<9x128x128xbf16, #tpu.memory_space<vmem>>, vector<1x128x128xbf16>
    %94 = vector.shape_cast %93 : vector<1x128x128xbf16> to vector<128x128xbf16>
    %cst_61 = arith.constant dense<0.000000e+00> : vector<256x128xf32>
    %95 = tpu.matmul %92, %94, %cst_61 {dimension_numbers = #tpu.dot_dimension_numbers<[1], [0], [0], [1], [0, 0, 1, 1], [], []>} : vector<256x128xbf16>, vector<128x128xbf16>, vector<256x128xf32> -> vector<256x128xf32>
    %96 = arith.addf %89, %95 : vector<256x128xf32>
    %c1_62 = arith.constant 1 : index
    %c7_63 = arith.constant 7 : index
    %c0_64 = arith.constant 0 : index
    %97 = vector.load %arg9[%c1_62, %c7_63, %c0_64] : memref<18x32x128xf32, #tpu.memory_space<vmem>>, vector<16x16x128xf32>
    %98 = vector.shape_cast %97 : vector<16x16x128xf32> to vector<256x128xf32>
    %99 = arith.truncf %98 : vector<256x128xf32> to vector<256x128xbf16>
    %c3_65 = arith.constant 3 : index
    %c0_66 = arith.constant 0 : index
    %c0_67 = arith.constant 0 : index
    %100 = vector.load %arg4[%c3_65, %c0_66, %c0_67] : memref<9x128x128xbf16, #tpu.memory_space<vmem>>, vector<1x128x128xbf16>
    %101 = vector.shape_cast %100 : vector<1x128x128xbf16> to vector<128x128xbf16>
    %cst_68 = arith.constant dense<0.000000e+00> : vector<256x128xf32>
    %102 = tpu.matmul %99, %101, %cst_68 {dimension_numbers = #tpu.dot_dimension_numbers<[1], [0], [0], [1], [0, 0, 1, 1], [], []>} : vector<256x128xbf16>, vector<128x128xbf16>, vector<256x128xf32> -> vector<256x128xf32>
    %103 = arith.addf %96, %102 : vector<256x128xf32>
    %c1_69 = arith.constant 1 : index
    %c8_70 = arith.constant 8 : index
    %c0_71 = arith.constant 0 : index
    %104 = vector.load %arg9[%c1_69, %c8_70, %c0_71] : memref<18x32x128xf32, #tpu.memory_space<vmem>>, vector<16x16x128xf32>
    %105 = vector.shape_cast %104 : vector<16x16x128xf32> to vector<256x128xf32>
    %106 = arith.truncf %105 : vector<256x128xf32> to vector<256x128xbf16>
    %c4_72 = arith.constant 4 : index
    %c0_73 = arith.constant 0 : index
    %c0_74 = arith.constant 0 : index
    %107 = vector.load %arg4[%c4_72, %c0_73, %c0_74] : memref<9x128x128xbf16, #tpu.memory_space<vmem>>, vector<1x128x128xbf16>
    %108 = vector.shape_cast %107 : vector<1x128x128xbf16> to vector<128x128xbf16>
    %cst_75 = arith.constant dense<0.000000e+00> : vector<256x128xf32>
    %109 = tpu.matmul %106, %108, %cst_75 {dimension_numbers = #tpu.dot_dimension_numbers<[1], [0], [0], [1], [0, 0, 1, 1], [], []>} : vector<256x128xbf16>, vector<128x128xbf16>, vector<256x128xf32> -> vector<256x128xf32>
    %110 = arith.addf %103, %109 : vector<256x128xf32>
    %c1_76 = arith.constant 1 : index
    %c9_77 = arith.constant 9 : index
    %c0_78 = arith.constant 0 : index
    %111 = vector.load %arg9[%c1_76, %c9_77, %c0_78] : memref<18x32x128xf32, #tpu.memory_space<vmem>>, vector<16x16x128xf32>
    %112 = vector.shape_cast %111 : vector<16x16x128xf32> to vector<256x128xf32>
    %113 = arith.truncf %112 : vector<256x128xf32> to vector<256x128xbf16>
    %c5_79 = arith.constant 5 : index
    %c0_80 = arith.constant 0 : index
    %c0_81 = arith.constant 0 : index
    %114 = vector.load %arg4[%c5_79, %c0_80, %c0_81] : memref<9x128x128xbf16, #tpu.memory_space<vmem>>, vector<1x128x128xbf16>
    %115 = vector.shape_cast %114 : vector<1x128x128xbf16> to vector<128x128xbf16>
    %cst_82 = arith.constant dense<0.000000e+00> : vector<256x128xf32>
    %116 = tpu.matmul %113, %115, %cst_82 {dimension_numbers = #tpu.dot_dimension_numbers<[1], [0], [0], [1], [0, 0, 1, 1], [], []>} : vector<256x128xbf16>, vector<128x128xbf16>, vector<256x128xf32> -> vector<256x128xf32>
    %117 = arith.addf %110, %116 : vector<256x128xf32>
    %c2_83 = arith.constant 2 : index
    %c7_84 = arith.constant 7 : index
    %c0_85 = arith.constant 0 : index
    %118 = vector.load %arg9[%c2_83, %c7_84, %c0_85] : memref<18x32x128xf32, #tpu.memory_space<vmem>>, vector<16x16x128xf32>
    %119 = vector.shape_cast %118 : vector<16x16x128xf32> to vector<256x128xf32>
    %120 = arith.truncf %119 : vector<256x128xf32> to vector<256x128xbf16>
    %c6_86 = arith.constant 6 : index
    %c0_87 = arith.constant 0 : index
    %c0_88 = arith.constant 0 : index
    %121 = vector.load %arg4[%c6_86, %c0_87, %c0_88] : memref<9x128x128xbf16, #tpu.memory_space<vmem>>, vector<1x128x128xbf16>
    %122 = vector.shape_cast %121 : vector<1x128x128xbf16> to vector<128x128xbf16>
    %cst_89 = arith.constant dense<0.000000e+00> : vector<256x128xf32>
    %123 = tpu.matmul %120, %122, %cst_89 {dimension_numbers = #tpu.dot_dimension_numbers<[1], [0], [0], [1], [0, 0, 1, 1], [], []>} : vector<256x128xbf16>, vector<128x128xbf16>, vector<256x128xf32> -> vector<256x128xf32>
    %124 = arith.addf %117, %123 : vector<256x128xf32>
    %c2_90 = arith.constant 2 : index
    %c8_91 = arith.constant 8 : index
    %c0_92 = arith.constant 0 : index
    %125 = vector.load %arg9[%c2_90, %c8_91, %c0_92] : memref<18x32x128xf32, #tpu.memory_space<vmem>>, vector<16x16x128xf32>
    %126 = vector.shape_cast %125 : vector<16x16x128xf32> to vector<256x128xf32>
    %127 = arith.truncf %126 : vector<256x128xf32> to vector<256x128xbf16>
    %c7_93 = arith.constant 7 : index
    %c0_94 = arith.constant 0 : index
    %c0_95 = arith.constant 0 : index
    %128 = vector.load %arg4[%c7_93, %c0_94, %c0_95] : memref<9x128x128xbf16, #tpu.memory_space<vmem>>, vector<1x128x128xbf16>
    %129 = vector.shape_cast %128 : vector<1x128x128xbf16> to vector<128x128xbf16>
    %cst_96 = arith.constant dense<0.000000e+00> : vector<256x128xf32>
    %130 = tpu.matmul %127, %129, %cst_96 {dimension_numbers = #tpu.dot_dimension_numbers<[1], [0], [0], [1], [0, 0, 1, 1], [], []>} : vector<256x128xbf16>, vector<128x128xbf16>, vector<256x128xf32> -> vector<256x128xf32>
    %131 = arith.addf %124, %130 : vector<256x128xf32>
    %c2_97 = arith.constant 2 : index
    %c9_98 = arith.constant 9 : index
    %c0_99 = arith.constant 0 : index
    %132 = vector.load %arg9[%c2_97, %c9_98, %c0_99] : memref<18x32x128xf32, #tpu.memory_space<vmem>>, vector<16x16x128xf32>
    %133 = vector.shape_cast %132 : vector<16x16x128xf32> to vector<256x128xf32>
    %134 = arith.truncf %133 : vector<256x128xf32> to vector<256x128xbf16>
    %c8_100 = arith.constant 8 : index
    %c0_101 = arith.constant 0 : index
    %c0_102 = arith.constant 0 : index
    %135 = vector.load %arg4[%c8_100, %c0_101, %c0_102] : memref<9x128x128xbf16, #tpu.memory_space<vmem>>, vector<1x128x128xbf16>
    %136 = vector.shape_cast %135 : vector<1x128x128xbf16> to vector<128x128xbf16>
    %cst_103 = arith.constant dense<0.000000e+00> : vector<256x128xf32>
    %137 = tpu.matmul %134, %136, %cst_103 {dimension_numbers = #tpu.dot_dimension_numbers<[1], [0], [0], [1], [0, 0, 1, 1], [], []>} : vector<256x128xbf16>, vector<128x128xbf16>, vector<256x128xf32> -> vector<256x128xf32>
    %138 = arith.addf %131, %137 : vector<256x128xf32>
    %c0_104 = arith.constant 0 : index
    %c0_105 = arith.constant 0 : index
    %139 = vector.load %arg5[%c0_104, %c0_105] : memref<1x128xf32, #tpu.memory_space<vmem>>, vector<1x128xf32>
    %140 = vector.broadcast %139 : vector<1x128xf32> to vector<256x128xf32>
    %141 = arith.addf %138, %140 : vector<256x128xf32>
    %142 = vector.extract_strided_slice %1 {offsets = [1, 1, 0], sizes = [16, 16, 4], strides = [1, 1, 1]} : vector<18x18x4xf32> to vector<16x16x4xf32>
    %143 = vector.shape_cast %142 : vector<16x16x4xf32> to vector<256x4xf32>
    %144 = arith.truncf %143 : vector<256x4xf32> to vector<256x4xbf16>
    %c0_106 = arith.constant 0 : index
    %c0_107 = arith.constant 0 : index
    %145 = vector.load %arg6[%c0_106, %c0_107] : memref<4x128xbf16, #tpu.memory_space<vmem>>, vector<4x128xbf16>
    %cst_108 = arith.constant dense<0.000000e+00> : vector<256x128xf32>
    %146 = tpu.matmul %144, %145, %cst_108 {dimension_numbers = #tpu.dot_dimension_numbers<[1], [0], [0], [1], [0, 0, 1, 1], [], []>} : vector<256x4xbf16>, vector<4x128xbf16>, vector<256x128xf32> -> vector<256x128xf32>
    %c0_109 = arith.constant 0 : index
    %c0_110 = arith.constant 0 : index
    %147 = vector.load %arg7[%c0_109, %c0_110] : memref<1x128xf32, #tpu.memory_space<vmem>>, vector<1x128xf32>
    %148 = vector.broadcast %147 : vector<1x128xf32> to vector<256x128xf32>
    %149 = arith.addf %146, %148 : vector<256x128xf32>
    %150 = arith.addf %141, %149 : vector<256x128xf32>
    %cst_111 = arith.constant 0.000000e+00 : f32
    %151 = vector.broadcast %cst_111 : f32 to vector<256x128xf32>
    %152 = arith.maximumf %150, %151 : vector<256x128xf32>
    %153 = vector.shape_cast %152 : vector<256x128xf32> to vector<1x16x16x128xf32>
    %c0_112 = arith.constant 0 : index
    %c0_113 = arith.constant 0 : index
    %c0_114 = arith.constant 0 : index
    %c0_115 = arith.constant 0 : index
    %154 = vector.load %arg8[%c0_112, %c0_113, %c0_114, %c0_115] : memref<1x16x16x128xf32, #tpu.memory_space<vmem>>, vector<1x16x16x128xf32>
    tpu.vector_store %arg8[%c0_112, %c0_113, %c0_114, %c0_115], %153 {strides = array<i32>} : memref<1x16x16x128xf32, #tpu.memory_space<vmem>>, vector<1x16x16x128xf32>,
    return
  }
  func.func @transform_0(%arg0: i32) -> (i32, i32, i32, i32) {
    %c0_i32 = arith.constant 0 : i32
    %c0_i32_0 = arith.constant 0 : i32
    %c0_i32_1 = arith.constant 0 : i32
    %c0_i32_2 = arith.constant 0 : i32
    return %arg0, %c0_i32, %c0_i32_0, %c0_i32_1 : i32, i32, i32, i32
  }
  func.func @transform_1(%arg0: i32) -> (i32, i32, i32) {
    %c0_i32 = arith.constant 0 : i32
    %c0_i32_0 = arith.constant 0 : i32
    %c0_i32_1 = arith.constant 0 : i32
    %c0_i32_2 = arith.constant 0 : i32
    return %c0_i32, %c0_i32_0, %c0_i32_1 : i32, i32, i32
  }
  func.func @transform_2(%arg0: i32) -> (i32, i32) {
    %c0_i32 = arith.constant 0 : i32
    %c0_i32_0 = arith.constant 0 : i32
    %c0_i32_1 = arith.constant 0 : i32
    return %c0_i32, %c0_i32_0 : i32, i32
  }
  func.func @transform_3(%arg0: i32) -> (i32, i32, i32) {
    %c0_i32 = arith.constant 0 : i32
    %c0_i32_0 = arith.constant 0 : i32
    %c0_i32_1 = arith.constant 0 : i32
    %c0_i32_2 = arith.constant 0 : i32
    return %c0_i32, %c0_i32_0, %c0_i32_1 : i32, i32, i32
  }
  func.func @transform_4(%arg0: i32) -> (i32, i32) {
    %c0_i32 = arith.constant 0 : i32
    %c0_i32_0 = arith.constant 0 : i32
    %c0_i32_1 = arith.constant 0 : i32
    return %c0_i32, %c0_i32_0 : i32, i32
  }
  func.func @transform_5(%arg0: i32) -> (i32, i32) {
    %c0_i32 = arith.constant 0 : i32
    %c0_i32_0 = arith.constant 0 : i32
    %c0_i32_1 = arith.constant 0 : i32
    return %c0_i32, %c0_i32_0 : i32, i32
  }
  func.func @transform_6(%arg0: i32) -> (i32, i32) {
    %c0_i32 = arith.constant 0 : i32
    %c0_i32_0 = arith.constant 0 : i32
    %c0_i32_1 = arith.constant 0 : i32
    return %c0_i32, %c0_i32_0 : i32, i32
  }
  func.func @transform_7(%arg0: i32) -> (i32, i32, i32, i32) {
    %c0_i32 = arith.constant 0 : i32
    %c0_i32_0 = arith.constant 0 : i32
    %c0_i32_1 = arith.constant 0 : i32
    %c0_i32_2 = arith.constant 0 : i32
    return %arg0, %c0_i32, %c0_i32_0, %c0_i32_1 : i32, i32, i32, i32
  }
}

</mosaic_0001>

<bundles_post_ra>
// kernel: simple_residual_block.1
= control target key start
LH: loop header
LB: loop body
LE: loop exit
PB: predicated region body
PF: predicated region fallthrough
CT: control target
= control target key end

     0   :  { %s8120_s24 = smov 0   ;;  %s9662_s0 = inlined_call_operand.vmem [shape: f32[2,18,18,4], index: 0, kind: input, shape index: {}]   ;;  %s9663_s1 = inlined_call_operand.vmem [shape: bf16[9,4,128], index: 1, kind: input, shape index: {}]   ;;  %s9664_s2 = inlined_call_operand.vmem [shape: f32[1,128], index: 2, kind: input, shape index: {}]   ;;  %s9665_s3 = inlined_call_operand.vmem [shape: bf16[9,128,128], index: 3, kind: input, shape index: {}]   ;;  %s9666_s4 = inlined_call_operand.vmem [shape: f32[1,128], index: 4, kind: input, shape index: {}]   ;;  %s9667_s5 = inlined_call_operand.vmem [shape: bf16[4,128], index: 5, kind: input, shape index: {}]   ;;  %s9668_s6 = inlined_call_operand.vmem [shape: f32[1,128], index: 6, kind: input, shape index: {}]   ;;  %s9669_s7 = inlined_call_operand.vmem [shape: f32[2,16,16,128], index: 7, kind: output, shape index: {}]  }
   0x1 LB: > { %s5805_s25 = sadd.s32 4294967295, %s8076_s24   ;;  %p5809_p0 = scmp.ge.s32.totalorder %s8076_s24, 1  ;;  %s8076_s24 = sphi %s8120_s24, %s17_s24  }
   0x2   : > { %p237_p1 = scmp.lt.s32.totalorder %s8076_s24, 3 }
   0x4   : > { %p238_p2 = pnand %p5809_p0, %p237_p1 }
   0x6   : > { %241 = sbr.rel (%p238_p2) target bundleno = 1572 (0x624), region = 48 }
   0xd   : > { %v5813_v0 = vld [vmem:[%s9663_s1 + $0x2] sm:$0x3]  ;;  %vm579_vm0 = vcmask 1041408   ;;  %p269_p3 = scmp.lt.s32.totalorder %s5805_s25, 1  ;;  %v350_v2 = vld [vmem:[%s9663_s1] sm:$0x3] }
   0xe   : > { %7969 = vmatprep.subr.msk.bf16.mxu0 %vm579_vm0, %v5813_v0  ;;  %v581_v1 = vsel %vm579_vm0, %v5813_v0, 0  ;;  %vm399_vm1 = vcmask 1046528   ;;  %vm530_vm2 = vcmask 31744   ;;  %v793_v23 = vsel %vm579_vm0, %v350_v2, 0  ;;  %v8224_v44 = vld [vmem:[%s9663_s1 + $0x4] sm:$0x3] }
   0xf   : > { %6574 = vmatpush3.bf16.msra.mxu0 %v581_v1  ;;  %s9771_s25 = smov (!%p269_p3, %s5805_s25), 1  ;;  %9703 = vst [vmem:[#allocation6_spill] sm:$0xff] %v8224_v44  ;;  %vm956_vm3 = vcmask 1045504  }
  0x10   : > { %7970 = vmatprep.subr.msk.bf16.mxu0 %vm579_vm0, %v350_v2  ;;  %s7979_s30 = smul.u32 432, %s9771_s25  ;;  %s6186_s27 = sshll.u32 %s9771_s25, 8 }
  0x11   : > { %s9580_s25 = scalar_lea.vmem %s9669_s7, %s6186_s27 }
  0x12   : > { %s8143_s10 = scalar_lea.vmem %s9662_s0, %s7979_s30 }
  0x13   : > { %v8146_v3 = vld [vmem:[%s8143_s10] sm:$0xff]  ;;  %v8149_v4 = vld [vmem:[%s8143_s10 + $0x8] sm:$0xff]  ;;  %v8152_v5 = vld [vmem:[%s8143_s10 + $0x10] sm:$0x3] }
  0x14   : > { %v400_v6 = vrot.slane %v8146_v3, 1  ;;  %v401_v7 = vrot.slane %v8149_v4, 1  ;;  %v403_v8 = vrot.slane %v8152_v5, 1  ;;  %v8158_v9 = vld [vmem:[%s8143_s10 + $0x18] sm:$0xff]  ;;  %v8161_v10 = vld [vmem:[%s8143_s10 + $0x20] sm:$0xff]  ;;  %v8172_v17 = vld [vmem:[%s8143_s10 + $0x30] sm:$0xff] }
  0x15   : > { %v8164_v11 = vld [vmem:[%s8143_s10 + $0x28] sm:$0x3]  ;;  %v405_v12 = vrot.slane %v8158_v9, 1  ;;  %v406_v13 = vrot.slane %v8161_v10, 1  ;;  %v8175_v18 = vld [vmem:[%s8143_s10 + $0x38] sm:$0xff]  ;;  %v8187_v25 = vld [vmem:[%s8143_s10 + $0x50] sm:$0xff] }
  0x16   : > { %v402_v14 = vsel %vm399_vm1, %v400_v6, %v401_v7  ;;  %v404_v15 = vsel %vm399_vm1, %v401_v7, %v403_v8  ;;  %v408_v16 = vrot.slane %v8164_v11, 1  ;;  %v8178_v19 = vld [vmem:[%s8143_s10 + $0x40] sm:$0x3]  ;;  %v8184_v24 = vld [vmem:[%s8143_s10 + $0x48] sm:$0xff]  ;;  %v8190_v26 = vld [vmem:[%s8143_s10 + $0x58] sm:$0x3] }
  0x17   : > { %v512_v20 = vpack.c.bf16 %v404_v15, %v402_v14  ;;  %v407_v22 = vsel %vm399_vm1, %v405_v12, %v406_v13  ;;  %9700 = vst [vmem:[#allocation3_spill] sm:$0xff] %v8190_v26  ;;  %v410_v28 = vrot.slane %v8172_v17, 1  ;;  %v411_v29 = vrot.slane %v8175_v18, 1  ;;  %v8197_v31 = vld [vmem:[%s8143_s10 + $0x60] sm:$0xff]  ;;  %v8200_v32 = vld [vmem:[%s8143_s10 + $0x68] sm:$0xff]  ;;  %v8216_v42 = vld [vmem:[%s8143_s10 + $0x78] sm:$0xff] }
  0x18   : > { %v409_v27 = vsel %vm399_vm1, %v406_v13, %v408_v16  ;;  %v413_v30 = vrot.slane %v8178_v19, 1  ;;  %v415_v34 = vrot.slane %v8184_v24, 1  ;;  %v416_v35 = vrot.slane %v8187_v25, 1  ;;  %v8209_v37 = vld [vmem:[%s8143_s10 + $0x70] sm:$0x3]  ;;  %v8219_v43 = vld [vmem:[%s8143_s10 + $0x80] sm:$0xff] }
  0x19   : > { %6575 = vmatprep.mubr.msk.bf16.mxu0 %vm530_vm2, %v512_v20  ;;  %v8203_v33 = vpack.c.bf16 %v409_v27, %v407_v22  ;;  %v418_v36 = vrot.slane %v8190_v26, 1  ;;  %9702 = vst [vmem:[#allocation5_spill] sm:$0xff] %v8209_v37  ;;  %v412_v38 = vsel %vm399_vm1, %v410_v28, %v411_v29  ;;  %v420_v40 = vrot.slane %v8197_v31, 1  ;;  %v8233_v48 = vld [vmem:[%s8143_s10 + $0x88] sm:$0x3]  ;;  %v8236_v49 = vld [vmem:[%s8143_s10 + $0x90] sm:$0xff] }
  0x1a   : > { %v414_v39 = vsel %vm399_vm1, %v411_v29, %v413_v30  ;;  %v421_v41 = vrot.slane %v8200_v32, 1  ;;  %v423_v47 = vrot.slane %v8209_v37, 1  ;;  %9705 = vst [vmem:[#allocation8_spill] sm:$0xff] %v8233_v48  ;;  %v8239_v50 = vld [vmem:[%s8143_s10 + $0x98] sm:$0xff]  ;;  %v417_v53 = vsel %vm399_vm1, %v415_v34, %v416_v35  ;;  %v8246_v55 = vld [vmem:[%s8143_s10 + $0xa0] sm:$0x3] }
  0x1b   : > { %9701 = vst [vmem:[#allocation4_spill] sm:$0xff] %v8203_v33  ;;  %6576 = vmatmul.mubr.msk.bf16.vlgmr.msra.gmra.mrb[0].mxu0 %vm530_vm2, %v8203_v33  ;;  %v8229_v46 = vpack.c.bf16 %v414_v39, %v412_v38  ;;  %v419_v54 = vsel %vm399_vm1, %v416_v35, %v418_v36  ;;  %9706 = vst [vmem:[#allocation9_spill] sm:$0xff] %v8246_v55  ;;  %v425_v58 = vrot.slane %v8216_v42, 1  ;;  %v426_v59 = vrot.slane %v8219_v43, 1  ;;  %v8255_v60 = vld [vmem:[%s8143_s10 + $0xa8] sm:$0xff]  ;;  %v8258_v61 = vld [vmem:[%s8143_s10 + $0xb0] sm:$0xff] }
  0x1c   : > { %6608 = vmatpush3.bf16.msra.mxu0 %v793_v23  ;;  %v422_v56 = vsel %vm399_vm1, %v420_v40, %v421_v41  ;;  %v424_v57 = vsel %vm399_vm1, %v421_v41, %v423_v47  ;;  %v428_v62 = vrot.slane %v8233_v48, 1  ;;  %v430_v63 = vrot.slane %v8236_v49, 1  ;;  %v8266_v1 = vld [vmem:[%s8143_s10 + $0xb8] sm:$0x3]  ;;  %v8269_v2 = vld [vmem:[%s8143_s10 + $0xc0] sm:$0xff]  ;;  %v8276_v12 = vld [vmem:[%s8143_s10 + $0xc8] sm:$0xff] }
  0x1d   : > { %9704 = vst [vmem:[#allocation7_spill] sm:$0xff] %v8229_v46  ;;  %6579 = vmatprep.mubr.msk.bf16.mxu0 %vm530_vm2, %v8229_v46  ;;  %7971 = vmatprep.subr.msk.bf16.mxu0 %vm579_vm0, %v8224_v44  ;;  %v431_v0 = vrot.slane %v8239_v50, 1  ;;  %9707 = vst [vmem:[#allocation10_spill] sm:$0xff] %v8266_v1  ;;  %v8272_v7 = vpack.c.bf16 %v419_v54, %v417_v53  ;;  %v433_v8 = vrot.slane %v8246_v55, 1  ;;  %v8279_v13 = vld [vmem:[%s8143_s10 + $0xd0] sm:$0x3] }
  0x1e   : > { %9709 = vst [vmem:[#allocation12_spill] sm:$0xff] %v8279_v13  ;;  %v8282_v14 = vld [vmem:[%s8143_s10 + $0xd8] sm:$0xff]  ;;  %v8285_v16 = vpack.c.bf16 %v424_v57, %v422_v56  ;;  %v435_v20 = vrot.slane %v8255_v60, 1  ;;  %v8289_v22 = vld [vmem:[%s8143_s10 + $0xe0] sm:$0xff]  ;;  %v8292_v23 = vld [vmem:[%s8143_s10 + $0xe8] sm:$0x3]  ;;  %v427_v28 = vsel %vm399_vm1, %v425_v58, %v426_v59  ;;  %v429_v38 = vsel %vm399_vm1, %v426_v59, %v428_v62 }
  0x1f   : > { %9708 = vst [vmem:[#allocation11_spill] sm:$0xff] %v8272_v7  ;;  %9711 = vst [vmem:[#allocation14_spill] sm:$0xff] %v8292_v23  ;;  %v8295_v27 = vld [vmem:[%s8143_s10 + $0xf0] sm:$0xff]  ;;  %v436_v29 = vrot.slane %v8258_v61, 1  ;;  %v438_v30 = vrot.slane %v8266_v1, 1  ;;  %v8301_v34 = vld [vmem:[%s8143_s10 + $0xf8] sm:$0xff]  ;;  %v432_v39 = vsel %vm399_vm1, %v430_v63, %v431_v0  ;;  %v434_v56 = vsel %vm399_vm1, %v431_v0, %v433_v8 }
  0x20   : > { %9710 = vst [vmem:[#allocation13_spill] sm:$0xff] %v8285_v16  ;;  %v8304_v35 = vld [vmem:[%s8143_s10 + $0x100] sm:$0x3]  ;;  %v8307_v36 = vld [vmem:[%s8143_s10 + $0x108] sm:$0xff]  ;;  %v440_v40 = vrot.slane %v8269_v2, 1  ;;  %v441_v41 = vrot.slane %v8276_v12, 1  ;;  %v8348_v21 = vpack.c.bf16 %v429_v38, %v427_v28  ;;  %v8359_v44 = vpack.c.bf16 %v434_v56, %v432_v39 }
  0x21   : > { %9712 = vst [vmem:[#allocation15_spill] sm:$0xff] %v8304_v35  ;;  %v8314_v47 = vld [vmem:[%s8143_s10 + $0x110] sm:$0xff]  ;;  %v8317_v53 = vld [vmem:[%s8143_s10 + $0x118] sm:$0x3]  ;;  %v8320_v54 = vld [vmem:[%s8143_s10 + $0x120] sm:$0xff]  ;;  %v443_v57 = vrot.slane %v8279_v13, 1 }
  0x22   : > { %9713 = vst [vmem:[#allocation16_spill] sm:$0xff] %v8317_v53  ;;  %v445_v58 = vrot.slane %v8282_v14, 1  ;;  %v446_v59 = vrot.slane %v8289_v22, 1  ;;  %v8329_v62 = vld [vmem:[%s8143_s10 + $0x128] sm:$0xff]  ;;  %v8332_v63 = vld [vmem:[%s8143_s10 + $0x130] sm:$0x3]  ;;  %v442_v1 = vsel %vm399_vm1, %v440_v40, %v441_v41 }
  0x23   : > { %6580 = vmatmul.mubr.msk.bf16.gmra.mrb[4].mxu0 %vm530_vm2, %v8272_v7  ;;  %9714 = vst [vmem:[#allocation17_spill] sm:$0xff] %v8332_v63  ;;  %v448_v15 = vrot.slane %v8292_v23, 1  ;;  %v450_v0 = vrot.slane %v8295_v27, 1  ;;  %v451_v8 = vrot.slane %v8301_v34, 1  ;;  %v8340_v52 = vld [vmem:[%s8143_s10 + $0x138] sm:$0xff]  ;;  %v8343_v6 = vld [vmem:[%s8143_s10 + $0x140] sm:$0xff]  ;;  %v437_v23 = vsel %vm399_vm1, %v435_v20, %v436_v29 }
  0x24   : > { %6583 = vmatprep.mubr.msk.bf16.mxu0 %vm530_vm2, %v8285_v16  ;;  %v8346_v51 = vld [vmem:[%s8143_s10 + $0x148] sm:$0x3]  ;;  %9715 = vst [vmem:[#allocation18_spill] sm:$0xff] %v8348_v21  ;;  %v453_v45 = vrot.slane %v8304_v35, 1  ;;  %v455_v7 = vrot.slane %v8307_v36, 1  ;;  %v456_v16 = vrot.slane %v8314_v47, 1  ;;  %v439_v35 = vsel %vm399_vm1, %v436_v29, %v438_v30 }
  0x25   : > { %v8354_v46 = vld [vmem:[%s8143_s10 + $0x150] sm:$0xff]  ;;  %v8357_v33 = vld [vmem:[%s8143_s10 + $0x158] sm:$0xff]  ;;  %9716 = vst [vmem:[#allocation19_spill] sm:$0xff] %v8359_v44  ;;  %v458_v13 = vrot.slane %v8317_v53, 1  ;;  %v460_v28 = vrot.slane %v8320_v54, 1  ;;  %v461_v55 = vrot.slane %v8329_v62, 1  ;;  %v444_v39 = vsel %vm399_vm1, %v441_v41, %v443_v57 }
  0x26   : > { %v8365_v38 = vld [vmem:[%s8143_s10 + $0x160] sm:$0x3]  ;;  %v463_v48 = vrot.slane %v8332_v63, 1  ;;  %v447_v56 = vsel %vm399_vm1, %v445_v58, %v446_v59  ;;  %v449_v20 = vsel %vm399_vm1, %v446_v59, %v448_v15  ;;  %v452_v53 = vsel %vm399_vm1, %v450_v0, %v451_v8  ;;  %v8376_v37 = vld [vmem:[%s8143_s10 + $0x168] sm:$0xff] }
  0x27   : > { %v454_v26 = vsel %vm399_vm1, %v451_v8, %v453_v45  ;;  %v457_v63 = vsel %vm399_vm1, %v455_v7, %v456_v16  ;;  %v459_v41 = vsel %vm399_vm1, %v456_v16, %v458_v13  ;;  %v462_v45 = vsel %vm399_vm1, %v460_v28, %v461_v55 }
  0x28   : > { %v464_v58 = vsel %vm399_vm1, %v461_v55, %v463_v48  ;;  %v8394_v7 = vpack.c.bf16 %v439_v35, %v437_v23  ;;  %v8396_v13 = vpack.c.bf16 %v444_v39, %v442_v1  ;;  %v8400_v16 = vpack.c.bf16 %v8161_v10, %v8158_v9  ;;  %v8409_v55 = vld [vmem:[%s8143_s10 + $0x170] sm:$0xff] }
  0x29   : > { %v8402_v8 = vpack.c.bf16 %v449_v20, %v447_v56  ;;  %v8404_v28 = vpack.c.bf16 %v454_v26, %v452_v53  ;;  %v8406_v48 = vpack.c.bf16 %v459_v41, %v457_v63  ;;  %v8413_v0 = vpack.c.bf16 %v8175_v18, %v8172_v17 }
  0x2a   : > { %9717 = vst [vmem:[#allocation20_spill] sm:$0xff] %v8396_v13  ;;  %v8415_v23 = vpack.c.bf16 %v464_v58, %v462_v45  ;;  %v8419_v1 = vpack.c.bf16 %v8187_v25, %v8184_v24  ;;  %v8423_v35 = vpack.c.bf16 %v8200_v32, %v8197_v31  ;;  %v8427_v26 = vpack.c.bf16 %v8219_v43, %v8216_v42 }
  0x2b   : > { %6584 = vmatmul.mubr.msk.bf16.gmra.mrb[8].mxu0 %vm530_vm2, %v8348_v21  ;;  %v8431_v53 = vpack.c.bf16 %v8239_v50, %v8236_v49  ;;  %v8435_v63 = vpack.c.bf16 %v8258_v61, %v8255_v60  ;;  %v8439_v39 = vpack.c.bf16 %v8276_v12, %v8269_v2  ;;  %v8443_v56 = vpack.c.bf16 %v8289_v22, %v8282_v14 }
  0x2c   : > { %6587 = vmatprep.mubr.msk.bf16.mxu0 %vm530_vm2, %v8359_v44  ;;  %v8447_v20 = vpack.c.bf16 %v8301_v34, %v8295_v27  ;;  %v8451_v41 = vpack.c.bf16 %v8314_v47, %v8307_v36  ;;  %v8455_v45 = vpack.c.bf16 %v8329_v62, %v8320_v54  ;;  %v8459_v58 = vpack.c.bf16 %v8343_v6, %v8340_v52 }
  0x2d   : > { %v8463_v59 = vpack.c.bf16 %v8357_v33, %v8354_v46  ;;  %v8467_v57 = vpack.c.bf16 %v8409_v55, %v8376_v37  ;;  %v9723_v15 = vrot.slane %v8149_v4, 2  ;;  %v9724_v40 = vrot.slane %v8146_v3, 2 }
  0x2e   : > { %9718 = vst [vmem:[#allocation21_spill] sm:$0xff] %v8451_v41  ;;  %9719 = vst [vmem:[#allocation22_spill] sm:$0xff] %v8455_v45  ;;  %v9725_v30 = vrot.slane %v8152_v5, 2  ;;  %v9728_v45 = vrot.slane %v8158_v9, 2  ;;  %v972_v9 = vrot.slane %v8184_v24, 2 }
  0x2f   : > { %9720 = vst [vmem:[#allocation23_spill] sm:$0xff] %v8459_v58  ;;  %9721 = vst [vmem:[#allocation24_spill] sm:$0xff] %v8463_v59  ;;  %v8474_v29 = vsel %vm956_vm3, %v9724_v40, %v9723_v15  ;;  %v9726_v44 = vmov %v9723_v15  ;;  %v9729_v40 = vrot.slane %v8164_v11, 2  ;;  %v968_v58 = vrot.slane %v8175_v18, 2  ;;  %v9731_v11 = vld [vmem:[#allocation3_spill] sm:$0xff]  ;;  %v9732_v18 = vld [vmem:[#allocation5_spill] sm:$0xff] }
  0x30   : > { %9722 = vst [vmem:[#allocation25_spill] sm:$0xff] %v8467_v57  ;;  %v8481_v21 = vsel %vm956_vm3, %v9726_v44, %v9725_v30  ;;  %v9727_v57 = vrot.slane %v8161_v10, 2  ;;  %v967_v30 = vrot.slane %v8172_v17, 2  ;;  %v970_v59 = vrot.slane %v8178_v19, 2 }
  0x31   : > { %v973_v10 = vrot.slane %v8187_v25, 2  ;;  %v978_v17 = vrot.slane %v8200_v32, 2  ;;  %v982_v25 = vrot.slane %v8216_v42, 2  ;;  %v9733_v32 = vld [vmem:[#allocation8_spill] sm:$0xff]  ;;  %v9734_v42 = vld [vmem:[#allocation9_spill] sm:$0xff] }
  0x32   : > { %v964_v41 = vsel %vm956_vm3, %v9728_v45, %v9727_v57  ;;  %v9730_v5 = vmov %v9727_v57  ;;  %v975_v57 = vrot.slane %v9731_v11, 2  ;;  %v977_v45 = vrot.slane %v8197_v31, 2 }
  0x33   : > { %v966_v15 = vsel %vm956_vm3, %v9730_v5, %v9729_v40  ;;  %6588 = vmatmul.mubr.msk.bf16.gmra.mrb[12].mxu0 %vm530_vm2, %v8394_v7  ;;  %v971_v40 = vsel %vm956_vm3, %v968_v58, %v970_v59  ;;  %v980_v5 = vrot.slane %v9732_v18, 2  ;;  %v983_v59 = vrot.slane %v8219_v43, 2  ;;  %v9735_v18 = vld [vmem:[#allocation10_spill] sm:$0xff] }
  0x34   : > { %v8498_v44 = vpack.c.bf16 %v966_v15, %v964_v41  ;;  %6591 = vmatprep.mubr.msk.bf16.mxu0 %vm530_vm2, %v8396_v13  ;;  %v969_v41 = vsel %vm956_vm3, %v967_v30, %v968_v58  ;;  %v974_v15 = vsel %vm956_vm3, %v972_v9, %v973_v10  ;;  %v976_v24 = vsel %vm956_vm3, %v973_v10, %v975_v57 }
  0x35   : > { %v8513_v19 = vpack.c.bf16 %v971_v40, %v969_v41  ;;  %v8518_v13 = vpack.c.bf16 %v976_v24, %v974_v15  ;;  %v979_v31 = vsel %vm956_vm3, %v977_v45, %v978_v17  ;;  %v981_v30 = vsel %vm956_vm3, %v978_v17, %v980_v5 }
  0x36   : > { %v8523_v58 = vpack.c.bf16 %v981_v30, %v979_v31  ;;  %v985_v11 = vrot.slane %v9733_v32, 2  ;;  %v987_v41 = vrot.slane %v8236_v49, 2  ;;  %v988_v9 = vrot.slane %v8239_v50, 2  ;;  %v9736_v31 = vld [vmem:[#allocation12_spill] sm:$0xff] }
  0x37   : > { %v984_v10 = vsel %vm956_vm3, %v982_v25, %v983_v59  ;;  %v990_v57 = vrot.slane %v9734_v42, 2  ;;  %v992_v40 = vrot.slane %v8255_v60, 2  ;;  %v993_v45 = vrot.slane %v8258_v61, 2  ;;  %v8546_v61 = vld [vmem:[%s8143_s10 + $0x178] sm:$0x3] }
  0x38   : > { %v986_v17 = vsel %vm956_vm3, %v983_v59, %v985_v11  ;;  %v989_v43 = vsel %vm956_vm3, %v987_v41, %v988_v9  ;;  %v995_v5 = vrot.slane %v9735_v18, 2  ;;  %v997_v15 = vrot.slane %v8269_v2, 2 }
  0x39   : > { %v8538_v49 = vpack.c.bf16 %v986_v17, %v984_v10  ;;  %v991_v50 = vsel %vm956_vm3, %v988_v9, %v990_v57  ;;  %v994_v24 = vsel %vm956_vm3, %v992_v40, %v993_v45  ;;  %v998_v60 = vrot.slane %v8276_v12, 2  ;;  %v9737_v12 = vld [vmem:[#allocation14_spill] sm:$0xff]  ;;  %v9738_v40 = vld [vmem:[#allocation15_spill] sm:$0xff] }
  0x3a   : > { %v8548_v25 = vpack.c.bf16 %v991_v50, %v989_v43  ;;  %v996_v2 = vsel %vm956_vm3, %v993_v45, %v995_v5  ;;  %v1000_v30 = vrot.slane %v9736_v31, 2  ;;  %v1002_v59 = vrot.slane %v8282_v14, 2 }
  0x3b   : > { %6592 = vmatmul.mubr.msk.bf16.gmra.mrb[16].mxu0 %vm530_vm2, %v8402_v8  ;;  %v8553_v32 = vpack.c.bf16 %v996_v2, %v994_v24  ;;  %v999_v11 = vsel %vm956_vm3, %v997_v15, %v998_v60  ;;  %v1003_v41 = vrot.slane %v8289_v22, 2  ;;  %v1005_v9 = vrot.slane %v9737_v12, 2  ;;  %v9739_v24 = vld [vmem:[#allocation16_spill] sm:$0xff] }
  0x3c   : > { %6595 = vmatprep.mubr.msk.bf16.mxu0 %vm530_vm2, %v8404_v28  ;;  %v1001_v10 = vsel %vm956_vm3, %v998_v60, %v1000_v30  ;;  %v1007_v42 = vrot.slane %v8295_v27, 2  ;;  %v1008_v57 = vrot.slane %v8301_v34, 2  ;;  %v1010_v45 = vrot.slane %v9738_v40, 2 }
  0x3d   : > { %v8562_v17 = vpack.c.bf16 %v1001_v10, %v999_v11  ;;  %v1004_v14 = vsel %vm956_vm3, %v1002_v59, %v1003_v41  ;;  %v1006_v43 = vsel %vm956_vm3, %v1003_v41, %v1005_v9  ;;  %v1012_v18 = vrot.slane %v8307_v36, 2  ;;  %v9744_v10 = vld [vmem:[#allocation17_spill] sm:$0xff] }
  0x3e   : > { %v8567_v5 = vpack.c.bf16 %v1006_v43, %v1004_v14  ;;  %v1009_v22 = vsel %vm956_vm3, %v1007_v42, %v1008_v57  ;;  %v1011_v15 = vsel %vm956_vm3, %v1008_v57, %v1010_v45  ;;  %v1013_v27 = vrot.slane %v8314_v47, 2 }
  0x3f   : > { %v478_v34 = vrot.slane %v8546_v61, 1  ;;  %v8573_v50 = vpack.c.bf16 %v1011_v15, %v1009_v22  ;;  %v1015_v60 = vrot.slane %v9739_v24, 2  ;;  %v9740_v2 = vrot.slane %v8343_v6, 1 }
  0x40   : > { %v9741_v31 = vrot.slane %v8340_v52, 1  ;;  %v9742_v30 = vrot.slane %v8346_v51, 1  ;;  %v1014_v47 = vsel %vm956_vm3, %v1012_v18, %v1013_v27  ;;  %v1017_v12 = vrot.slane %v8320_v54, 2 }
  0x41   : > { %v9743_v59 = vmov %v9740_v2  ;;  %v1016_v41 = vsel %vm956_vm3, %v1013_v27, %v1015_v60  ;;  %v1018_v9 = vrot.slane %v8329_v62, 2  ;;  %v1020_v42 = vrot.slane %v9744_v10, 2 }
  0x42   : > { %v467_v36 = vsel %vm399_vm1, %v9741_v31, %v9740_v2  ;;  %v469_v11 = vsel %vm399_vm1, %v9743_v59, %v9742_v30  ;;  %v8595_v57 = vpack.c.bf16 %v1016_v41, %v1014_v47  ;;  %v1022_v40 = vrot.slane %v8340_v52, 2 }
  0x43   : > { %6596 = vmatmul.mubr.msk.bf16.gmra.mrb[20].mxu0 %vm530_vm2, %v8406_v48  ;;  %v1023_v45 = vrot.slane %v8343_v6, 2  ;;  %v1025_v14 = vrot.slane %v8346_v51, 2  ;;  %v9745_v43 = vrot.slane %v8357_v33, 1  ;;  %v9746_v18 = vrot.slane %v8354_v46, 1 }
  0x44   : > { %6599 = vmatprep.mubr.msk.bf16.mxu0 %vm530_vm2, %v8415_v23  ;;  %v9747_v62 = vrot.slane %v8365_v38, 1  ;;  %v1019_v27 = vsel %vm956_vm3, %v1017_v12, %v1018_v9  ;;  %v1021_v52 = vsel %vm956_vm3, %v1018_v9, %v1020_v42  ;;  %v8616_v60 = vpack.c.bf16 %v469_v11, %v467_v36 }
  0x45   : > { %v472_v54 = vsel %vm399_vm1, %v9746_v18, %v9745_v43  ;;  %v9748_v22 = vmov %v9745_v43  ;;  %v8612_v24 = vpack.c.bf16 %v1021_v52, %v1019_v27  ;;  %v1024_v51 = vsel %vm956_vm3, %v1022_v40, %v1023_v45  ;;  %v5880_v52 = vld [vmem:[%s9663_s1 + $0x8] sm:$0x3] }
  0x46   : > { %v474_v15 = vsel %vm399_vm1, %v9748_v22, %v9747_v62  ;;  %v1026_v6 = vsel %vm956_vm3, %v1023_v45, %v1025_v14  ;;  %v9749_v30 = vrot.slane %v8409_v55, 1  ;;  %v9750_v59 = vrot.slane %v8376_v37, 1  ;;  %v9756_v62 = vld [vmem:[#allocation24_spill] sm:$0xff]  ;;  %v9757_v22 = vld [vmem:[#allocation25_spill] sm:$0xff] }
  0x47   : > { %v8618_v2 = vpack.c.bf16 %v1026_v6, %v1024_v51  ;;  %v8620_v31 = vpack.c.bf16 %v474_v15, %v472_v54  ;;  %v1027_v41 = vrot.slane %v8354_v46, 2  ;;  %v1028_v12 = vrot.slane %v8357_v33, 2  ;;  %v9755_v54 = vld [vmem:[#allocation23_spill] sm:$0xff]  ;;  %v329_v51 = vld [vmem:[%s8143_s10 + $0x188] sm:$0xff] }
  0x48   : > { %v477_v47 = vsel %vm399_vm1, %v9750_v59, %v9749_v30  ;;  %v1030_v36 = vrot.slane %v8365_v38, 2  ;;  %v9751_v11 = vmov %v9749_v30  ;;  %v1032_v10 = vrot.slane %v8376_v37, 2  ;;  %v330_v59 = vld [vmem:[%s8143_s10 + $0x190] sm:$0x3] }
  0x49   : > { %v479_v9 = vsel %vm399_vm1, %v9751_v11, %v478_v34  ;;  %v1033_v42 = vrot.slane %v8409_v55, 2  ;;  %v1035_v40 = vrot.slane %v8546_v61, 2  ;;  %v1029_v45 = vsel %vm956_vm3, %v1027_v41, %v1028_v12  ;;  %v9752_v55 = vld [vmem:[#allocation6_spill] sm:$0xff]  ;;  %v5863_v34 = vld [vmem:[%s9663_s1 + $0x6] sm:$0x3] }
  0x4a   : > { %v1031_v46 = vsel %vm956_vm3, %v1028_v12, %v1030_v36  ;;  %v8646_v43 = vpack.c.bf16 %v479_v9, %v477_v47  ;;  %v334_v37 = vpack.c.bf16 %v8149_v4, %v8146_v3  ;;  %v1136_v61 = vsel %vm579_vm0, %v9752_v55, 0  ;;  %v9753_v3 = vld [vmem:[#allocation21_spill] sm:$0xff]  ;;  %v9754_v4 = vld [vmem:[#allocation22_spill] sm:$0xff]  ;;  %v9759_v9 = vld [vmem:[#allocation4_spill] sm:$0xff] }
  0x4b   : > { %6600 = vmatmul.mubr.msk.bf16.gmra.mrb[24].mxu0 %vm530_vm2, %v8616_v60  ;;  %v8642_v33 = vpack.c.bf16 %v1031_v46, %v1029_v45  ;;  %v1034_v38 = vsel %vm956_vm3, %v1032_v10, %v1033_v42  ;;  %v1036_v14 = vsel %vm956_vm3, %v1033_v42, %v1035_v40  ;;  %v9758_v15 = vpack.c.bf16 %v8481_v21, %v8474_v29  ;;  %v5897_v29 = vld [vmem:[%s9663_s1 + $0xa] sm:$0x3]  ;;  %v5914_v42 = vld [vmem:[%s9663_s1 + $0xc] sm:$0x3]  ;;  %v9760_v40 = vld [vmem:[#allocation7_spill] sm:$0xff] }
  0x4c   : > { %6603 = vmatprep.mubr.msk.bf16.mxu0 %vm530_vm2, %v8620_v31  ;;  %v8648_v18 = vpack.c.bf16 %v1036_v14, %v1034_v38  ;;  %v1338_v27 = vsel %vm579_vm0, %v5863_v34, 0  ;;  %v1550_v21 = vsel %vm579_vm0, %v5880_v52, 0  ;;  %v1746_v30 = vrot.slane %v329_v51, 2  ;;  %v9761_v45 = vld [vmem:[#allocation11_spill] sm:$0xff]  ;;  %v9762_v46 = vld [vmem:[#allocation13_spill] sm:$0xff]  ;;  %v9763_v38 = vld [vmem:[#allocation18_spill] sm:$0xff] }
  0x4d   : > { %v1748_v41 = vrot.slane %v330_v59, 2  ;;  %v1759_v10 = vsel %vm579_vm0, %v5897_v29, 0  ;;  %v9764_v14 = vld [vmem:[#allocation19_spill] sm:$0xff] }
  0x4f   : > { %v1749_v12 = vsel %vm956_vm3, %v1746_v30, %v1748_v41 }
  0x53   : > { %6604 = vmatmul.mubr.msk.bf16.gmra.mrb[28].mxu0 %vm530_vm2, %v8646_v43 }
  0x54   : > { %6609 = vmatprep.mubr.msk.bf16.mxu0 %vm530_vm2, %v334_v37  ;;  %v9765_v37 = vld [vmem:[#allocation20_spill] sm:$0xff] }
  0x5b   : > { %6610 = vmatmul.mubr.msk.bf16.vlgmr.msra.gmra.mrb[0].mxu0 %vm530_vm2, %v8400_v16 }
  0x5c   : > { %6642 = vmatpush3.bf16.msra.mxu0 %v1136_v61  ;;  %6613 = vmatprep.mubr.msk.bf16.mxu0 %vm530_vm2, %v8413_v0  ;;  %v1537_v61 = vrot.slane %v329_v51, 1 }
  0x5d   : > { %7972 = vmatprep.subr.msk.bf16.mxu0 %vm579_vm0, %v5863_v34  ;;  %v1539_v34 = vrot.slane %v330_v59, 1 }
  0x63   : > { %6614 = vmatmul.mubr.msk.bf16.gmra.mrb[4].mxu0 %vm530_vm2, %v8419_v1 }
  0x64   : > { %6617 = vmatprep.mubr.msk.bf16.mxu0 %vm530_vm2, %v8423_v35 }
  0x6b   : > { %6618 = vmatmul.mubr.msk.bf16.gmra.mrb[8].mxu0 %vm530_vm2, %v8427_v26 }
  0x6c   : > { %6621 = vmatprep.mubr.msk.bf16.mxu0 %vm530_vm2, %v8431_v53 }
  0x73   : > { %6622 = vmatmul.mubr.msk.bf16.gmra.mrb[12].mxu0 %vm530_vm2, %v8435_v63 }
  0x74   : > { %6625 = vmatprep.mubr.msk.bf16.mxu0 %vm530_vm2, %v8439_v39 }
  0x7b   : > { %6626 = vmatmul.mubr.msk.bf16.gmra.mrb[16].mxu0 %vm530_vm2, %v8443_v56 }
  0x7c   : > { %6629 = vmatprep.mubr.msk.bf16.mxu0 %vm530_vm2, %v8447_v20 }
  0x83   : > { %6630 = vmatmul.mubr.msk.bf16.gmra.mrb[20].mxu0 %vm530_vm2, %v9753_v3 }
  0x84   : > { %6633 = vmatprep.mubr.msk.bf16.mxu0 %vm530_vm2, %v9754_v4 }
  0x8b   : > { %6634 = vmatmul.mubr.msk.bf16.gmra.mrb[24].mxu0 %vm530_vm2, %v9755_v54 }
  0x8c   : > { %6637 = vmatprep.mubr.msk.bf16.mxu0 %vm530_vm2, %v9756_v62 }
  0x93   : > { %6638 = vmatmul.mubr.msk.bf16.gmra.mrb[28].mxu0 %vm530_vm2, %v9757_v22 }
  0x94   : > { %6643 = vmatprep.mubr.msk.bf16.mxu0 %vm530_vm2, %v9758_v15 }
  0x9b   : > { %6644 = vmatmul.mubr.msk.bf16.vlgmr.msra.gmra.mrb[0].mxu0 %vm530_vm2, %v8498_v44 }
  0x9c   : > { %6676 = vmatpush3.bf16.msra.mxu0 %v1338_v27  ;;  %6647 = vmatprep.mubr.msk.bf16.mxu0 %vm530_vm2, %v8513_v19  ;;  %v1540_v27 = vsel %vm399_vm1, %v1537_v61, %v1539_v34 }
  0x9d   : > { %7973 = vmatprep.subr.msk.bf16.mxu0 %vm579_vm0, %v5880_v52 }
  0xa3   : > { %6648 = vmatmul.mubr.msk.bf16.gmra.mrb[4].mxu0 %vm530_vm2, %v8518_v13 }
  0xa4   : > { %6651 = vmatprep.mubr.msk.bf16.mxu0 %vm530_vm2, %v8523_v58 }
  0xab   : > { %6652 = vmatmul.mubr.msk.bf16.gmra.mrb[8].mxu0 %vm530_vm2, %v8538_v49 }
  0xac   : > { %6655 = vmatprep.mubr.msk.bf16.mxu0 %vm530_vm2, %v8548_v25 }
  0xb3   : > { %6656 = vmatmul.mubr.msk.bf16.gmra.mrb[12].mxu0 %vm530_vm2, %v8553_v32 }
  0xb4   : > { %6659 = vmatprep.mubr.msk.bf16.mxu0 %vm530_vm2, %v8562_v17 }
  0xbb   : > { %6660 = vmatmul.mubr.msk.bf16.gmra.mrb[16].mxu0 %vm530_vm2, %v8567_v5 }
  0xbc   : > { %6663 = vmatprep.mubr.msk.bf16.mxu0 %vm530_vm2, %v8573_v50 }
  0xc3   : > { %6664 = vmatmul.mubr.msk.bf16.gmra.mrb[20].mxu0 %vm530_vm2, %v8595_v57 }
  0xc4   : > { %6667 = vmatprep.mubr.msk.bf16.mxu0 %vm530_vm2, %v8612_v24 }
  0xcb   : > { %6668 = vmatmul.mubr.msk.bf16.gmra.mrb[24].mxu0 %vm530_vm2, %v8618_v2 }
  0xcc   : > { %6671 = vmatprep.mubr.msk.bf16.mxu0 %vm530_vm2, %v8642_v33 }
  0xd3   : > { %6672 = vmatmul.mubr.msk.bf16.gmra.mrb[28].mxu0 %vm530_vm2, %v8648_v18 }
  0xd4   : > { %6677 = vmatprep.mubr.msk.bf16.mxu0 %vm530_vm2, %v8400_v16  ;;  %v328_v16 = vld [vmem:[%s8143_s10 + $0x180] sm:$0xff] }
  0xd5   : > { %v1745_v6 = vrot.slane %v328_v16, 2  ;;  %v8770_v36 = vpack.c.bf16 %v329_v51, %v328_v16  ;;  %v1536_v55 = vrot.slane %v328_v16, 1  ;;  %v5948_v16 = vld [vmem:[%s9663_s1 + $0x10] sm:$0x3]  ;;  %v7992_v51 = vld [vmem:[%s9665_s3 + $0x200] sm:$0xff]  }
  0xd7   : > { %v1747_v47 = vsel %vm956_vm3, %v1745_v6, %v1746_v30  ;;  %v1538_v15 = vsel %vm399_vm1, %v1536_v55, %v1537_v61  ;;  %v7993_v6 = vld [vmem:[%s9665_s3 + $0x58] sm:$0xff]  }
  0xd8   : > { %v8772_v11 = vpack.c.bf16 %v1749_v12, %v1747_v47  ;;  %v8813_v52 = vpack.c.bf16 %v1540_v27, %v1538_v15 }
  0xdb   : > { %6678 = vmatmul.mubr.msk.bf16.vlgmr.msra.gmra.mrb[0].mxu0 %vm530_vm2, %v8413_v0 }
  0xdc   : > { %6710 = vmatpush3.bf16.msra.mxu0 %v1550_v21  ;;  %6681 = vmatprep.mubr.msk.bf16.mxu0 %vm530_vm2, %v8419_v1  ;;  %v1961_v21 = vsel %vm579_vm0, %v5914_v42, 0 }
  0xdd   : > { %7974 = vmatprep.subr.msk.bf16.mxu0 %vm579_vm0, %v5897_v29  ;;  %v5931_v29 = vld [vmem:[%s9663_s1 + $0xe] sm:$0x3] }
  0xe3   : > { %6682 = vmatmul.mubr.msk.bf16.gmra.mrb[4].mxu0 %vm530_vm2, %v8423_v35 }
  0xe4   : > { %6685 = vmatprep.mubr.msk.bf16.mxu0 %vm530_vm2, %v8427_v26 }
  0xeb   : > { %6686 = vmatmul.mubr.msk.bf16.gmra.mrb[8].mxu0 %vm530_vm2, %v8431_v53 }
  0xec   : > { %6689 = vmatprep.mubr.msk.bf16.mxu0 %vm530_vm2, %v8435_v63 }
  0xf3   : > { %6690 = vmatmul.mubr.msk.bf16.gmra.mrb[12].mxu0 %vm530_vm2, %v8439_v39 }
  0xf4   : > { %6693 = vmatprep.mubr.msk.bf16.mxu0 %vm530_vm2, %v8443_v56 }
  0xfb   : > { %6694 = vmatmul.mubr.msk.bf16.gmra.mrb[16].mxu0 %vm530_vm2, %v8447_v20 }
  0xfc   : > { %6697 = vmatprep.mubr.msk.bf16.mxu0 %vm530_vm2, %v9753_v3 }
 0x103   : > { %6698 = vmatmul.mubr.msk.bf16.gmra.mrb[20].mxu0 %vm530_vm2, %v9754_v4 }
 0x104   : > { %6701 = vmatprep.mubr.msk.bf16.mxu0 %vm530_vm2, %v9755_v54 }
 0x10b   : > { %6702 = vmatmul.mubr.msk.bf16.gmra.mrb[24].mxu0 %vm530_vm2, %v9756_v62 }
 0x10c   : > { %6705 = vmatprep.mubr.msk.bf16.mxu0 %vm530_vm2, %v9757_v22 }
 0x113   : > { %6706 = vmatmul.mubr.msk.bf16.gmra.mrb[28].mxu0 %vm530_vm2, %v8770_v36 }
 0x114   : > { %6711 = vmatprep.mubr.msk.bf16.mxu0 %vm530_vm2, %v9759_v9 }
 0x11b   : > { %6712 = vmatmul.mubr.msk.bf16.vlgmr.msra.gmra.mrb[0].mxu0 %vm530_vm2, %v9760_v40 }
 0x11c   : > { %6744 = vmatpush3.bf16.msra.mxu0 %v1759_v10  ;;  %6715 = vmatprep.mubr.msk.bf16.mxu0 %vm530_vm2, %v9761_v45  ;;  %v7994_v10 = vld [vmem:[%s9665_s3 + $0x208] sm:$0xff]  }
 0x11d   : > { %7975 = vmatprep.subr.msk.bf16.mxu0 %vm579_vm0, %v5914_v42 }
 0x123   : > { %6716 = vmatmul.mubr.msk.bf16.gmra.mrb[4].mxu0 %vm530_vm2, %v9762_v46 }
 0x124   : > { %6719 = vmatprep.mubr.msk.bf16.mxu0 %vm530_vm2, %v9763_v38 }
 0x12b   : > { %6720 = vmatmul.mubr.msk.bf16.gmra.mrb[8].mxu0 %vm530_vm2, %v9764_v14 }
 0x12c   : > { %6723 = vmatprep.mubr.msk.bf16.mxu0 %vm530_vm2, %v8394_v7 }
 0x133   : > { %6724 = vmatmul.mubr.msk.bf16.gmra.mrb[12].mxu0 %vm530_vm2, %v9765_v37 }
 0x134   : > { %6727 = vmatprep.mubr.msk.bf16.mxu0 %vm530_vm2, %v8402_v8 }
 0x13b   : > { %6728 = vmatmul.mubr.msk.bf16.gmra.mrb[16].mxu0 %vm530_vm2, %v8404_v28 }
 0x13c   : > { %6731 = vmatprep.mubr.msk.bf16.mxu0 %vm530_vm2, %v8406_v48 }
 0x143   : > { %6732 = vmatmul.mubr.msk.bf16.gmra.mrb[20].mxu0 %vm530_vm2, %v8415_v23 }
 0x144   : > { %6735 = vmatprep.mubr.msk.bf16.mxu0 %vm530_vm2, %v8616_v60 }
 0x14b   : > { %6736 = vmatmul.mubr.msk.bf16.gmra.mrb[24].mxu0 %vm530_vm2, %v8620_v31 }
 0x14c   : > { %6739 = vmatprep.mubr.msk.bf16.mxu0 %vm530_vm2, %v8646_v43 }
 0x153   : > { %6740 = vmatmul.mubr.msk.bf16.gmra.mrb[28].mxu0 %vm530_vm2, %v8813_v52 }
 0x154   : > { %6745 = vmatprep.mubr.msk.bf16.mxu0 %vm530_vm2, %v8498_v44  ;;  %v2173_v44 = vsel %vm579_vm0, %v5931_v29, 0 }
 0x15b   : > { %6746 = vmatmul.mubr.msk.bf16.vlgmr.msra.gmra.mrb[0].mxu0 %vm530_vm2, %v8513_v19 }
 0x15c   : > { %6778 = vmatpush3.bf16.msra.mxu0 %v1961_v21  ;;  %6749 = vmatprep.mubr.msk.bf16.mxu0 %vm530_vm2, %v8518_v13 }
 0x15d   : > { %7976 = vmatprep.subr.msk.bf16.mxu0 %vm579_vm0, %v5931_v29 }
 0x163   : > { %6750 = vmatmul.mubr.msk.bf16.gmra.mrb[4].mxu0 %vm530_vm2, %v8523_v58 }
 0x164   : > { %6753 = vmatprep.mubr.msk.bf16.mxu0 %vm530_vm2, %v8538_v49 }
 0x16b   : > { %6754 = vmatmul.mubr.msk.bf16.gmra.mrb[8].mxu0 %vm530_vm2, %v8548_v25 }
 0x16c   : > { %6757 = vmatprep.mubr.msk.bf16.mxu0 %vm530_vm2, %v8553_v32 }
 0x173   : > { %6758 = vmatmul.mubr.msk.bf16.gmra.mrb[12].mxu0 %vm530_vm2, %v8562_v17 }
 0x174   : > { %6761 = vmatprep.mubr.msk.bf16.mxu0 %vm530_vm2, %v8567_v5 }
 0x17b   : > { %6762 = vmatmul.mubr.msk.bf16.gmra.mrb[16].mxu0 %vm530_vm2, %v8573_v50 }
 0x17c   : > { %6765 = vmatprep.mubr.msk.bf16.mxu0 %vm530_vm2, %v8595_v57 }
 0x183   : > { %6766 = vmatmul.mubr.msk.bf16.gmra.mrb[20].mxu0 %vm530_vm2, %v8612_v24 }
 0x184   : > { %6769 = vmatprep.mubr.msk.bf16.mxu0 %vm530_vm2, %v8618_v2 }
 0x18b   : > { %6770 = vmatmul.mubr.msk.bf16.gmra.mrb[24].mxu0 %vm530_vm2, %v8642_v33 }
 0x18c   : > { %6773 = vmatprep.mubr.msk.bf16.mxu0 %vm530_vm2, %v8648_v18 }
 0x193   : > { %6774 = vmatmul.mubr.msk.bf16.gmra.mrb[28].mxu0 %vm530_vm2, %v8772_v11 }
 0x194   : > { %6779 = vmatprep.mubr.msk.bf16.mxu0 %vm530_vm2, %v8413_v0  ;;  %v331_v0 = vld [vmem:[%s8143_s10 + $0x198] sm:$0xff] }
 0x195   : > { %v2159_v30 = vrot.slane %v331_v0, 1 }
 0x19b   : > { %6780 = vmatmul.mubr.msk.bf16.vlgmr.msra.gmra.mrb[0].mxu0 %vm530_vm2, %v8419_v1  ;;  %v332_v1 = vld [vmem:[%s8143_s10 + $0x1a0] sm:$0xff] }
 0x19c   : > { %6812 = vmatpush3.bf16.msra.mxu0 %v2173_v44  ;;  %6783 = vmatprep.mubr.msk.bf16.mxu0 %vm530_vm2, %v8423_v35  ;;  %v2368_v35 = vrot.slane %v331_v0, 2  ;;  %v2160_v59 = vrot.slane %v332_v1, 1 }
 0x19d   : > { %7977 = vmatprep.subr.msk.bf16.mxu0 %vm579_vm0, %v5948_v16 }
 0x19e   : > { %v2161_v41 = vsel %vm399_vm1, %v2159_v30, %v2160_v59 }
 0x1a3   : > { %6784 = vmatmul.mubr.msk.bf16.gmra.mrb[4].mxu0 %vm530_vm2, %v8427_v26  ;;  %v2369_v26 = vrot.slane %v332_v1, 2 }
 0x1a4   : > { %6787 = vmatprep.mubr.msk.bf16.mxu0 %vm530_vm2, %v8431_v53  ;;  %v333_v53 = vld [vmem:[%s8143_s10 + $0x1a8] sm:$0x3] }
 0x1a5   : > { %v2162_v47 = vrot.slane %v333_v53, 1 }
 0x1a7   : > { %v2163_v12 = vsel %vm399_vm1, %v2160_v59, %v2162_v47 }
 0x1ab   : > { %6788 = vmatmul.mubr.msk.bf16.gmra.mrb[8].mxu0 %vm530_vm2, %v8435_v63  ;;  %v8893_v63 = vsel %vm956_vm3, %v2368_v35, %v2369_v26 }
 0x1ac   : > { %6791 = vmatprep.mubr.msk.bf16.mxu0 %vm530_vm2, %v8439_v39  ;;  %v2371_v39 = vrot.slane %v333_v53, 2  ;;  %v8006_v53 = vld [vmem:[%s9665_s3 + $0x8] sm:$0xff]  }
 0x1b3   : > { %6792 = vmatmul.mubr.msk.bf16.gmra.mrb[12].mxu0 %vm530_vm2, %v8443_v56  ;;  %v2372_v56 = vsel %vm956_vm3, %v2369_v26, %v2371_v39 }
 0x1b4   : > { %6795 = vmatprep.mubr.msk.bf16.mxu0 %vm530_vm2, %v8447_v20  ;;  %v1954_v20 = vpack.c.bf16 %v332_v1, %v331_v0 }
 0x1bb   : > { %6796 = vmatmul.mubr.msk.bf16.gmra.mrb[16].mxu0 %vm530_vm2, %v9753_v3  ;;  %v2375_v3 = vpack.c.bf16 %v2372_v56, %v8893_v63 }
 0x1bc   : > { %6799 = vmatprep.mubr.msk.bf16.mxu0 %vm530_vm2, %v9754_v4  ;;  %v7989_v4 = vld [vmem:[%s9665_s3 + $0x40] sm:$0xff]  }
 0x1bd   : > { %6879 = vmatprep.subr.bf16.mxu1 %v7989_v4 }
 0x1be   : > { %6880 = vmatpush3.bf16.msra.mxu1 %v7989_v4 }
 0x1c3   : > { %6800 = vmatmul.mubr.msk.bf16.gmra.mrb[20].mxu0 %vm530_vm2, %v9755_v54  ;;  %v7990_v54 = vld [vmem:[%s9665_s3 + $0x48] sm:$0xff]  }
 0x1c4   : > { %6803 = vmatprep.mubr.msk.bf16.mxu0 %vm530_vm2, %v9756_v62  ;;  %6881 = vmatprep.subr.bf16.mxu1 %v7990_v54  ;;  %v7991_v62 = vld [vmem:[%s9665_s3 + $0x50] sm:$0xff]  }
 0x1c5   : > { %6882 = vmatpush3.bf16.msra.mxu1 %v7990_v54 }
 0x1c6   : > { %6883 = vmatprep.subr.bf16.mxu1 %v7991_v62 }
 0x1c9   : > { %6884 = vmatpush3.bf16.msra.mxu1 %v7991_v62 }
 0x1ca   : > { %6885 = vmatprep.subr.bf16.mxu1 %v7993_v6 }
 0x1cb   : > { %6804 = vmatmul.mubr.msk.bf16.gmra.mrb[24].mxu0 %vm530_vm2, %v9757_v22  ;;  %v2382_v22 = vsel %vm579_vm0, %v5948_v16, 0 }
 0x1cc   : > { %6807 = vmatprep.mubr.msk.bf16.mxu0 %vm530_vm2, %v8770_v36  ;;  %v2166_v36 = vpack.c.bf16 %v2163_v12, %v2161_v41 }
 0x1cd   : > { %6886 = vmatpush3.bf16.msra.mxu1 %v7993_v6 }
 0x1d3   : > { %6808 = vmatmul.mubr.msk.bf16.gmra.mrb[28].mxu0 %vm530_vm2, %v1954_v20 }
 0x1d4   : > { %6813 = vmatprep.mubr.msk.bf16.mxu0 %vm530_vm2, %v9760_v40 }
 0x1db   : > { %6814 = vmatmul.mubr.msk.bf16.vlgmr.msra.gmra.mrb[0].mxu0 %vm530_vm2, %v9761_v45 }
 0x1dc   : > { %6846 = vmatpush3.bf16.msra.mxu0 %v2382_v22  ;;  %6817 = vmatprep.mubr.msk.bf16.mxu0 %vm530_vm2, %v9762_v46 }
 0x1dd   : > { %7263 = vmatprep.subr.bf16.mxu0 %v7992_v51 }
 0x1e3   : > { %6818 = vmatmul.mubr.msk.bf16.gmra.mrb[4].mxu0 %vm530_vm2, %v9763_v38 }
 0x1e4   : > { %6821 = vmatprep.mubr.msk.bf16.mxu0 %vm530_vm2, %v9764_v14 }
 0x1eb   : > { %6822 = vmatmul.mubr.msk.bf16.gmra.mrb[8].mxu0 %vm530_vm2, %v8394_v7 }
 0x1ec   : > { %6825 = vmatprep.mubr.msk.bf16.mxu0 %vm530_vm2, %v9765_v37 }
 0x1f3   : > { %6826 = vmatmul.mubr.msk.bf16.gmra.mrb[12].mxu0 %vm530_vm2, %v8402_v8 }
 0x1f4   : > { %6829 = vmatprep.mubr.msk.bf16.mxu0 %vm530_vm2, %v8404_v28 }
 0x1fb   : > { %6830 = vmatmul.mubr.msk.bf16.gmra.mrb[16].mxu0 %vm530_vm2, %v8406_v48 }
 0x1fc   : > { %6833 = vmatprep.mubr.msk.bf16.mxu0 %vm530_vm2, %v8415_v23 }
 0x203   : > { %6834 = vmatmul.mubr.msk.bf16.gmra.mrb[20].mxu0 %vm530_vm2, %v8616_v60 }
 0x204   : > { %6837 = vmatprep.mubr.msk.bf16.mxu0 %vm530_vm2, %v8620_v31 }
 0x20b   : > { %6838 = vmatmul.mubr.msk.bf16.gmra.mrb[24].mxu0 %vm530_vm2, %v8646_v43 }
 0x20c   : > { %6841 = vmatprep.mubr.msk.bf16.mxu0 %vm530_vm2, %v8813_v52 }
 0x213   : > { %6842 = vmatmul.mubr.msk.bf16.gmra.mrb[28].mxu0 %vm530_vm2, %v2166_v36 }
 0x214   : > { %6847 = vmatprep.mubr.msk.bf16.mxu0 %vm530_vm2, %v8513_v19  ;;  %v7997_v19 = vld [vmem:[%s9665_s3 + $0x68] sm:$0xff]  }
 0x21b   : > { %6848 = vmatmul.mubr.msk.bf16.vlgmr.msra.gmra.mrb[0].mxu0 %vm530_vm2, %v8518_v13  ;;  %v7995_v13 = vld [vmem:[%s9665_s3 + $0x60] sm:$0xff]  }
 0x21c   : > { %6851 = vmatprep.mubr.msk.bf16.mxu0 %vm530_vm2, %v8523_v58  ;;  %7264 = vmatpush3.bf16.msra.mxu0 %v7992_v51  ;;  %v7996_v58 = vld [vmem:[%s9665_s3 + $0x210] sm:$0xff]  }
 0x21d   : > { %7265 = vmatprep.subr.bf16.mxu0 %v7994_v10  ;;  %6887 = vmatprep.subr.bf16.mxu1 %v7995_v13  ;;  %v8007_v51 = vld [vmem:[%s9665_s3 + $0x10] sm:$0xff]  }
 0x21e   : > { %6888 = vmatpush3.bf16.msra.mxu1 %v7995_v13  ;;  %v8008_v13 = vld [vmem:[%s9665_s3 + $0x18] sm:$0xff]  }
 0x21f   : > { %6889 = vmatprep.subr.bf16.mxu1 %v7997_v19 }
 0x220   : > { %7266 = vmatpush3.bf16.msra.mxu0 %v7994_v10 }
 0x221   : > { %7267 = vmatprep.subr.bf16.mxu0 %v7996_v58 }
 0x222   : > { %6890 = vmatpush3.bf16.msra.mxu1 %v7997_v19 }
 0x223   : > { %6852 = vmatmul.mubr.msk.bf16.gmra.mrb[4].mxu0 %vm530_vm2, %v8538_v49  ;;  %v7999_v49 = vld [vmem:[%s9665_s3 + $0x70] sm:$0xff]  }
 0x224   : > { %6855 = vmatprep.mubr.msk.bf16.mxu0 %vm530_vm2, %v8548_v25  ;;  %6891 = vmatprep.subr.bf16.mxu1 %v7999_v49  ;;  %v8078_v25 = vmov 0.0  }
 0x225   : > { %7268 = vmatpush3.bf16.msra.mxu0 %v7996_v58  ;;  %2648 = vst [vmem:[#allocation2] sm:$0xff] %v8078_v25  ;;  %2649 = vst [vmem:[#allocation2 + $0x8] sm:$0xff] %v8078_v25 }
 0x226   : > { %6892 = vmatpush3.bf16.msra.mxu1 %v7999_v49  ;;  %2650 = vst [vmem:[#allocation2 + $0x10] sm:$0xff] %v8078_v25  ;;  %2651 = vst [vmem:[#allocation2 + $0x18] sm:$0xff] %v8078_v25 }
 0x227   : > { %2652 = vst [vmem:[#allocation2 + $0x20] sm:$0xff] %v8078_v25  ;;  %2655 = vst [vmem:[#allocation2 + $0x38] sm:$0xff] %v8078_v25 }
 0x228   : > { %2656 = vst [vmem:[#allocation2 + $0x40] sm:$0xff] %v8078_v25  ;;  %2659 = vst [vmem:[#allocation2 + $0x58] sm:$0xff] %v8078_v25 }
 0x229   : > { %2660 = vst [vmem:[#allocation2 + $0x60] sm:$0xff] %v8078_v25  ;;  %2663 = vst [vmem:[#allocation2 + $0x78] sm:$0xff] %v8078_v25 }
 0x22a   : > { %2664 = vst [vmem:[#allocation2 + $0x80] sm:$0xff] %v8078_v25  ;;  %2667 = vst [vmem:[#allocation2 + $0x98] sm:$0xff] %v8078_v25 }
 0x22b   : > { %6856 = vmatmul.mubr.msk.bf16.gmra.mrb[8].mxu0 %vm530_vm2, %v8553_v32  ;;  %2668 = vst [vmem:[#allocation2 + $0xa0] sm:$0xff] %v8078_v25  ;;  %2671 = vst [vmem:[#allocation2 + $0xb8] sm:$0xff] %v8078_v25  ;;  %v7998_v32 = vld [vmem:[%s9665_s3 + $0x218] sm:$0xff]  }
 0x22c   : > { %6859 = vmatprep.mubr.msk.bf16.mxu0 %vm530_vm2, %v8562_v17  ;;  %2672 = vst [vmem:[#allocation2 + $0xc0] sm:$0xff] %v8078_v25  ;;  %2675 = vst [vmem:[#allocation2 + $0xd8] sm:$0xff] %v8078_v25  ;;  %v8001_v17 = vld [vmem:[%s9665_s3 + $0x78] sm:$0xff]   ;;  %7269 = vmatprep.subr.bf16.mxu0 %v7998_v32 }
 0x22d   : > { %2676 = vst [vmem:[#allocation2 + $0xe0] sm:$0xff] %v8078_v25  ;;  %2679 = vst [vmem:[#allocation2 + $0xf8] sm:$0xff] %v8078_v25  ;;  %6893 = vmatprep.subr.bf16.mxu1 %v8001_v17  ;;  %7270 = vmatpush3.bf16.msra.mxu0 %v7998_v32 }
 0x22e   : > { %2680 = vst [vmem:[#allocation2 + $0x100] sm:$0xff] %v8078_v25  ;;  %2683 = vst [vmem:[#allocation2 + $0x118] sm:$0xff] %v8078_v25  ;;  %6894 = vmatpush3.bf16.msra.mxu1 %v8001_v17 }
 0x22f   : > { %2684 = vst [vmem:[#allocation2 + $0x120] sm:$0xff] %v8078_v25  ;;  %2687 = vst [vmem:[#allocation2 + $0x138] sm:$0xff] %v8078_v25 }
 0x230   : > { %2688 = vst [vmem:[#allocation2 + $0x140] sm:$0xff] %v8078_v25  ;;  %2691 = vst [vmem:[#allocation2 + $0x158] sm:$0xff] %v8078_v25 }
 0x231   : > { %2692 = vst [vmem:[#allocation2 + $0x160] sm:$0xff] %v8078_v25  ;;  %2695 = vst [vmem:[#allocation2 + $0x178] sm:$0xff] %v8078_v25 }
 0x232   : > { %2696 = vst [vmem:[#allocation2 + $0x180] sm:$0xff] %v8078_v25  ;;  %2699 = vst [vmem:[#allocation2 + $0x198] sm:$0xff] %v8078_v25 }
 0x233   : > { %6860 = vmatmul.mubr.msk.bf16.gmra.mrb[12].mxu0 %vm530_vm2, %v8567_v5  ;;  %2700 = vst [vmem:[#allocation2 + $0x1a0] sm:$0xff] %v8078_v25  ;;  %2703 = vst [vmem:[#allocation2 + $0x1b8] sm:$0xff] %v8078_v25  ;;  %v8000_v5 = vld [vmem:[%s9665_s3 + $0x220] sm:$0xff]  }
 0x234   : > { %6863 = vmatprep.mubr.msk.bf16.mxu0 %vm530_vm2, %v8573_v50  ;;  %2704 = vst [vmem:[#allocation2 + $0x1c0] sm:$0xff] %v8078_v25  ;;  %2707 = vst [vmem:[#allocation2 + $0x1d8] sm:$0xff] %v8078_v25  ;;  %v8079_v50 = vmov 0.0|0.0   ;;  %7271 = vmatprep.subr.bf16.mxu0 %v8000_v5 }
 0x235   : > { %2708 = vst [vmem:[#allocation2 + $0x1e0] sm:$0xff] %v8078_v25  ;;  %2711 = vst [vmem:[#allocation2 + $0x1f8] sm:$0xff] %v8078_v25  ;;  %6895 = vmatprep.mubr.bf16.mxu1 %v8079_v50  ;;  %7272 = vmatpush3.bf16.msra.mxu0 %v8000_v5 }
 0x236   : > { %2712 = vst [vmem:[#allocation2 + $0x200] sm:$0xff] %v8078_v25  ;;  %2715 = vst [vmem:[#allocation2 + $0x218] sm:$0xff] %v8078_v25 }
 0x237   : > { %2716 = vst [vmem:[#allocation2 + $0x220] sm:$0xff] %v8078_v25  ;;  %2717 = vst [vmem:[#allocation2 + $0x228] sm:$0xff] %v8078_v25 }
 0x238   : > { %2718 = vst [vmem:[#allocation2 + $0x230] sm:$0xff] %v8078_v25  ;;  %2719 = vst [vmem:[#allocation2 + $0x238] sm:$0xff] %v8078_v25 }
 0x23b   : > { %6864 = vmatmul.mubr.msk.bf16.gmra.mrb[16].mxu0 %vm530_vm2, %v8595_v57  ;;  %v8002_v57 = vld [vmem:[%s9665_s3 + $0x228] sm:$0xff]  }
 0x23c   : > { %6867 = vmatprep.mubr.msk.bf16.mxu0 %vm530_vm2, %v8612_v24  ;;  %7273 = vmatprep.subr.bf16.mxu0 %v8002_v57  ;;  %v8004_v24 = vld [vmem:[%s9665_s3 + $0x230] sm:$0xff]  }
 0x23d   : > { %7274 = vmatpush3.bf16.msra.mxu0 %v8002_v57 }
 0x23e   : > { %7275 = vmatprep.subr.bf16.mxu0 %v8004_v24 }
 0x241   : > { %7276 = vmatpush3.bf16.msra.mxu0 %v8004_v24  ;;  %v8009_v24 = vld [vmem:[%s9665_s3 + $0x20] sm:$0xff]  }
 0x243   : > { %6868 = vmatmul.mubr.msk.bf16.gmra.mrb[20].mxu0 %vm530_vm2, %v8618_v2  ;;  %v8005_v2 = vld [vmem:[%s9665_s3 + $0x238] sm:$0xff]  }
 0x244   : > { %6871 = vmatprep.mubr.msk.bf16.mxu0 %vm530_vm2, %v8642_v33  ;;  %v8003_v33 = vld [vmem:[%s9665_s3] sm:$0xff]   ;;  %7277 = vmatprep.subr.bf16.mxu0 %v8005_v2 }
 0x245   : > { %7278 = vmatpush3.bf16.msra.mxu0 %v8005_v2  ;;  %6927 = vmatprep.subr.bf16.mxu1 %v8003_v33 }
 0x24b   : > { %6872 = vmatmul.mubr.msk.bf16.gmra.mrb[24].mxu0 %vm530_vm2, %v8648_v18  ;;  %v9017_v18 = vld [vmem:[%s9664_s2] ss:$0 sm:$0xff] }
 0x24c   : > { %6875 = vmatprep.mubr.msk.bf16.mxu0 %vm530_vm2, %v8772_v11 }
 0x253   : > { %6876 = vmatmul.mubr.msk.bf16.gmra.mrb[28].mxu0 %vm530_vm2, %v2375_v3 }
 0x2ee   : > { %v6849_v11 = vpop.f32.mrb[0].mxu0 }
 0x2ef   : > { %v2586_v42 = vadd.f32 %v6849_v11, %v9017_v18  ;;  %v2418_v55 = vpop.f32.mrb[1].mxu0 }
 0x2f0   : > { %v2584_v61 = vadd.f32 %v9017_v18, %v2418_v55  ;;  %v6850_v34 = vpop.f32.mrb[2].mxu0 }
 0x2f1   : > { %v2618_v15 = vmax.f32 %v2586_v42, 0.0  ;;  %v2587_v27 = vadd.f32 %v6850_v34, %v9017_v18  ;;  %v2421_v21 = vpop.f32.mrb[3].mxu0 }
 0x2f2   : > { %v2616_v29 = vmax.f32 %v2584_v61, 0.0  ;;  %v2585_v44 = vadd.f32 %v9017_v18, %v2421_v21 }
 0x2f3   : > { %2723 = vst [vmem:[#allocation2 + $0x48] sm:$0xff] %v2618_v15  ;;  %v2619_v16 = vmax.f32 %v2587_v27, 0.0 }
 0x2f4   : > { %2721 = vst [vmem:[#allocation2 + $0x28] sm:$0xff] %v2616_v29  ;;  %v2617_v0 = vmax.f32 %v2585_v44, 0.0 }
 0x2f5   : > { %2724 = vst [vmem:[#allocation2 + $0x50] sm:$0xff] %v2619_v16  ;;  %v2851_v1 = vpack.c.bf16 %v2619_v16, %v2618_v15 }
 0x2f6   : > { %2722 = vst [vmem:[#allocation2 + $0x30] sm:$0xff] %v2617_v0  ;;  %v6853_v35 = vpop.f32.mrb[4].mxu0  ;;  %v2850_v26 = vpack.c.bf16 %v2617_v0, %v2616_v29  ;;  %v8010_v0 = vld [vmem:[%s9665_s3 + $0x28] sm:$0xff]  }
 0x2f7   : > { %v2590_v63 = vadd.f32 %v6853_v35, %v9017_v18  ;;  %v2434_v39 = vpop.f32.mrb[5].mxu0 }
 0x2f8   : > { %v2588_v56 = vadd.f32 %v9017_v18, %v2434_v39  ;;  %v6854_v20 = vpop.f32.mrb[6].mxu0  ;;  %6896 = vmatmul.mubr.bf16.vlgmr.msra.gmra.mrb[0].mxu1 %v2850_v26 }
 0x2f9   : > { %v2622_v3 = vmax.f32 %v2590_v63, 0.0  ;;  %v2591_v4 = vadd.f32 %v6854_v20, %v9017_v18  ;;  %v2437_v54 = vpop.f32.mrb[7].mxu0  ;;  %6928 = vmatpush3.bf16.msra.mxu1 %v8003_v33  ;;  %6899 = vmatprep.mubr.bf16.mxu1 %v2851_v1 }
 0x2fa   : > { %v2620_v62 = vmax.f32 %v2588_v56, 0.0  ;;  %v2589_v22 = vadd.f32 %v9017_v18, %v2437_v54  ;;  %6929 = vmatprep.subr.bf16.mxu1 %v8006_v53 }
 0x2fb   : > { %2727 = vst [vmem:[#allocation2 + $0x88] sm:$0xff] %v2622_v3  ;;  %v2623_v6 = vmax.f32 %v2591_v4, 0.0 }
 0x2fc   : > { %2725 = vst [vmem:[#allocation2 + $0x68] sm:$0xff] %v2620_v62  ;;  %v2621_v30 = vmax.f32 %v2589_v22, 0.0  ;;  %v5137_v59 = vld [vmem:[#allocation2 + $0x49] sm:$0xff]  ;;  %v5138_v47 = vld [vmem:[#allocation2 + $0x51] sm:$0xff] }
 0x2fd   : > { %2728 = vst [vmem:[#allocation2 + $0x90] sm:$0xff] %v2623_v6  ;;  %v9033_v41 = vpack.c.bf16 %v5138_v47, %v5137_v59  ;;  %6930 = vmatpush3.bf16.msra.mxu1 %v8006_v53  ;;  %v2853_v12 = vpack.c.bf16 %v2623_v6, %v2622_v3  ;;  %v8011_v3 = vld [vmem:[%s9665_s3 + $0x30] sm:$0xff]  }
 0x2fe   : > { %2726 = vst [vmem:[#allocation2 + $0x70] sm:$0xff] %v2621_v30  ;;  %v6857_v36 = vpop.f32.mrb[8].mxu0  ;;  %v2852_v10 = vpack.c.bf16 %v2621_v30, %v2620_v62  ;;  %6931 = vmatprep.subr.bf16.mxu1 %v8007_v51 }
 0x2ff   : > { %v2594_v19 = vadd.f32 %v6857_v36, %v9017_v18  ;;  %v2450_v58 = vpop.f32.mrb[9].mxu0  ;;  %7279 = vmatprep.mubr.bf16.mxu0 %v9033_v41 }
 0x300   : > { %v2592_v49 = vadd.f32 %v9017_v18, %v2450_v58  ;;  %v6858_v25 = vpop.f32.mrb[10].mxu0  ;;  %6900 = vmatmul.mubr.bf16.gmra.mrb[4].mxu1 %v2852_v10 }
 0x301   : > { %v2626_v32 = vmax.f32 %v2594_v19, 0.0  ;;  %v2595_v17 = vadd.f32 %v6858_v25, %v9017_v18  ;;  %v2453_v5 = vpop.f32.mrb[11].mxu0  ;;  %6903 = vmatprep.mubr.bf16.mxu1 %v2853_v12  ;;  %6932 = vmatpush3.bf16.msra.mxu1 %v8007_v51 }
 0x302   : > { %v2624_v50 = vmax.f32 %v2592_v49, 0.0  ;;  %v2593_v57 = vadd.f32 %v9017_v18, %v2453_v5  ;;  %6933 = vmatprep.subr.bf16.mxu1 %v8008_v13 }
 0x303   : > { %2731 = vst [vmem:[#allocation2 + $0xc8] sm:$0xff] %v2626_v32  ;;  %v2627_v2 = vmax.f32 %v2595_v17, 0.0 }
 0x304   : > { %2729 = vst [vmem:[#allocation2 + $0xa8] sm:$0xff] %v2624_v50  ;;  %v2625_v33 = vmax.f32 %v2593_v57, 0.0  ;;  %v5141_v11 = vld [vmem:[#allocation2 + $0x89] sm:$0xff]  ;;  %v5142_v42 = vld [vmem:[#allocation2 + $0x91] sm:$0xff]  ;;  %v9078_v57 = vld [vmem:[%s9665_s3 + $0x80] sm:$0xff]  }
 0x305   : > { %2732 = vst [vmem:[#allocation2 + $0xd0] sm:$0xff] %v2627_v2  ;;  %v5139_v55 = vld [vmem:[#allocation2 + $0x69] sm:$0xff]  ;;  %v5140_v61 = vld [vmem:[#allocation2 + $0x71] sm:$0xff]  ;;  %v2855_v34 = vpack.c.bf16 %v2627_v2, %v2626_v32  ;;  %6934 = vmatpush3.bf16.msra.mxu1 %v8008_v13  ;;  %v9049_v16 = vpack.c.bf16 %v5142_v42, %v5141_v11 }
 0x306   : > { %2730 = vst [vmem:[#allocation2 + $0xb0] sm:$0xff] %v2625_v33  ;;  %v6861_v15 = vpop.f32.mrb[12].mxu0  ;;  %v9046_v27 = vpack.c.bf16 %v5140_v61, %v5139_v55  ;;  %v2854_v21 = vpack.c.bf16 %v2625_v33, %v2624_v50  ;;  %6935 = vmatprep.subr.bf16.mxu1 %v8009_v24  ;;  %v8012_v13 = vld [vmem:[%s9665_s3 + $0x38] sm:$0xff]  }
 0x307   : > { %v2598_v29 = vadd.f32 %v6861_v15, %v9017_v18  ;;  %v2466_v44 = vpop.f32.mrb[13].mxu0 }
 0x308   : > { %v2596_v1 = vadd.f32 %v9017_v18, %v2466_v44  ;;  %v6862_v35 = vpop.f32.mrb[14].mxu0  ;;  %7280 = vmatmul.mubr.bf16.vlgmr.msra.gmra.mrb[32].mxu0 %v9046_v27  ;;  %6904 = vmatmul.mubr.bf16.gmra.mrb[8].mxu1 %v2854_v21 }
 0x309   : > { %v2630_v26 = vmax.f32 %v2598_v29, 0.0  ;;  %v2599_v53 = vadd.f32 %v6862_v35, %v9017_v18  ;;  %v2469_v63 = vpop.f32.mrb[15].mxu0  ;;  %7283 = vmatprep.mubr.bf16.mxu0 %v9049_v16  ;;  %6907 = vmatprep.mubr.bf16.mxu1 %v2855_v34 }
 0x30a   : > { %v2628_v39 = vmax.f32 %v2596_v1, 0.0  ;;  %v2597_v56 = vadd.f32 %v9017_v18, %v2469_v63  ;;  %6936 = vmatpush3.bf16.msra.mxu1 %v8009_v24 }
 0x30b   : > { %2735 = vst [vmem:[#allocation2 + $0x108] sm:$0xff] %v2630_v26  ;;  %v2631_v20 = vmax.f32 %v2599_v53, 0.0  ;;  %6937 = vmatprep.subr.bf16.mxu1 %v8010_v0 }
 0x30c   : > { %2733 = vst [vmem:[#allocation2 + $0xe8] sm:$0xff] %v2628_v39  ;;  %v2629_v4 = vmax.f32 %v2597_v56, 0.0  ;;  %v5145_v54 = vld [vmem:[#allocation2 + $0xc9] sm:$0xff]  ;;  %v5146_v62 = vld [vmem:[#allocation2 + $0xd1] sm:$0xff] }
 0x30d   : > { %2736 = vst [vmem:[#allocation2 + $0x110] sm:$0xff] %v2631_v20  ;;  %v5143_v22 = vld [vmem:[#allocation2 + $0xa9] sm:$0xff]  ;;  %v5144_v51 = vld [vmem:[#allocation2 + $0xb1] sm:$0xff]  ;;  %v2857_v6 = vpack.c.bf16 %v2631_v20, %v2630_v26  ;;  %v9065_v10 = vpack.c.bf16 %v5146_v62, %v5145_v54 }
 0x30e   : > { %2734 = vst [vmem:[#allocation2 + $0xf0] sm:$0xff] %v2629_v4  ;;  %v6865_v30 = vpop.f32.mrb[16].mxu0  ;;  %v9062_v59 = vpack.c.bf16 %v5144_v51, %v5143_v22  ;;  %v2856_v47 = vpack.c.bf16 %v2629_v4, %v2628_v39  ;;  %6938 = vmatpush3.bf16.msra.mxu1 %v8010_v0 }
 0x30f   : > { %v2602_v12 = vadd.f32 %v6865_v30, %v9017_v18  ;;  %v2482_v36 = vpop.f32.mrb[17].mxu0  ;;  %6939 = vmatprep.subr.bf16.mxu1 %v8011_v3 }
 0x310   : > { %v2600_v19 = vadd.f32 %v9017_v18, %v2482_v36  ;;  %v6866_v58 = vpop.f32.mrb[18].mxu0  ;;  %7284 = vmatmul.mubr.bf16.gmra.mrb[36].mxu0 %v9062_v59  ;;  %6908 = vmatmul.mubr.bf16.gmra.mrb[12].mxu1 %v2856_v47 }
 0x311   : > { %v2634_v49 = vmax.f32 %v2602_v12, 0.0  ;;  %v2603_v25 = vadd.f32 %v6866_v58, %v9017_v18  ;;  %v2485_v32 = vpop.f32.mrb[19].mxu0  ;;  %7287 = vmatprep.mubr.bf16.mxu0 %v9065_v10  ;;  %6911 = vmatprep.mubr.bf16.mxu1 %v2857_v6 }
 0x312   : > { %v2632_v17 = vmax.f32 %v2600_v19, 0.0  ;;  %v2601_v5 = vadd.f32 %v9017_v18, %v2485_v32  ;;  %6940 = vmatpush3.bf16.msra.mxu1 %v8011_v3 }
 0x313   : > { %2739 = vst [vmem:[#allocation2 + $0x148] sm:$0xff] %v2634_v49  ;;  %v2635_v50 = vmax.f32 %v2603_v25, 0.0  ;;  %6941 = vmatprep.subr.bf16.mxu1 %v8012_v13 }
 0x314   : > { %2737 = vst [vmem:[#allocation2 + $0x128] sm:$0xff] %v2632_v17  ;;  %v2633_v24 = vmax.f32 %v2601_v5, 0.0  ;;  %v5149_v2 = vld [vmem:[#allocation2 + $0x109] sm:$0xff]  ;;  %v5150_v33 = vld [vmem:[#allocation2 + $0x111] sm:$0xff] }
 0x315   : > { %2740 = vst [vmem:[#allocation2 + $0x150] sm:$0xff] %v2635_v50  ;;  %v5147_v11 = vld [vmem:[#allocation2 + $0xe9] sm:$0xff]  ;;  %v5148_v42 = vld [vmem:[#allocation2 + $0xf1] sm:$0xff]  ;;  %v2859_v55 = vpack.c.bf16 %v2635_v50, %v2634_v49  ;;  %v9083_v44 = vpack.c.bf16 %v5150_v33, %v5149_v2 }
 0x316   : > { %2738 = vst [vmem:[#allocation2 + $0x130] sm:$0xff] %v2633_v24  ;;  %v6869_v61 = vpop.f32.mrb[20].mxu0  ;;  %v9080_v34 = vpack.c.bf16 %v5148_v42, %v5147_v11  ;;  %v2858_v15 = vpack.c.bf16 %v2633_v24, %v2632_v17  ;;  %6942 = vmatpush3.bf16.msra.mxu1 %v8012_v13 }
 0x317   : > { %v2606_v21 = vadd.f32 %v6869_v61, %v9017_v18  ;;  %v2498_v29 = vpop.f32.mrb[21].mxu0  ;;  %6975 = vmatprep.subr.bf16.mxu1 %v9078_v57 }
 0x318   : > { %v2604_v0 = vadd.f32 %v9017_v18, %v2498_v29  ;;  %v6870_v1 = vpop.f32.mrb[22].mxu0  ;;  %7288 = vmatmul.mubr.bf16.gmra.mrb[40].mxu0 %v9080_v34  ;;  %6912 = vmatmul.mubr.bf16.gmra.mrb[16].mxu1 %v2858_v15 }
 0x319   : > { %v2638_v35 = vmax.f32 %v2606_v21, 0.0  ;;  %v2607_v26 = vadd.f32 %v6870_v1, %v9017_v18  ;;  %v2501_v53 = vpop.f32.mrb[23].mxu0  ;;  %7291 = vmatprep.mubr.bf16.mxu0 %v9083_v44  ;;  %6915 = vmatprep.mubr.bf16.mxu1 %v2859_v55 }
 0x31a   : > { %v2636_v63 = vmax.f32 %v2604_v0, 0.0  ;;  %v2605_v39 = vadd.f32 %v9017_v18, %v2501_v53 }
 0x31b   : > { %2743 = vst [vmem:[#allocation2 + $0x188] sm:$0xff] %v2638_v35  ;;  %v2639_v56 = vmax.f32 %v2607_v26, 0.0 }
 0x31c   : > { %2741 = vst [vmem:[#allocation2 + $0x168] sm:$0xff] %v2636_v63  ;;  %v9091_v20 = vmax.f32 %v2605_v39, 0.0  ;;  %v5153_v3 = vld [vmem:[#allocation2 + $0x149] sm:$0xff]  ;;  %v5154_v4 = vld [vmem:[#allocation2 + $0x151] sm:$0xff] }
 0x31d   : > { %2744 = vst [vmem:[#allocation2 + $0x190] sm:$0xff] %v2639_v56  ;;  %v5151_v54 = vld [vmem:[#allocation2 + $0x129] sm:$0xff]  ;;  %v5152_v62 = vld [vmem:[#allocation2 + $0x131] sm:$0xff]  ;;  %v2861_v22 = vpack.c.bf16 %v2639_v56, %v2638_v35  ;;  %v9098_v36 = vpack.c.bf16 %v5154_v4, %v5153_v3 }
 0x31e   : > { %2742 = vst [vmem:[#allocation2 + $0x170] sm:$0xff] %v9091_v20  ;;  %v6873_v51 = vpop.f32.mrb[24].mxu0  ;;  %v9094_v6 = vpack.c.bf16 %v5152_v62, %v5151_v54  ;;  %v2860_v30 = vpack.c.bf16 %v9091_v20, %v2636_v63  ;;  %v2753_v63 = vld [vmem:[#allocation2 + $0x7] sm:$0xff]  ;;  %v2754_v39 = vld [vmem:[#allocation2 + $0xf] sm:$0xff] }
 0x31f   : > { %v2610_v47 = vadd.f32 %v6873_v51, %v9017_v18  ;;  %v2514_v12 = vpop.f32.mrb[25].mxu0  ;;  %v2785_v4 = vpack.c.bf16 %v2754_v39, %v2753_v63  ;;  %v2758_v51 = vld [vmem:[#allocation2 + $0x4f] sm:$0xff]  ;;  %v2769_v63 = vld [vmem:[#allocation2 + $0x107] sm:$0xff]  ;;  %v8020_v39 = vld [vmem:[%s9665_s3 + $0xb8] sm:$0xff]  }
 0x320   : > { %v2608_v13 = vadd.f32 %v9017_v18, %v2514_v12  ;;  %v6874_v19 = vpop.f32.mrb[26].mxu0  ;;  %7292 = vmatmul.mubr.bf16.gmra.mrb[44].mxu0 %v9094_v6  ;;  %6916 = vmatmul.mubr.bf16.gmra.mrb[20].mxu1 %v2860_v30  ;;  %v2755_v30 = vld [vmem:[#allocation2 + $0x27] sm:$0xff] }
 0x321   : > { %v2642_v58 = vmax.f32 %v2610_v47, 0.0  ;;  %v2611_v49 = vadd.f32 %v6874_v19, %v9017_v18  ;;  %v2517_v25 = vpop.f32.mrb[27].mxu0  ;;  %7295 = vmatprep.mubr.bf16.mxu0 %v9098_v36  ;;  %6919 = vmatprep.mubr.bf16.mxu1 %v2861_v22  ;;  %v2756_v22 = vld [vmem:[#allocation2 + $0x2f] sm:$0xff]  ;;  %v2757_v47 = vld [vmem:[#allocation2 + $0x47] sm:$0xff] }
 0x322   : > { %v2640_v32 = vmax.f32 %v2608_v13, 0.0  ;;  %v2609_v17 = vadd.f32 %v9017_v18, %v2517_v25  ;;  %v8014_v12 = vld [vmem:[%s9665_s3 + $0x88] sm:$0xff]   ;;  %v9128_v13 = vpack.c.bf16 %v2758_v51, %v2757_v47  ;;  %v8015_v19 = vld [vmem:[%s9665_s3 + $0x90] sm:$0xff]  }
 0x323   : > { %2747 = vst [vmem:[#allocation2 + $0x1c8] sm:$0xff] %v2642_v58  ;;  %v2643_v5 = vmax.f32 %v2611_v49, 0.0  ;;  %v2762_v49 = vld [vmem:[#allocation2 + $0x8f] sm:$0xff]  ;;  %v2759_v25 = vld [vmem:[#allocation2 + $0x67] sm:$0xff] }
 0x324   : > { %2745 = vst [vmem:[#allocation2 + $0x1a8] sm:$0xff] %v2640_v32  ;;  %v2641_v50 = vmax.f32 %v2609_v17, 0.0  ;;  %v2761_v17 = vld [vmem:[#allocation2 + $0x87] sm:$0xff] }
 0x325   : > { %2748 = vst [vmem:[#allocation2 + $0x1d0] sm:$0xff] %v2643_v5  ;;  %v5155_v24 = vld [vmem:[#allocation2 + $0x169] sm:$0xff]  ;;  %v5156_v2 = vld [vmem:[#allocation2 + $0x171] sm:$0xff]  ;;  %v9105_v33 = vpack.c.bf16 %v2643_v5, %v2642_v58 }
 0x326   : > { %2746 = vst [vmem:[#allocation2 + $0x1b0] sm:$0xff] %v2641_v50  ;;  %v6877_v11 = vpop.f32.mrb[28].mxu0  ;;  %v9107_v42 = vpack.c.bf16 %v5156_v2, %v5155_v24  ;;  %v9109_v55 = vpack.c.bf16 %v2641_v50, %v2640_v32  ;;  %v2760_v58 = vld [vmem:[#allocation2 + $0x6f] sm:$0xff]  ;;  %v8016_v5 = vld [vmem:[%s9665_s3 + $0x98] sm:$0xff]   ;;  %v8017_v50 = vld [vmem:[%s9665_s3 + $0xa0] sm:$0xff]  }
 0x327   : > { %v2614_v61 = vadd.f32 %v6877_v11, %v9017_v18  ;;  %v2530_v15 = vpop.f32.mrb[29].mxu0  ;;  %v9136_v32 = vpack.c.bf16 %v2760_v58, %v2759_v25  ;;  %v2764_v24 = vld [vmem:[#allocation2 + $0xaf] sm:$0xff]  ;;  %v2763_v11 = vld [vmem:[#allocation2 + $0xa7] sm:$0xff] }
 0x328   : > { %v2612_v21 = vadd.f32 %v9017_v18, %v2530_v15  ;;  %v6878_v29 = vpop.f32.mrb[30].mxu0  ;;  %7296 = vmatmul.mubr.bf16.gmra.mrb[48].mxu0 %v9107_v42  ;;  %6920 = vmatmul.mubr.bf16.gmra.mrb[24].mxu1 %v9109_v55  ;;  %v2766_v2 = vld [vmem:[#allocation2 + $0xcf] sm:$0xff]  ;;  %v2765_v15 = vld [vmem:[#allocation2 + $0xc7] sm:$0xff] }
 0x329   : > { %v2646_v0 = vmax.f32 %v2614_v61, 0.0  ;;  %v2615_v1 = vadd.f32 %v6878_v29, %v9017_v18  ;;  %v2533_v35 = vpop.f32.mrb[31].mxu0  ;;  %6923 = vmatprep.mubr.bf16.mxu1 %v9105_v33  ;;  %v9148_v61 = vpack.c.bf16 %v2764_v24, %v2763_v11  ;;  %v9153_v29 = vpack.c.bf16 %v2766_v2, %v2765_v15  ;;  %v2771_v51 = vld [vmem:[#allocation2 + $0x127] sm:$0xff]  ;;  %v2778_v58 = vld [vmem:[#allocation2 + $0x18f] sm:$0xff] }
 0x32a   : > { %v2644_v26 = vmax.f32 %v2612_v21, 0.0  ;;  %v2613_v53 = vadd.f32 %v9017_v18, %v2533_v35  ;;  %v9123_v18 = vpack.c.bf16 %v2756_v22, %v2755_v30  ;;  %v8018_v21 = vld [vmem:[%s9665_s3 + $0xa8] sm:$0xff]  }
 0x32b   : > { %2751 = vst [vmem:[#allocation2 + $0x208] sm:$0xff] %v2646_v0  ;;  %v2647_v56 = vmax.f32 %v2615_v1, 0.0  ;;  %v2768_v1 = vld [vmem:[#allocation2 + $0xef] sm:$0xff]  ;;  %v2773_v47 = vld [vmem:[#allocation2 + $0x147] sm:$0xff] }
 0x32c   : > { %2749 = vst [vmem:[#allocation2 + $0x1e8] sm:$0xff] %v2644_v26  ;;  %v2645_v3 = vmax.f32 %v2613_v53, 0.0  ;;  %v2770_v35 = vld [vmem:[#allocation2 + $0x10f] sm:$0xff]  ;;  %v2779_v2 = vld [vmem:[#allocation2 + $0x1a7] sm:$0xff] }
 0x32d   : > { %2752 = vst [vmem:[#allocation2 + $0x210] sm:$0xff] %v2647_v56  ;;  %v9118_v54 = vpack.c.bf16 %v2647_v56, %v2646_v0  ;;  %v8019_v0 = vld [vmem:[%s9665_s3 + $0xb0] sm:$0xff]   ;;  %v9165_v56 = vpack.c.bf16 %v2770_v35, %v2769_v63  ;;  %v2781_v15 = vld [vmem:[#allocation2 + $0x1c7] sm:$0xff] }
 0x32e   : > { %2750 = vst [vmem:[#allocation2 + $0x1f0] sm:$0xff] %v2645_v3  ;;  %v9120_v62 = vpack.c.bf16 %v2645_v3, %v2644_v26  ;;  %v2767_v26 = vld [vmem:[#allocation2 + $0xe7] sm:$0xff]  ;;  %v2774_v22 = vld [vmem:[#allocation2 + $0x14f] sm:$0xff] }
 0x32f   : > { %v9160_v53 = vpack.c.bf16 %v2768_v1, %v2767_v26  ;;  %v8021_v3 = vld [vmem:[%s9665_s3 + $0xc0] sm:$0xff]   ;;  %v2782_v24 = vld [vmem:[#allocation2 + $0x1cf] sm:$0xff] }
 0x330   : > { %6924 = vmatmul.mubr.bf16.gmra.mrb[28].mxu1 %v9120_v62  ;;  %v3301_v1 = vld [vmem:[#allocation2 + $0x11] sm:$0xff] }
 0x331   : > { %6943 = vmatprep.mubr.bf16.mxu1 %v2785_v4  ;;  %v2772_v4 = vld [vmem:[#allocation2 + $0x12f] sm:$0xff] }
 0x332   : > { %v9172_v30 = vpack.c.bf16 %v2772_v4, %v2771_v51  ;;  %v3302_v4 = vld [vmem:[#allocation2 + $0x29] sm:$0xff] }
 0x333   : > { %v2783_v26 = vld [vmem:[#allocation2 + $0x1e7] sm:$0xff] }
 0x335   : > { %v2784_v35 = vld [vmem:[#allocation2 + $0x1ef] sm:$0xff] }
 0x338   : > { %6944 = vmatmul.mubr.bf16.vlgmr.msra.gmra.mrb[0].mxu1 %v9123_v18 }
 0x339   : > { %6976 = vmatpush3.bf16.msra.mxu1 %v9078_v57  ;;  %6947 = vmatprep.mubr.bf16.mxu1 %v9128_v13  ;;  %v9141_v57 = vpack.c.bf16 %v2762_v49, %v2761_v17  ;;  %v2775_v49 = vld [vmem:[#allocation2 + $0x167] sm:$0xff] }
 0x33a   : > { %6977 = vmatprep.subr.bf16.mxu1 %v8014_v12  ;;  %v2777_v17 = vld [vmem:[#allocation2 + $0x187] sm:$0xff] }
 0x33d   : > { %6978 = vmatpush3.bf16.msra.mxu1 %v8014_v12  ;;  %v9174_v12 = vpack.c.bf16 %v2774_v22, %v2773_v47  ;;  %v3303_v22 = vld [vmem:[#allocation2 + $0x31] sm:$0xff]  ;;  %v8022_v47 = vld [vmem:[%s9665_s3 + $0xc8] sm:$0xff]  }
 0x33e   : > { %6979 = vmatprep.subr.bf16.mxu1 %v8015_v19  ;;  %v9193_v51 = vpack.c.bf16 %v3303_v22, %v3302_v4  ;;  %v3637_v22 = vld [vmem:[#allocation2 + $0x20f] sm:$0xff] }
 0x340   : > { %6948 = vmatmul.mubr.bf16.gmra.mrb[4].mxu1 %v9136_v32 }
 0x341   : > { %6951 = vmatprep.mubr.bf16.mxu1 %v9141_v57  ;;  %6980 = vmatpush3.bf16.msra.mxu1 %v8015_v19  ;;  %v2776_v19 = vld [vmem:[#allocation2 + $0x16f] sm:$0xff] }
 0x342   : > { %6981 = vmatprep.subr.bf16.mxu1 %v8016_v5  ;;  %v9178_v25 = vpack.c.bf16 %v2776_v19, %v2775_v49  ;;  %v8023_v19 = vld [vmem:[%s9665_s3 + $0xd0] sm:$0xff]  }
 0x343   : > { %v3325_v49 = vld [vmem:[#allocation2 + $0x191] sm:$0xff] }
 0x345   : > { %6982 = vmatpush3.bf16.msra.mxu1 %v8016_v5  ;;  %v9180_v5 = vpack.c.bf16 %v2778_v58, %v2777_v17  ;;  %v8024_v58 = vld [vmem:[%s9665_s3 + $0xd8] sm:$0xff]  }
 0x346   : > { %6983 = vmatprep.subr.bf16.mxu1 %v8017_v50 }
 0x348   : > { %6952 = vmatmul.mubr.bf16.gmra.mrb[8].mxu1 %v9148_v61 }
 0x349   : > { %6955 = vmatprep.mubr.bf16.mxu1 %v9153_v29  ;;  %6984 = vmatpush3.bf16.msra.mxu1 %v8017_v50  ;;  %v2780_v50 = vld [vmem:[#allocation2 + $0x1af] sm:$0xff] }
 0x34a   : > { %6985 = vmatprep.subr.bf16.mxu1 %v8018_v21  ;;  %v9184_v11 = vpack.c.bf16 %v2780_v50, %v2779_v2  ;;  %v3328_v50 = vld [vmem:[#allocation2 + $0x1c9] sm:$0xff] }
 0x34d   : > { %6986 = vmatpush3.bf16.msra.mxu1 %v8018_v21  ;;  %v9186_v21 = vpack.c.bf16 %v2782_v24, %v2781_v15  ;;  %v3329_v24 = vld [vmem:[#allocation2 + $0x1d1] sm:$0xff] }
 0x34e   : > { %6987 = vmatprep.subr.bf16.mxu1 %v8019_v0  ;;  %v9235_v15 = vpack.c.bf16 %v3329_v24, %v3328_v50  ;;  %v3916_v50 = vld [vmem:[#allocation2 + $0x68] sm:$0xff] }
 0x34f   : > { %v8038_v24 = vld [vmem:[%s9665_s3 + $0x148] sm:$0xff]  }
 0x350   : > { %6956 = vmatmul.mubr.bf16.gmra.mrb[12].mxu1 %v9160_v53 }
 0x351   : > { %6959 = vmatprep.mubr.bf16.mxu1 %v9165_v56  ;;  %6988 = vmatpush3.bf16.msra.mxu1 %v8019_v0  ;;  %v3300_v0 = vld [vmem:[#allocation2 + $0x9] sm:$0xff] }
 0x352   : > { %6989 = vmatprep.subr.bf16.mxu1 %v8020_v39  ;;  %v3332_v63 = vpack.c.bf16 %v3301_v1, %v3300_v0  ;;  %v8031_v1 = vld [vmem:[%s9665_s3 + $0x110] sm:$0xff]  }
 0x355   : > { %6990 = vmatpush3.bf16.msra.mxu1 %v8020_v39  ;;  %v9190_v39 = vpack.c.bf16 %v2784_v35, %v2783_v26 }
 0x356   : > { %7023 = vmatprep.subr.bf16.mxu1 %v8021_v3 }
 0x358   : > { %6960 = vmatmul.mubr.bf16.gmra.mrb[16].mxu1 %v9172_v30 }
 0x359   : > { %6963 = vmatprep.mubr.bf16.mxu1 %v9174_v12 }
 0x360   : > { %6964 = vmatmul.mubr.bf16.gmra.mrb[20].mxu1 %v9178_v25 }
 0x361   : > { %6967 = vmatprep.mubr.bf16.mxu1 %v9180_v5 }
 0x368   : > { %6968 = vmatmul.mubr.bf16.gmra.mrb[24].mxu1 %v9184_v11 }
 0x369   : > { %6971 = vmatprep.mubr.bf16.mxu1 %v9186_v21 }
 0x370   : > { %6972 = vmatmul.mubr.bf16.gmra.mrb[28].mxu1 %v9190_v39 }
 0x371   : > { %6991 = vmatprep.mubr.bf16.mxu1 %v3332_v63 }
 0x378   : > { %6992 = vmatmul.mubr.bf16.vlgmr.msra.gmra.mrb[0].mxu1 %v9193_v51 }
 0x379   : > { %7024 = vmatpush3.bf16.msra.mxu1 %v8021_v3  ;;  %6995 = vmatprep.mubr.bf16.mxu1 %v9033_v41  ;;  %v8025_v41 = vld [vmem:[%s9665_s3 + $0xe0] sm:$0xff]   ;;  %v8026_v3 = vld [vmem:[%s9665_s3 + $0xe8] sm:$0xff]  }
 0x37a   : > { %7025 = vmatprep.subr.bf16.mxu1 %v8022_v47 }
 0x37d   : > { %7026 = vmatpush3.bf16.msra.mxu1 %v8022_v47 }
 0x37e   : > { %7027 = vmatprep.subr.bf16.mxu1 %v8023_v19 }
 0x380   : > { %6996 = vmatmul.mubr.bf16.gmra.mrb[4].mxu1 %v9046_v27  ;;  %v8027_v27 = vld [vmem:[%s9665_s3 + $0xf0] sm:$0xff]  }
 0x381   : > { %6999 = vmatprep.mubr.bf16.mxu1 %v9049_v16  ;;  %7028 = vmatpush3.bf16.msra.mxu1 %v8023_v19  ;;  %v8028_v16 = vld [vmem:[%s9665_s3 + $0xf8] sm:$0xff]  }
 0x382   : > { %7029 = vmatprep.subr.bf16.mxu1 %v8024_v58 }
 0x385   : > { %7030 = vmatpush3.bf16.msra.mxu1 %v8024_v58 }
 0x386   : > { %7031 = vmatprep.subr.bf16.mxu1 %v8025_v41 }
 0x388   : > { %7000 = vmatmul.mubr.bf16.gmra.mrb[8].mxu1 %v9062_v59  ;;  %v8029_v59 = vld [vmem:[%s9665_s3 + $0x100] sm:$0xff]  }
 0x389   : > { %7003 = vmatprep.mubr.bf16.mxu1 %v9065_v10  ;;  %7032 = vmatpush3.bf16.msra.mxu1 %v8025_v41  ;;  %v3324_v10 = vld [vmem:[#allocation2 + $0x189] sm:$0xff] }
 0x38a   : > { %7033 = vmatprep.subr.bf16.mxu1 %v8026_v3  ;;  %v9229_v17 = vpack.c.bf16 %v3325_v49, %v3324_v10  ;;  %v3914_v49 = vld [vmem:[#allocation2 + $0x48] sm:$0xff] }
 0x38d   : > { %7034 = vmatpush3.bf16.msra.mxu1 %v8026_v3  ;;  %v3912_v3 = vld [vmem:[#allocation2 + $0x28] sm:$0xff] }
 0x38e   : > { %7035 = vmatprep.subr.bf16.mxu1 %v8027_v27 }
 0x390   : > { %7004 = vmatmul.mubr.bf16.gmra.mrb[12].mxu1 %v9080_v34  ;;  %v3326_v34 = vld [vmem:[#allocation2 + $0x1a9] sm:$0xff] }
 0x391   : > { %7007 = vmatprep.mubr.bf16.mxu1 %v9083_v44  ;;  %7036 = vmatpush3.bf16.msra.mxu1 %v8027_v27  ;;  %v3327_v44 = vld [vmem:[#allocation2 + $0x1b1] sm:$0xff] }
 0x392   : > { %7037 = vmatprep.subr.bf16.mxu1 %v8028_v16  ;;  %v9233_v2 = vpack.c.bf16 %v3327_v44, %v3326_v34 }
 0x395   : > { %7038 = vmatpush3.bf16.msra.mxu1 %v8028_v16 }
 0x396   : > { %7071 = vmatprep.subr.bf16.mxu1 %v8029_v59 }
 0x398   : > { %7008 = vmatmul.mubr.bf16.gmra.mrb[16].mxu1 %v9094_v6  ;;  %v3330_v6 = vld [vmem:[#allocation2 + $0x1e9] sm:$0xff] }
 0x399   : > { %7011 = vmatprep.mubr.bf16.mxu1 %v9098_v36  ;;  %v3331_v36 = vld [vmem:[#allocation2 + $0x1f1] sm:$0xff] }
 0x39a   : > { %v9239_v0 = vpack.c.bf16 %v3331_v36, %v3330_v6  ;;  %v8039_v36 = vld [vmem:[%s9665_s3 + $0x150] sm:$0xff]  }
 0x3a0   : > { %7012 = vmatmul.mubr.bf16.gmra.mrb[20].mxu1 %v9107_v42  ;;  %v8030_v42 = vld [vmem:[%s9665_s3 + $0x108] sm:$0xff]  }
 0x3a1   : > { %7015 = vmatprep.mubr.bf16.mxu1 %v9229_v17 }
 0x3a8   : > { %7016 = vmatmul.mubr.bf16.gmra.mrb[24].mxu1 %v9233_v2 }
 0x3a9   : > { %7019 = vmatprep.mubr.bf16.mxu1 %v9235_v15 }
 0x3b0   : > { %7020 = vmatmul.mubr.bf16.gmra.mrb[28].mxu1 %v9239_v0 }
 0x3b1   : > { %7039 = vmatprep.mubr.bf16.mxu1 %v9123_v18  ;;  %v8032_v18 = vld [vmem:[%s9665_s3 + $0x118] sm:$0xff]  }
 0x3b8   : > { %7040 = vmatmul.mubr.bf16.vlgmr.msra.gmra.mrb[0].mxu1 %v9128_v13  ;;  %v8033_v13 = vld [vmem:[%s9665_s3 + $0x120] sm:$0xff]  }
 0x3b9   : > { %7072 = vmatpush3.bf16.msra.mxu1 %v8029_v59  ;;  %7043 = vmatprep.mubr.bf16.mxu1 %v9136_v32  ;;  %v8034_v32 = vld [vmem:[%s9665_s3 + $0x128] sm:$0xff]   ;;  %v3917_v59 = vld [vmem:[#allocation2 + $0x70] sm:$0xff] }
 0x3ba   : > { %7073 = vmatprep.subr.bf16.mxu1 %v8030_v42  ;;  %v9321_v6 = vpack.c.bf16 %v3917_v59, %v3916_v50  ;;  %v3922_v59 = vld [vmem:[#allocation2 + $0xc8] sm:$0xff] }
 0x3bb   : > { %v3924_v50 = vld [vmem:[#allocation2 + $0xe8] sm:$0xff] }
 0x3bd   : > { %7074 = vmatpush3.bf16.msra.mxu1 %v8030_v42 }
 0x3be   : > { %7075 = vmatprep.subr.bf16.mxu1 %v8031_v1 }
 0x3c0   : > { %7044 = vmatmul.mubr.bf16.gmra.mrb[4].mxu1 %v9141_v57  ;;  %v8035_v57 = vld [vmem:[%s9665_s3 + $0x130] sm:$0xff]  }
 0x3c1   : > { %7047 = vmatprep.mubr.bf16.mxu1 %v9148_v61  ;;  %7076 = vmatpush3.bf16.msra.mxu1 %v8031_v1  ;;  %v8036_v61 = vld [vmem:[%s9665_s3 + $0x138] sm:$0xff]   ;;  %v3919_v1 = vld [vmem:[#allocation2 + $0x90] sm:$0xff] }
 0x3c2   : > { %7077 = vmatprep.subr.bf16.mxu1 %v8032_v18 }
 0x3c5   : > { %7078 = vmatpush3.bf16.msra.mxu1 %v8032_v18 }
 0x3c6   : > { %7079 = vmatprep.subr.bf16.mxu1 %v8033_v13 }
 0x3c8   : > { %7048 = vmatmul.mubr.bf16.gmra.mrb[8].mxu1 %v9153_v29  ;;  %v8037_v29 = vld [vmem:[%s9665_s3 + $0x140] sm:$0xff]  }
 0x3c9   : > { %7051 = vmatprep.mubr.bf16.mxu1 %v9160_v53  ;;  %7080 = vmatpush3.bf16.msra.mxu1 %v8033_v13  ;;  %v3921_v13 = vld [vmem:[#allocation2 + $0xb0] sm:$0xff] }
 0x3ca   : > { %7081 = vmatprep.subr.bf16.mxu1 %v8034_v32 }
 0x3cd   : > { %7082 = vmatpush3.bf16.msra.mxu1 %v8034_v32 }
 0x3ce   : > { %7083 = vmatprep.subr.bf16.mxu1 %v8035_v57 }
 0x3d0   : > { %7052 = vmatmul.mubr.bf16.gmra.mrb[12].mxu1 %v9165_v56 }
 0x3d1   : > { %7055 = vmatprep.mubr.bf16.mxu1 %v9172_v30  ;;  %7084 = vmatpush3.bf16.msra.mxu1 %v8035_v57  ;;  %v3918_v57 = vld [vmem:[#allocation2 + $0x88] sm:$0xff] }
 0x3d2   : > { %7085 = vmatprep.subr.bf16.mxu1 %v8036_v61 }
 0x3d5   : > { %7086 = vmatpush3.bf16.msra.mxu1 %v8036_v61 }
 0x3d6   : > { %7119 = vmatprep.subr.bf16.mxu1 %v8037_v29 }
 0x3d8   : > { %7056 = vmatmul.mubr.bf16.gmra.mrb[16].mxu1 %v9174_v12 }
 0x3d9   : > { %7059 = vmatprep.mubr.bf16.mxu1 %v9178_v25 }
 0x3db   : > { %v9277_v53 = vpop.f32.mrb[32].mxu0 }
 0x3dc   : > { %v9279_v35 = vpop.f32.mrb[33].mxu0 }
 0x3dd   : > { %v9281_v26 = vpop.f32.mrb[34].mxu0 }
 0x3de   : > { %v9283_v56 = vpop.f32.mrb[35].mxu0 }
 0x3e0   : > { %7060 = vmatmul.mubr.bf16.gmra.mrb[20].mxu1 %v9180_v5  ;;  %v3913_v5 = vld [vmem:[#allocation2 + $0x30] sm:$0xff] }
 0x3e1   : > { %7063 = vmatprep.mubr.bf16.mxu1 %v9184_v11  ;;  %v3636_v11 = vld [vmem:[#allocation2 + $0x207] sm:$0xff]  ;;  %v3944_v27 = vpack.c.bf16 %v3913_v5, %v3912_v3  ;;  %v8040_v5 = vld [vmem:[%s9665_s3 + $0x158] sm:$0xff]  }
 0x3e2   : > { %v9305_v41 = vpack.c.bf16 %v3637_v22, %v3636_v11  ;;  %v3920_v22 = vld [vmem:[#allocation2 + $0xa8] sm:$0xff]  ;;  %v8041_v3 = vld [vmem:[%s9665_s3 + $0x160] sm:$0xff]  }
 0x3e3   : > { %v9287_v30 = vpop.f32.mrb[36].mxu0  ;;  %v9341_v11 = vpack.c.bf16 %v3921_v13, %v3920_v22  ;;  %v3927_v13 = vld [vmem:[#allocation2 + $0x110] sm:$0xff]  ;;  %v3926_v22 = vld [vmem:[#allocation2 + $0x108] sm:$0xff] }
 0x3e4   : > { %v9289_v63 = vpop.f32.mrb[37].mxu0 }
 0x3e5   : > { %v9291_v4 = vpop.f32.mrb[38].mxu0 }
 0x3e6   : > { %v9293_v12 = vpop.f32.mrb[39].mxu0 }
 0x3e8   : > { %7064 = vmatmul.mubr.bf16.gmra.mrb[24].mxu1 %v9186_v21 }
 0x3e9   : > { %7067 = vmatprep.mubr.bf16.mxu1 %v9190_v39  ;;  %v3915_v39 = vld [vmem:[#allocation2 + $0x50] sm:$0xff] }
 0x3ea   : > { %v9316_v44 = vpack.c.bf16 %v3915_v39, %v3914_v49  ;;  %v3925_v39 = vld [vmem:[#allocation2 + $0xf0] sm:$0xff] }
 0x3eb   : > { %v9297_v25 = vpop.f32.mrb[40].mxu0 }
 0x3ec   : > { %v9299_v47 = vpop.f32.mrb[41].mxu0 }
 0x3ed   : > { %v9301_v19 = vpop.f32.mrb[42].mxu0 }
 0x3ee   : > { %v9303_v58 = vpop.f32.mrb[43].mxu0 }
 0x3f0   : > { %7068 = vmatmul.mubr.bf16.gmra.mrb[28].mxu1 %v9305_v41 }
 0x3f1   : > { %7087 = vmatprep.mubr.bf16.mxu1 %v3944_v27  ;;  %v3923_v27 = vld [vmem:[#allocation2 + $0xd0] sm:$0xff] }
 0x3f2   : > { %v9348_v49 = vpack.c.bf16 %v3923_v27, %v3922_v59  ;;  %v3928_v27 = vld [vmem:[#allocation2 + $0x128] sm:$0xff] }
 0x3f3   : > { %v9308_v21 = vpop.f32.mrb[44].mxu0 }
 0x3f4   : > { %v9310_v16 = vpop.f32.mrb[45].mxu0 }
 0x3f5   : > { %v9312_v10 = vpop.f32.mrb[46].mxu0 }
 0x3f6   : > { %v9314_v34 = vpop.f32.mrb[47].mxu0 }
 0x3f8   : > { %7088 = vmatmul.mubr.bf16.vlgmr.msra.gmra.mrb[0].mxu1 %v9316_v44 }
 0x3f9   : > { %7120 = vmatpush3.bf16.msra.mxu1 %v8037_v29  ;;  %7091 = vmatprep.mubr.bf16.mxu1 %v9321_v6  ;;  %v9336_v29 = vpack.c.bf16 %v3919_v1, %v3918_v57  ;;  %v9353_v1 = vpack.c.bf16 %v3925_v39, %v3924_v50  ;;  %v3929_v57 = vld [vmem:[#allocation2 + $0x130] sm:$0xff]  ;;  %v8044_v39 = vld [vmem:[%s9665_s3 + $0x178] sm:$0xff]  }
 0x3fa   : > { %7121 = vmatprep.subr.bf16.mxu1 %v8038_v24  ;;  %v9365_v59 = vpack.c.bf16 %v3929_v57, %v3928_v27  ;;  %v3931_v50 = vld [vmem:[#allocation2 + $0x150] sm:$0xff]  ;;  %v3934_v27 = vld [vmem:[#allocation2 + $0x188] sm:$0xff] }
 0x3fb   : > { %v9328_v42 = vpop.f32.mrb[48].mxu0 }
 0x3fc   : > { %v9330_v18 = vpop.f32.mrb[49].mxu0 }
 0x3fd   : > { %v9332_v32 = vpop.f32.mrb[50].mxu0  ;;  %7122 = vmatpush3.bf16.msra.mxu1 %v8038_v24  ;;  %v8042_v24 = vld [vmem:[%s9665_s3 + $0x168] sm:$0xff]  }
 0x3fe   : > { %9766 = vst [vmem:[#allocation3_spill] sm:$0xff] %v9332_v32  ;;  %v9334_v61 = vpop.f32.mrb[51].mxu0  ;;  %7123 = vmatprep.subr.bf16.mxu1 %v8039_v36 }
 0x3ff   : > { %9767 = vst [vmem:[#allocation5_spill] sm:$0xff] %v9334_v61 }
 0x400   : > { %7092 = vmatmul.mubr.bf16.gmra.mrb[4].mxu1 %v9336_v29 }
 0x401   : > { %7095 = vmatprep.mubr.bf16.mxu1 %v9341_v11  ;;  %7124 = vmatpush3.bf16.msra.mxu1 %v8039_v36  ;;  %v8043_v36 = vld [vmem:[%s9665_s3 + $0x170] sm:$0xff]  }
 0x402   : > { %7125 = vmatprep.subr.bf16.mxu1 %v8040_v5 }
 0x405   : > { %7126 = vmatpush3.bf16.msra.mxu1 %v8040_v5  ;;  %v9360_v5 = vpack.c.bf16 %v3927_v13, %v3926_v22  ;;  %v3930_v13 = vld [vmem:[#allocation2 + $0x148] sm:$0xff] }
 0x406   : > { %7127 = vmatprep.subr.bf16.mxu1 %v8041_v3  ;;  %v9374_v22 = vpack.c.bf16 %v3931_v50, %v3930_v13  ;;  %v4222_v50 = vld [vmem:[#allocation2 + $0x69] sm:$0xff]  ;;  %v4223_v13 = vld [vmem:[#allocation2 + $0x71] sm:$0xff] }
 0x408   : > { %7096 = vmatmul.mubr.bf16.gmra.mrb[8].mxu1 %v9348_v49 }
 0x409   : > { %7099 = vmatprep.mubr.bf16.mxu1 %v9353_v1  ;;  %7128 = vmatpush3.bf16.msra.mxu1 %v8041_v3  ;;  %v8045_v3 = vld [vmem:[%s9665_s3 + $0x180] sm:$0xff]  }
 0x40a   : > { %7129 = vmatprep.subr.bf16.mxu1 %v8042_v24 }
 0x40d   : > { %7130 = vmatpush3.bf16.msra.mxu1 %v8042_v24  ;;  %v9372_v24 = vld [vmem:[#allocation2 + $0x168] sm:$0xff] }
 0x40e   : > { %7131 = vmatprep.subr.bf16.mxu1 %v8043_v36  ;;  %v3954_v57 = vpack.c.bf16 %v9091_v20, %v9372_v24  ;;  %v4220_v20 = vld [vmem:[#allocation2 + $0x49] sm:$0xff] }
 0x410   : > { %7100 = vmatmul.mubr.bf16.gmra.mrb[12].mxu1 %v9360_v5 }
 0x411   : > { %7103 = vmatprep.mubr.bf16.mxu1 %v9365_v59  ;;  %7132 = vmatpush3.bf16.msra.mxu1 %v8043_v36  ;;  %v3935_v36 = vld [vmem:[#allocation2 + $0x190] sm:$0xff] }
 0x412   : > { %7133 = vmatprep.subr.bf16.mxu1 %v8044_v39  ;;  %v9379_v61 = vpack.c.bf16 %v3935_v36, %v3934_v27  ;;  %v8046_v36 = vld [vmem:[%s9665_s3 + $0x188] sm:$0xff]   ;;  %v4252_v27 = vpack.c.bf16 %v4223_v13, %v4222_v50  ;;  %v4229_v13 = vld [vmem:[#allocation2 + $0xd1] sm:$0xff] }
 0x413   : > { %v4228_v50 = vld [vmem:[#allocation2 + $0xc9] sm:$0xff] }
 0x415   : > { %7134 = vmatpush3.bf16.msra.mxu1 %v8044_v39  ;;  %v4221_v39 = vld [vmem:[#allocation2 + $0x51] sm:$0xff] }
 0x416   : > { %7167 = vmatprep.subr.bf16.mxu1 %v8045_v3 }
 0x418   : > { %7104 = vmatmul.mubr.bf16.gmra.mrb[16].mxu1 %v9374_v22 }
 0x419   : > { %7107 = vmatprep.mubr.bf16.mxu1 %v3954_v57  ;;  %v4251_v57 = vpack.c.bf16 %v4221_v39, %v4220_v20  ;;  %v8048_v20 = vld [vmem:[%s9665_s3 + $0x198] sm:$0xff]  }
 0x420   : > { %7108 = vmatmul.mubr.bf16.gmra.mrb[20].mxu1 %v9379_v61 }
 0x421   : > { %7111 = vmatprep.mubr.bf16.mxu1 %v9109_v55  ;;  %v4224_v55 = vld [vmem:[#allocation2 + $0x89] sm:$0xff] }
 0x428   : > { %7112 = vmatmul.mubr.bf16.gmra.mrb[24].mxu1 %v9105_v33  ;;  %v8047_v33 = vld [vmem:[%s9665_s3 + $0x190] sm:$0xff]  }
 0x429   : > { %7115 = vmatprep.mubr.bf16.mxu1 %v9120_v62  ;;  %v4226_v62 = vld [vmem:[#allocation2 + $0xa9] sm:$0xff] }
 0x430   : > { %7116 = vmatmul.mubr.bf16.gmra.mrb[28].mxu1 %v9118_v54  ;;  %v4225_v54 = vld [vmem:[#allocation2 + $0x91] sm:$0xff] }
 0x431   : > { %7135 = vmatprep.mubr.bf16.mxu1 %v9193_v51  ;;  %v4227_v51 = vld [vmem:[#allocation2 + $0xb1] sm:$0xff]  ;;  %v4253_v32 = vpack.c.bf16 %v4225_v54, %v4224_v55  ;;  %v8050_v55 = vld [vmem:[%s9665_s3 + $0x1a8] sm:$0xff]  }
 0x432   : > { %v4254_v39 = vpack.c.bf16 %v4227_v51, %v4226_v62  ;;  %v4233_v62 = vld [vmem:[#allocation2 + $0x111] sm:$0xff]  ;;  %v4234_v51 = vld [vmem:[#allocation2 + $0x129] sm:$0xff] }
 0x438   : > { %7136 = vmatmul.mubr.bf16.vlgmr.msra.gmra.mrb[0].mxu1 %v4251_v57  ;;  %v4230_v57 = vld [vmem:[#allocation2 + $0xe9] sm:$0xff] }
 0x439   : > { %7168 = vmatpush3.bf16.msra.mxu1 %v8045_v3  ;;  %7139 = vmatprep.mubr.bf16.mxu1 %v4252_v27  ;;  %v8049_v3 = vld [vmem:[%s9665_s3 + $0x1a0] sm:$0xff]   ;;  %v4231_v27 = vld [vmem:[#allocation2 + $0xf1] sm:$0xff] }
 0x43a   : > { %7169 = vmatprep.subr.bf16.mxu1 %v8046_v36  ;;  %v4256_v54 = vpack.c.bf16 %v4231_v27, %v4230_v57  ;;  %v4236_v57 = vld [vmem:[#allocation2 + $0x149] sm:$0xff]  ;;  %v4237_v27 = vld [vmem:[#allocation2 + $0x151] sm:$0xff] }
 0x43d   : > { %7170 = vmatpush3.bf16.msra.mxu1 %v8046_v36  ;;  %v4255_v36 = vpack.c.bf16 %v4229_v13, %v4228_v50  ;;  %v8052_v50 = vld [vmem:[%s9665_s3 + $0x1b8] sm:$0xff]  }
 0x43e   : > { %7171 = vmatprep.subr.bf16.mxu1 %v8047_v33 }
 0x440   : > { %7140 = vmatmul.mubr.bf16.gmra.mrb[4].mxu1 %v4253_v32  ;;  %v8051_v32 = vld [vmem:[%s9665_s3 + $0x1b0] sm:$0xff]  }
 0x441   : > { %7143 = vmatprep.mubr.bf16.mxu1 %v4254_v39  ;;  %7172 = vmatpush3.bf16.msra.mxu1 %v8047_v33  ;;  %v4232_v33 = vld [vmem:[#allocation2 + $0x109] sm:$0xff]  ;;  %v4235_v39 = vld [vmem:[#allocation2 + $0x131] sm:$0xff] }
 0x442   : > { %7173 = vmatprep.subr.bf16.mxu1 %v8048_v20  ;;  %v4258_v13 = vpack.c.bf16 %v4235_v39, %v4234_v51  ;;  %v4526_v51 = vld [vmem:[#allocation2 + $0x4f] sm:$0xff] }
 0x445   : > { %7174 = vmatpush3.bf16.msra.mxu1 %v8048_v20  ;;  %v4257_v20 = vpack.c.bf16 %v4233_v62, %v4232_v33  ;;  %v4249_v62 = vld [vmem:[#allocation2 + $0x211] sm:$0xff] }
 0x446   : > { %7175 = vmatprep.subr.bf16.mxu1 %v8049_v3 }
 0x448   : > { %7144 = vmatmul.mubr.bf16.gmra.mrb[8].mxu1 %v4255_v36  ;;  %v4238_v36 = vld [vmem:[#allocation2 + $0x169] sm:$0xff] }
 0x449   : > { %7147 = vmatprep.mubr.bf16.mxu1 %v4256_v54  ;;  %7176 = vmatpush3.bf16.msra.mxu1 %v8049_v3  ;;  %v8053_v3 = vld [vmem:[%s9665_s3 + $0x1c0] sm:$0xff]   ;;  %v4239_v54 = vld [vmem:[#allocation2 + $0x171] sm:$0xff] }
 0x44a   : > { %7177 = vmatprep.subr.bf16.mxu1 %v8050_v55  ;;  %v4260_v33 = vpack.c.bf16 %v4239_v54, %v4238_v36  ;;  %v4529_v36 = vld [vmem:[#allocation2 + $0x87] sm:$0xff]  ;;  %v4532_v54 = vld [vmem:[#allocation2 + $0xaf] sm:$0xff] }
 0x44d   : > { %7178 = vmatpush3.bf16.msra.mxu1 %v8050_v55  ;;  %v4259_v55 = vpack.c.bf16 %v4237_v27, %v4236_v57  ;;  %v4530_v57 = vld [vmem:[#allocation2 + $0x8f] sm:$0xff]  ;;  %v4527_v27 = vld [vmem:[#allocation2 + $0x67] sm:$0xff] }
 0x44e   : > { %7179 = vmatprep.subr.bf16.mxu1 %v8051_v32 }
 0x450   : > { %7148 = vmatmul.mubr.bf16.gmra.mrb[12].mxu1 %v4257_v20  ;;  %v4525_v20 = vld [vmem:[#allocation2 + $0x47] sm:$0xff] }
 0x451   : > { %7151 = vmatprep.mubr.bf16.mxu1 %v4258_v13  ;;  %7180 = vmatpush3.bf16.msra.mxu1 %v8051_v32  ;;  %v4248_v32 = vld [vmem:[#allocation2 + $0x209] sm:$0xff] }
 0x452   : > { %7181 = vmatprep.subr.bf16.mxu1 %v8052_v50  ;;  %v9415_v39 = vpack.c.bf16 %v4249_v62, %v4248_v32  ;;  %v4528_v13 = vld [vmem:[#allocation2 + $0x6f] sm:$0xff]  ;;  %v4533_v62 = vld [vmem:[#allocation2 + $0xc7] sm:$0xff] }
 0x455   : > { %7182 = vmatpush3.bf16.msra.mxu1 %v8052_v50  ;;  %v4557_v50 = vpack.c.bf16 %v4526_v51, %v4525_v20  ;;  %v8056_v51 = vld [vmem:[%s9665_s3 + $0x1d8] sm:$0xff]  }
 0x456   : > { %7215 = vmatprep.subr.bf16.mxu1 %v8053_v3 }
 0x458   : > { %7152 = vmatmul.mubr.bf16.gmra.mrb[16].mxu1 %v4259_v55  ;;  %v4534_v55 = vld [vmem:[#allocation2 + $0xcf] sm:$0xff] }
 0x459   : > { %7155 = vmatprep.mubr.bf16.mxu1 %v4260_v33  ;;  %v4531_v33 = vld [vmem:[#allocation2 + $0xa7] sm:$0xff]  ;;  %v4561_v20 = vpack.c.bf16 %v4534_v55, %v4533_v62  ;;  %v8060_v62 = vld [vmem:[%s9665_s3 + $0x1f8] sm:$0xff]  }
 0x45a   : > { %v4560_v32 = vpack.c.bf16 %v4532_v54, %v4531_v33  ;;  %v4542_v54 = vld [vmem:[#allocation2 + $0x14f] sm:$0xff]  ;;  %v4539_v55 = vld [vmem:[#allocation2 + $0x127] sm:$0xff] }
 0x460   : > { %7156 = vmatmul.mubr.bf16.gmra.mrb[20].mxu1 %v9229_v17  ;;  %v4558_v17 = vpack.c.bf16 %v4528_v13, %v4527_v27  ;;  %v4538_v13 = vld [vmem:[#allocation2 + $0x10f] sm:$0xff] }
 0x461   : > { %7159 = vmatprep.mubr.bf16.mxu1 %v9233_v2  ;;  %v8054_v2 = vld [vmem:[%s9665_s3 + $0x1c8] sm:$0xff]  }
 0x468   : > { %7160 = vmatmul.mubr.bf16.gmra.mrb[24].mxu1 %v9235_v15  ;;  %v4559_v15 = vpack.c.bf16 %v4530_v57, %v4529_v36  ;;  %v4535_v57 = vld [vmem:[#allocation2 + $0xe7] sm:$0xff] }
 0x469   : > { %7163 = vmatprep.mubr.bf16.mxu1 %v9239_v0  ;;  %v8055_v0 = vld [vmem:[%s9665_s3 + $0x1d0] sm:$0xff]   ;;  %v8058_v36 = vld [vmem:[%s9665_s3 + $0x1e8] sm:$0xff]  }
 0x470   : > { %7164 = vmatmul.mubr.bf16.gmra.mrb[28].mxu1 %v9415_v39 }
 0x471   : > { %7183 = vmatprep.mubr.bf16.mxu1 %v4557_v50  ;;  %v4536_v50 = vld [vmem:[#allocation2 + $0xef] sm:$0xff] }
 0x472   : > { %v4562_v27 = vpack.c.bf16 %v4536_v50, %v4535_v57  ;;  %v4543_v50 = vld [vmem:[#allocation2 + $0x167] sm:$0xff] }
 0x473   : > { %v4545_v57 = vld [vmem:[#allocation2 + $0x187] sm:$0xff] }
 0x478   : > { %7184 = vmatmul.mubr.bf16.vlgmr.msra.gmra.mrb[0].mxu1 %v4558_v17  ;;  %v4537_v17 = vld [vmem:[#allocation2 + $0x107] sm:$0xff] }
 0x479   : > { %7216 = vmatpush3.bf16.msra.mxu1 %v8053_v3  ;;  %7187 = vmatprep.mubr.bf16.mxu1 %v4559_v15  ;;  %v8057_v3 = vld [vmem:[%s9665_s3 + $0x1e0] sm:$0xff]   ;;  %v8059_v15 = vld [vmem:[%s9665_s3 + $0x1f0] sm:$0xff]  }
 0x47a   : > { %7217 = vmatprep.subr.bf16.mxu1 %v8054_v2 }
 0x47d   : > { %7218 = vmatpush3.bf16.msra.mxu1 %v8054_v2  ;;  %v4563_v2 = vpack.c.bf16 %v4538_v13, %v4537_v17 }
 0x47e   : > { %7219 = vmatprep.subr.bf16.mxu1 %v8055_v0 }
 0x480   : > { %7188 = vmatmul.mubr.bf16.gmra.mrb[4].mxu1 %v4560_v32  ;;  %v4541_v32 = vld [vmem:[#allocation2 + $0x147] sm:$0xff] }
 0x481   : > { %7191 = vmatprep.mubr.bf16.mxu1 %v4561_v20  ;;  %7220 = vmatpush3.bf16.msra.mxu1 %v8055_v0  ;;  %v4540_v0 = vld [vmem:[#allocation2 + $0x12f] sm:$0xff] }
 0x482   : > { %7221 = vmatprep.subr.bf16.mxu1 %v8056_v51  ;;  %v4564_v33 = vpack.c.bf16 %v4540_v0, %v4539_v55  ;;  %v4544_v20 = vld [vmem:[#allocation2 + $0x16f] sm:$0xff]  ;;  %v4547_v0 = vld [vmem:[#allocation2 + $0x1a7] sm:$0xff] }
 0x483   : > { %v4566_v13 = vpack.c.bf16 %v4544_v20, %v4543_v50  ;;  %v4556_v20 = vld [vmem:[#allocation2 + $0x22f] sm:$0xff] }
 0x485   : > { %7222 = vmatpush3.bf16.msra.mxu1 %v8056_v51  ;;  %v4565_v51 = vpack.c.bf16 %v4542_v54, %v4541_v32  ;;  %v4551_v32 = vld [vmem:[#allocation2 + $0x1e7] sm:$0xff] }
 0x486   : > { %7223 = vmatprep.subr.bf16.mxu1 %v8057_v3 }
 0x488   : > { %7192 = vmatmul.mubr.bf16.gmra.mrb[8].mxu1 %v4562_v27  ;;  %v8061_v27 = vld [vmem:[%s9665_s3 + $0x200] sm:$0xff]  }
 0x489   : > { %7195 = vmatprep.mubr.bf16.mxu1 %v4563_v2  ;;  %7224 = vmatpush3.bf16.msra.mxu1 %v8057_v3  ;;  %v4546_v3 = vld [vmem:[#allocation2 + $0x18f] sm:$0xff] }
 0x48a   : > { %7225 = vmatprep.subr.bf16.mxu1 %v8058_v36  ;;  %v4567_v17 = vpack.c.bf16 %v4546_v3, %v4545_v57  ;;  %v4550_v2 = vld [vmem:[#allocation2 + $0x1cf] sm:$0xff] }
 0x48b   : > { %v8062_v3 = vld [vmem:[%s9665_s3 + $0x208] sm:$0xff]  }
 0x48c   : > { %v4853_v57 = vld [vmem:[#allocation2 + $0x1a8] sm:$0xff] }
 0x48d   : > { %7226 = vmatpush3.bf16.msra.mxu1 %v8058_v36  ;;  %v4548_v36 = vld [vmem:[#allocation2 + $0x1af] sm:$0xff] }
 0x48e   : > { %7227 = vmatprep.subr.bf16.mxu1 %v8059_v15  ;;  %v4568_v54 = vpack.c.bf16 %v4548_v36, %v4547_v0  ;;  %v4860_v0 = vld [vmem:[#allocation2 + $0x210] sm:$0xff] }
 0x490   : > { %7196 = vmatmul.mubr.bf16.gmra.mrb[12].mxu1 %v4564_v33  ;;  %v4552_v33 = vld [vmem:[#allocation2 + $0x1ef] sm:$0xff] }
 0x491   : > { %7199 = vmatprep.mubr.bf16.mxu1 %v4565_v51  ;;  %7228 = vmatpush3.bf16.msra.mxu1 %v8059_v15  ;;  %v4549_v15 = vld [vmem:[#allocation2 + $0x1c7] sm:$0xff] }
 0x492   : > { %7229 = vmatprep.subr.bf16.mxu1 %v8060_v62  ;;  %v4569_v55 = vpack.c.bf16 %v4550_v2, %v4549_v15  ;;  %v4555_v51 = vld [vmem:[#allocation2 + $0x227] sm:$0xff]  ;;  %v4858_v2 = vld [vmem:[#allocation2 + $0x1f0] sm:$0xff] }
 0x493   : > { %v4572_v50 = vpack.c.bf16 %v4556_v20, %v4555_v51  ;;  %v5159_v20 = vld [vmem:[#allocation2 + $0x1a9] sm:$0xff] }
 0x495   : > { %7230 = vmatpush3.bf16.msra.mxu1 %v8060_v62  ;;  %v4570_v62 = vpack.c.bf16 %v4552_v33, %v4551_v32 }
 0x496   : > { %7345 = vmatprep.subr.bf16.mxu1 %v8061_v27 }
 0x498   : > { %7200 = vmatmul.mubr.bf16.gmra.mrb[16].mxu1 %v4566_v13 }
 0x499   : > { %7203 = vmatprep.mubr.bf16.mxu1 %v4567_v17  ;;  %v4855_v17 = vld [vmem:[#allocation2 + $0x1c8] sm:$0xff] }
 0x4a0   : > { %7204 = vmatmul.mubr.bf16.gmra.mrb[20].mxu1 %v4568_v54  ;;  %v4857_v54 = vld [vmem:[#allocation2 + $0x1e8] sm:$0xff] }
 0x4a1   : > { %7207 = vmatprep.mubr.bf16.mxu1 %v4569_v55  ;;  %v4876_v15 = vpack.c.bf16 %v4858_v2, %v4857_v54  ;;  %v4859_v55 = vld [vmem:[#allocation2 + $0x208] sm:$0xff] }
 0x4a2   : > { %v4877_v33 = vpack.c.bf16 %v4860_v0, %v4859_v55 }
 0x4a8   : > { %7208 = vmatmul.mubr.bf16.gmra.mrb[24].mxu1 %v4570_v62  ;;  %v5157_v62 = vld [vmem:[#allocation2 + $0x189] sm:$0xff] }
 0x4a9   : > { %7211 = vmatprep.mubr.bf16.mxu1 %v9305_v41  ;;  %v8063_v41 = vld [vmem:[%s9665_s3 + $0x210] sm:$0xff]  }
 0x4b0   : > { %7212 = vmatmul.mubr.bf16.gmra.mrb[28].mxu1 %v4572_v50  ;;  %v5160_v50 = vld [vmem:[#allocation2 + $0x1b1] sm:$0xff] }
 0x4b1   : > { %7231 = vmatprep.mubr.bf16.mxu1 %v9316_v44  ;;  %v8064_v44 = vld [vmem:[%s9665_s3 + $0x218] sm:$0xff]  }
 0x4b8   : > { %7232 = vmatmul.mubr.bf16.vlgmr.msra.gmra.mrb[0].mxu1 %v9321_v6  ;;  %v8065_v6 = vld [vmem:[%s9665_s3 + $0x220] sm:$0xff]  }
 0x4b9   : > { %7353 = vmatpush3.bf16.msra.mxu1 %v8061_v27  ;;  %7235 = vmatprep.mubr.bf16.mxu1 %v9336_v29  ;;  %v8066_v29 = vld [vmem:[%s9665_s3 + $0x228] sm:$0xff]  }
 0x4ba   : > { %7346 = vmatprep.subr.bf16.mxu1 %v8062_v3 }
 0x4bd   : > { %7354 = vmatpush3.bf16.msra.mxu1 %v8062_v3  ;;  %v5161_v3 = vld [vmem:[#allocation2 + $0x1c9] sm:$0xff] }
 0x4be   : > { %7347 = vmatprep.subr.bf16.mxu1 %v8063_v41 }
 0x4c0   : > { %7236 = vmatmul.mubr.bf16.gmra.mrb[4].mxu1 %v9341_v11  ;;  %v8067_v11 = vld [vmem:[%s9665_s3 + $0x230] sm:$0xff]  }
 0x4c1   : > { %7239 = vmatprep.mubr.bf16.mxu1 %v9348_v49  ;;  %7355 = vmatpush3.bf16.msra.mxu1 %v8063_v41  ;;  %v8068_v49 = vld [vmem:[%s9665_s3 + $0x238] sm:$0xff]  }
 0x4c2   : > { %7348 = vmatprep.subr.bf16.mxu1 %v8064_v44  ;;  %v5162_v41 = vld [vmem:[#allocation2 + $0x1d1] sm:$0xff] }
 0x4c5   : > { %7356 = vmatpush3.bf16.msra.mxu1 %v8064_v44  ;;  %v5180_v44 = vpack.c.bf16 %v5160_v50, %v5159_v20 }
 0x4c6   : > { %7349 = vmatprep.subr.bf16.mxu1 %v8065_v6 }
 0x4c8   : > { %7240 = vmatmul.mubr.bf16.gmra.mrb[8].mxu1 %v9353_v1  ;;  %v4850_v1 = vld [vmem:[#allocation2 + $0x170] sm:$0xff] }
 0x4c9   : > { %7243 = vmatprep.mubr.bf16.mxu1 %v9360_v5  ;;  %7357 = vmatpush3.bf16.msra.mxu1 %v8065_v6  ;;  %v5482_v5 = vld [vmem:[%s9667_s5] sm:$0x3]  ;;  %v4872_v13 = vpack.c.bf16 %v4850_v1, %v9372_v24 }
 0x4ca   : > { %7350 = vmatprep.subr.bf16.mxu1 %v8066_v29  ;;  %v8069_v24 = vld [vmem:[#allocation2] sm:$0xff]  ;;  %v5491_v6 = vsel %vm579_vm0, %v5482_v5, 0 }
 0x4cb   : > { %v4878_v32 = vpack.c.bf16 %v8069_v24, %v8069_v24 }
 0x4cd   : > { %7358 = vmatpush3.bf16.msra.mxu1 %v8066_v29  ;;  %v5181_v29 = vpack.c.bf16 %v5162_v41, %v5161_v3 }
 0x4ce   : > { %7351 = vmatprep.subr.bf16.mxu1 %v8067_v11 }
 0x4d0   : > { %7244 = vmatmul.mubr.bf16.gmra.mrb[12].mxu1 %v9365_v59  ;;  %v4854_v59 = vld [vmem:[#allocation2 + $0x1b0] sm:$0xff] }
 0x4d1   : > { %7247 = vmatprep.mubr.bf16.mxu1 %v9374_v22  ;;  %7359 = vmatpush3.bf16.msra.mxu1 %v8067_v11  ;;  %v4856_v22 = vld [vmem:[#allocation2 + $0x1d0] sm:$0xff]  ;;  %v4874_v27 = vpack.c.bf16 %v4854_v59, %v4853_v57 }
 0x4d2   : > { %7352 = vmatprep.subr.bf16.mxu1 %v8068_v49  ;;  %v4875_v36 = vpack.c.bf16 %v4856_v22, %v4855_v17  ;;  %v5163_v11 = vld [vmem:[#allocation2 + $0x1e9] sm:$0xff]  ;;  %v5168_v59 = vld [vmem:[#allocation2 + $0x231] sm:$0xff] }
 0x4d5   : > { %7360 = vmatpush3.bf16.msra.mxu1 %v8068_v49  ;;  %v5164_v49 = vld [vmem:[#allocation2 + $0x1f1] sm:$0xff] }
 0x4d6   : > { %7978 = vmatprep.subr.msk.bf16.mxu1 %vm579_vm0, %v5482_v5  ;;  %v5182_v1 = vpack.c.bf16 %v5164_v49, %v5163_v11 }
 0x4d8   : > { %7248 = vmatmul.mubr.bf16.gmra.mrb[16].mxu1 %v4872_v13  ;;  %v5167_v13 = vld [vmem:[#allocation2 + $0x229] sm:$0xff] }
 0x4d9   : > { %7251 = vmatprep.mubr.bf16.mxu1 %v9379_v61  ;;  %v5158_v61 = vld [vmem:[#allocation2 + $0x191] sm:$0xff]  ;;  %v5184_v22 = vpack.c.bf16 %v5168_v59, %v5167_v13 }
 0x4da   : > { %v5179_v51 = vpack.c.bf16 %v5158_v61, %v5157_v62 }
 0x4e0   : > { %7252 = vmatmul.mubr.bf16.gmra.mrb[20].mxu1 %v4874_v27 }
 0x4e1   : > { %7255 = vmatprep.mubr.bf16.mxu1 %v4875_v36 }
 0x4e8   : > { %7256 = vmatmul.mubr.bf16.gmra.mrb[24].mxu1 %v4876_v15 }
 0x4e9   : > { %7259 = vmatprep.mubr.bf16.mxu1 %v4877_v33 }
 0x4f0   : > { %7260 = vmatmul.mubr.bf16.gmra.mrb[28].mxu1 %v4878_v32 }
 0x4f1   : > { %7299 = vmatprep.mubr.bf16.mxu1 %v5179_v51 }
 0x4f8   : > { %7300 = vmatmul.mubr.bf16.vlgmr.msra.gmra.mrb[20].mxu1 %v5180_v44 }
 0x4f9   : > { %7312 = vmatpush3.bf16.msra.mxu1 %v5491_v6  ;;  %7303 = vmatprep.mubr.bf16.mxu1 %v5181_v29 }
 0x500   : > { %7304 = vmatmul.mubr.bf16.gmra.mrb[24].mxu1 %v5182_v1 }
 0x501   : > { %7307 = vmatprep.mubr.bf16.mxu1 %v9415_v39 }
 0x508   : > { %7308 = vmatmul.mubr.bf16.gmra.mrb[28].mxu1 %v5184_v22 }
 0x509   : > { %7313 = vmatprep.mubr.msk.bf16.mxu1 %vm530_vm2, %v9759_v9 }
 0x510   : > { %7314 = vmatmul.mubr.msk.bf16.vlgmr.msra.gmra.mrb[32].mxu1 %vm530_vm2, %v9760_v40 }
 0x511   : > { %7317 = vmatprep.mubr.msk.bf16.mxu1 %vm530_vm2, %v9761_v45 }
 0x518   : > { %7318 = vmatmul.mubr.msk.bf16.gmra.mrb[36].mxu1 %vm530_vm2, %v9762_v46 }
 0x519   : > { %7321 = vmatprep.mubr.msk.bf16.mxu1 %vm530_vm2, %v9763_v38 }
 0x520   : > { %7322 = vmatmul.mubr.msk.bf16.gmra.mrb[40].mxu1 %vm530_vm2, %v9764_v14 }
 0x521   : > { %7325 = vmatprep.mubr.msk.bf16.mxu1 %vm530_vm2, %v8394_v7 }
 0x528   : > { %7326 = vmatmul.mubr.msk.bf16.gmra.mrb[44].mxu1 %vm530_vm2, %v9765_v37 }
 0x529   : > { %7329 = vmatprep.mubr.msk.bf16.mxu1 %vm530_vm2, %v8402_v8 }
 0x530   : > { %7330 = vmatmul.mubr.msk.bf16.gmra.mrb[48].mxu1 %vm530_vm2, %v8404_v28 }
 0x531   : > { %7333 = vmatprep.mubr.msk.bf16.mxu1 %vm530_vm2, %v8406_v48 }
 0x538   : > { %7334 = vmatmul.mubr.msk.bf16.gmra.mrb[20].mxu1 %vm530_vm2, %v8415_v23 }
 0x539   : > { %7337 = vmatprep.mubr.msk.bf16.mxu1 %vm530_vm2, %v8616_v60 }
 0x540   : > { %7338 = vmatmul.mubr.msk.bf16.gmra.mrb[24].mxu1 %vm530_vm2, %v8620_v31 }
 0x541   : > { %7341 = vmatprep.mubr.msk.bf16.mxu1 %vm530_vm2, %v8646_v43 }
 0x548   : > { %7342 = vmatmul.mubr.msk.bf16.gmra.mrb[28].mxu1 %vm530_vm2, %v8813_v52 }
 0x58b   : > { %v7233_v7 = vpop.f32.mrb[0].mxu1 }
 0x58c   : > { %v7361_v8 = vadd.f32 %v9277_v53, %v7233_v7  ;;  %v4978_v28 = vpop.f32.mrb[1].mxu1 }
 0x58d   : > { %v7365_v48 = vadd.f32 %v9279_v35, %v4978_v28  ;;  %v7234_v9 = vpop.f32.mrb[2].mxu1 }
 0x58e   : > { %v7369_v23 = vadd.f32 %v9281_v26, %v7234_v9  ;;  %v4981_v40 = vpop.f32.mrb[3].mxu1 }
 0x58f   : > { %v7373_v60 = vadd.f32 %v9283_v56, %v4981_v40 }
 0x593   : > { %v7237_v45 = vpop.f32.mrb[4].mxu1 }
 0x594   : > { %v7377_v31 = vadd.f32 %v9287_v30, %v7237_v45  ;;  %v4994_v46 = vpop.f32.mrb[5].mxu1 }
 0x595   : > { %v7381_v43 = vadd.f32 %v9289_v63, %v4994_v46  ;;  %v7238_v38 = vpop.f32.mrb[6].mxu1 }
 0x596   : > { %v7385_v14 = vadd.f32 %v9291_v4, %v7238_v38  ;;  %v4997_v37 = vpop.f32.mrb[7].mxu1 }
 0x597   : > { %v7389_v52 = vadd.f32 %v9293_v12, %v4997_v37 }
 0x59b   : > { %v7241_v53 = vpop.f32.mrb[8].mxu1 }
 0x59c   : > { %v9522_v35 = vadd.f32 %v9297_v25, %v7241_v53  ;;  %v5010_v26 = vpop.f32.mrb[9].mxu1 }
 0x59d   : > { %v9525_v39 = vadd.f32 %v9299_v47, %v5010_v26  ;;  %v7242_v56 = vpop.f32.mrb[10].mxu1 }
 0x59e   : > { %v9528_v30 = vadd.f32 %v9301_v19, %v7242_v56  ;;  %v5013_v5 = vpop.f32.mrb[11].mxu1 }
 0x59f   : > { %v9531_v63 = vadd.f32 %v9303_v58, %v5013_v5 }
 0x5a3   : > { %v7245_v4 = vpop.f32.mrb[12].mxu1 }
 0x5a4   : > { %v9534_v57 = vadd.f32 %v9308_v21, %v7245_v4  ;;  %v5026_v12 = vpop.f32.mrb[13].mxu1 }
 0x5a5   : > { %v9537_v25 = vadd.f32 %v9310_v16, %v5026_v12  ;;  %v7246_v27 = vpop.f32.mrb[14].mxu1  ;;  %v9768_v16 = vld [vmem:[#allocation3_spill] sm:$0xff] }
 0x5a6   : > { %v9540_v47 = vadd.f32 %v9312_v10, %v7246_v27  ;;  %v5029_v17 = vpop.f32.mrb[15].mxu1  ;;  %v9769_v10 = vld [vmem:[#allocation5_spill] sm:$0xff] }
 0x5a7   : > { %v9543_v19 = vadd.f32 %v9314_v34, %v5029_v17  ;;  %v9560_v34 = vld [vmem:[%s9666_s4] ss:$0 sm:$0xff] }
 0x5a8   : > { %v7374_v33 = vadd.f32 %v7373_v60, %v9560_v34  ;;  %v7362_v24 = vadd.f32 %v7361_v8, %v9560_v34  ;;  %v7366_v62 = vadd.f32 %v7365_v48, %v9560_v34  ;;  %v7378_v44 = vadd.f32 %v7377_v31, %v9560_v34 }
 0x5a9   : > { %v7382_v49 = vadd.f32 %v7381_v43, %v9560_v34  ;;  %v7386_v59 = vadd.f32 %v7385_v14, %v9560_v34  ;;  %v7390_v8 = vadd.f32 %v7389_v52, %v9560_v34  ;;  %v7394_v14 = vadd.f32 %v9522_v35, %v9560_v34 }
 0x5aa   : > { %v7398_v26 = vadd.f32 %v9525_v39, %v9560_v34  ;;  %v7402_v4 = vadd.f32 %v9528_v30, %v9560_v34  ;;  %v7406_v27 = vadd.f32 %v9531_v63, %v9560_v34 }
 0x5ab   : > { %v7249_v36 = vpop.f32.mrb[16].mxu1 }
 0x5ac   : > { %v9546_v58 = vadd.f32 %v9328_v42, %v7249_v36  ;;  %v5042_v2 = vpop.f32.mrb[17].mxu1  ;;  %v7370_v42 = vadd.f32 %v7369_v23, %v9560_v34 }
 0x5ad   : > { %v9549_v21 = vadd.f32 %v9330_v18, %v5042_v2  ;;  %v7250_v0 = vpop.f32.mrb[18].mxu1  ;;  %v9567_v18 = vld [vmem:[%s9668_s6] ss:$0 sm:$0xff] }
 0x5ae   : > { %v9552_v54 = vadd.f32 %v9768_v16, %v7250_v0  ;;  %v5045_v15 = vpop.f32.mrb[19].mxu1  ;;  %v7371_v20 = vadd.f32 %v7370_v42, %v9567_v18  ;;  %v7375_v41 = vadd.f32 %v7374_v33, %v9567_v18  ;;  %v7379_v9 = vadd.f32 %v7378_v44, %v9567_v18 }
 0x5af   : > { %v9555_v55 = vadd.f32 %v9769_v10, %v5045_v15  ;;  %v7383_v40 = vadd.f32 %v7382_v49, %v9567_v18  ;;  %v7387_v31 = vadd.f32 %v7386_v59, %v9567_v18  ;;  %v7391_v38 = vadd.f32 %v7390_v8, %v9567_v18 }
 0x5b0   : > { %v7395_v35 = vadd.f32 %v7394_v14, %v9567_v18  ;;  %v7399_v39 = vadd.f32 %v7398_v26, %v9567_v18  ;;  %v7403_v30 = vadd.f32 %v7402_v4, %v9567_v18  ;;  %v7407_v63 = vadd.f32 %v7406_v27, %v9567_v18 }
 0x5b1   : > { %v7410_v10 = vadd.f32 %v9534_v57, %v9560_v34  ;;  %v7426_v49 = vadd.f32 %v9546_v58, %v9560_v34  ;;  %v7443_v26 = vadd.f32 %v9567_v18, %v9560_v34 }
 0x5b3   : > { %v7411_v57 = vadd.f32 %v7410_v10, %v9567_v18  ;;  %v7427_v58 = vadd.f32 %v7426_v49, %v9567_v18 }
 0x5e3   : > { %v7315_v32 = vpop.f32.mrb[32].mxu1 }
 0x5e4   : > { %v7363_v61 = vadd.f32 %v7362_v24, %v7315_v32  ;;  %v5527_v51 = vpop.f32.mrb[33].mxu1  ;;  %v7414_v32 = vadd.f32 %v9537_v25, %v9560_v34 }
 0x5e5   : > { %v7367_v50 = vadd.f32 %v7366_v62, %v5527_v51  ;;  %v7316_v3 = vpop.f32.mrb[34].mxu1  ;;  %v7418_v51 = vadd.f32 %v9540_v47, %v9560_v34 }
 0x5e6   : > { %v7364_v6 = vadd.f32 %v7363_v61, %v9567_v18  ;;  %v7372_v29 = vadd.f32 %v7371_v20, %v7316_v3  ;;  %v5530_v11 = vpop.f32.mrb[35].mxu1  ;;  %v7415_v25 = vadd.f32 %v7414_v32, %v9567_v18 }
 0x5e7   : > { %v7368_v1 = vadd.f32 %v7367_v50, %v9567_v18  ;;  %v7376_v13 = vadd.f32 %v7375_v41, %v5530_v11  ;;  %v7422_v50 = vadd.f32 %v9543_v19, %v9560_v34  ;;  %v7419_v47 = vadd.f32 %v7418_v51, %v9567_v18 }
 0x5e8   : > { %v5688_v22 = vmax.f32 %v7364_v6, 0.0  ;;  %v5689_v7 = vmax.f32 %v7372_v29, 0.0 }
 0x5e9   : > { %v5686_v28 = vmax.f32 %v7368_v1, 0.0  ;;  %v5687_v48 = vmax.f32 %v7376_v13, 0.0  ;;  %v7423_v19 = vadd.f32 %v7422_v50, %v9567_v18 }
 0x5ea   : > { %5720 = vst [vmem:[%s9580_s25 + $0x10] sm:$0xff] %v5688_v22  ;;  %5721 = vst [vmem:[%s9580_s25 + $0x18] sm:$0xff] %v5689_v7  ;;  %v7430_v22 = vadd.f32 %v9549_v21, %v9560_v34 }
 0x5eb   : > { %5718 = vst [vmem:[%s9580_s25] sm:$0xff] %v5686_v28  ;;  %5719 = vst [vmem:[%s9580_s25 + $0x8] sm:$0xff] %v5687_v48  ;;  %v7319_v23 = vpop.f32.mrb[36].mxu1  ;;  %v7434_v28 = vadd.f32 %v9552_v54, %v9560_v34 }
 0x5ec   : > { %v7380_v60 = vadd.f32 %v7379_v9, %v7319_v23  ;;  %v5543_v45 = vpop.f32.mrb[37].mxu1  ;;  %v7438_v9 = vadd.f32 %v9555_v55, %v9560_v34  ;;  %v7431_v21 = vadd.f32 %v7430_v22, %v9567_v18 }
 0x5ed   : > { %v7384_v46 = vadd.f32 %v7383_v40, %v5543_v45  ;;  %v7320_v43 = vpop.f32.mrb[38].mxu1  ;;  %v7435_v54 = vadd.f32 %v7434_v28, %v9567_v18 }
 0x5ee   : > { %v5692_v37 = vmax.f32 %v7380_v60, 0.0  ;;  %v7388_v52 = vadd.f32 %v7387_v31, %v7320_v43  ;;  %v5546_v53 = vpop.f32.mrb[39].mxu1  ;;  %v7439_v55 = vadd.f32 %v7438_v9, %v9567_v18 }
 0x5ef   : > { %v5690_v56 = vmax.f32 %v7384_v46, 0.0  ;;  %v7392_v5 = vadd.f32 %v7391_v38, %v5546_v53 }
 0x5f0   : > { %5724 = vst [vmem:[%s9580_s25 + $0x30] sm:$0xff] %v5692_v37  ;;  %v5693_v12 = vmax.f32 %v7388_v52, 0.0 }
 0x5f1   : > { %5722 = vst [vmem:[%s9580_s25 + $0x20] sm:$0xff] %v5690_v56  ;;  %v5691_v17 = vmax.f32 %v7392_v5, 0.0 }
 0x5f2   : > { %5725 = vst [vmem:[%s9580_s25 + $0x38] sm:$0xff] %v5693_v12 }
 0x5f3   : > { %5723 = vst [vmem:[%s9580_s25 + $0x28] sm:$0xff] %v5691_v17  ;;  %v7323_v36 = vpop.f32.mrb[40].mxu1 }
 0x5f4   : > { %v7396_v2 = vadd.f32 %v7395_v35, %v7323_v36  ;;  %v5559_v0 = vpop.f32.mrb[41].mxu1 }
 0x5f5   : > { %v7400_v16 = vadd.f32 %v7399_v39, %v5559_v0  ;;  %v7324_v15 = vpop.f32.mrb[42].mxu1 }
 0x5f6   : > { %v5696_v42 = vmax.f32 %v7396_v2, 0.0  ;;  %v7404_v33 = vadd.f32 %v7403_v30, %v7324_v15  ;;  %v5562_v24 = vpop.f32.mrb[43].mxu1 }
 0x5f7   : > { %v5694_v62 = vmax.f32 %v7400_v16, 0.0  ;;  %v7408_v61 = vadd.f32 %v7407_v63, %v5562_v24 }
 0x5f8   : > { %5728 = vst [vmem:[%s9580_s25 + $0x50] sm:$0xff] %v5696_v42  ;;  %v5697_v20 = vmax.f32 %v7404_v33, 0.0 }
 0x5f9   : > { %5726 = vst [vmem:[%s9580_s25 + $0x40] sm:$0xff] %v5694_v62  ;;  %v5695_v3 = vmax.f32 %v7408_v61, 0.0 }
 0x5fa   : > { %5729 = vst [vmem:[%s9580_s25 + $0x58] sm:$0xff] %v5697_v20 }
 0x5fb   : > { %5727 = vst [vmem:[%s9580_s25 + $0x48] sm:$0xff] %v5695_v3  ;;  %v7327_v41 = vpop.f32.mrb[44].mxu1 }
 0x5fc   : > { %v7412_v44 = vadd.f32 %v7411_v57, %v7327_v41  ;;  %v5575_v6 = vpop.f32.mrb[45].mxu1 }
 0x5fd   : > { %v7416_v29 = vadd.f32 %v7415_v25, %v5575_v6  ;;  %v7328_v11 = vpop.f32.mrb[46].mxu1 }
 0x5fe   : > { %v5700_v1 = vmax.f32 %v7412_v44, 0.0  ;;  %v7420_v13 = vadd.f32 %v7419_v47, %v7328_v11  ;;  %v5578_v59 = vpop.f32.mrb[47].mxu1 }
 0x5ff   : > { %v5698_v7 = vmax.f32 %v7416_v29, 0.0  ;;  %v7424_v8 = vadd.f32 %v7423_v19, %v5578_v59 }
 0x600   : > { %5732 = vst [vmem:[%s9580_s25 + $0x70] sm:$0xff] %v5700_v1  ;;  %v5701_v48 = vmax.f32 %v7420_v13, 0.0 }
 0x601   : > { %5730 = vst [vmem:[%s9580_s25 + $0x60] sm:$0xff] %v5698_v7  ;;  %v5699_v23 = vmax.f32 %v7424_v8, 0.0 }
 0x602   : > { %5733 = vst [vmem:[%s9580_s25 + $0x78] sm:$0xff] %v5701_v48 }
 0x603   : > { %5731 = vst [vmem:[%s9580_s25 + $0x68] sm:$0xff] %v5699_v23  ;;  %v7331_v40 = vpop.f32.mrb[48].mxu1 }
 0x604   : > { %v7428_v60 = vadd.f32 %v7427_v58, %v7331_v40  ;;  %v5591_v45 = vpop.f32.mrb[49].mxu1 }
 0x605   : > { %v7432_v31 = vadd.f32 %v7431_v21, %v5591_v45  ;;  %v7332_v46 = vpop.f32.mrb[50].mxu1 }
 0x606   : > { %v5704_v43 = vmax.f32 %v7428_v60, 0.0  ;;  %v7436_v38 = vadd.f32 %v7435_v54, %v7332_v46  ;;  %v5594_v14 = vpop.f32.mrb[51].mxu1 }
 0x607   : > { %v5702_v37 = vmax.f32 %v7432_v31, 0.0  ;;  %v7440_v52 = vadd.f32 %v7439_v55, %v5594_v14 }
 0x608   : > { %5736 = vst [vmem:[%s9580_s25 + $0x90] sm:$0xff] %v5704_v43  ;;  %v5705_v53 = vmax.f32 %v7436_v38, 0.0 }
 0x609   : > { %5734 = vst [vmem:[%s9580_s25 + $0x80] sm:$0xff] %v5702_v37  ;;  %v5703_v56 = vmax.f32 %v7440_v52, 0.0 }
 0x60a   : > { %5737 = vst [vmem:[%s9580_s25 + $0x98] sm:$0xff] %v5705_v53 }
 0x60b   : > { %5735 = vst [vmem:[%s9580_s25 + $0x88] sm:$0xff] %v5703_v56  ;;  %v7335_v5 = vpop.f32.mrb[20].mxu1 }
 0x60c   : > { %v7442_v4 = vadd.f32 %v7443_v26, %v7335_v5  ;;  %v5607_v12 = vpop.f32.mrb[21].mxu1 }
 0x60d   : > { %v7444_v27 = vadd.f32 %v7443_v26, %v5607_v12  ;;  %v7336_v17 = vpop.f32.mrb[22].mxu1 }
 0x60e   : > { %v5708_v35 = vmax.f32 %v7442_v4, 0.0  ;;  %v7446_v36 = vadd.f32 %v7443_v26, %v7336_v17  ;;  %v5610_v39 = vpop.f32.mrb[23].mxu1 }
 0x60f   : > { %v5706_v2 = vmax.f32 %v7444_v27, 0.0  ;;  %v7448_v0 = vadd.f32 %v7443_v26, %v5610_v39 }
 0x610   : > { %5740 = vst [vmem:[%s9580_s25 + $0xb0] sm:$0xff] %v5708_v35  ;;  %v5709_v34 = vmax.f32 %v7446_v36, 0.0 }
 0x611   : > { %5738 = vst [vmem:[%s9580_s25 + $0xa0] sm:$0xff] %v5706_v2  ;;  %v5707_v18 = vmax.f32 %v7448_v0, 0.0 }
 0x612   : > { %5741 = vst [vmem:[%s9580_s25 + $0xb8] sm:$0xff] %v5709_v34 }
 0x613   : > { %5739 = vst [vmem:[%s9580_s25 + $0xa8] sm:$0xff] %v5707_v18  ;;  %v7339_v30 = vpop.f32.mrb[24].mxu1 }
 0x614   : > { %v7450_v16 = vadd.f32 %v7443_v26, %v7339_v30  ;;  %v5623_v15 = vpop.f32.mrb[25].mxu1 }
 0x615   : > { %v7452_v63 = vadd.f32 %v7443_v26, %v5623_v15  ;;  %v7340_v10 = vpop.f32.mrb[26].mxu1 }
 0x616   : > { %v5712_v42 = vmax.f32 %v7450_v16, 0.0  ;;  %v7454_v33 = vadd.f32 %v7443_v26, %v7340_v10  ;;  %v5626_v24 = vpop.f32.mrb[27].mxu1 }
 0x617   : > { %v5710_v32 = vmax.f32 %v7452_v63, 0.0  ;;  %v7456_v62 = vadd.f32 %v7443_v26, %v5626_v24 }
 0x618   : > { %5744 = vst [vmem:[%s9580_s25 + $0xd0] sm:$0xff] %v5712_v42  ;;  %v5713_v61 = vmax.f32 %v7454_v33, 0.0 }
 0x619   : > { %5742 = vst [vmem:[%s9580_s25 + $0xc0] sm:$0xff] %v5710_v32  ;;  %v5711_v51 = vmax.f32 %v7456_v62, 0.0 }
 0x61a   : > { %5745 = vst [vmem:[%s9580_s25 + $0xd8] sm:$0xff] %v5713_v61 }
 0x61b   : > { %5743 = vst [vmem:[%s9580_s25 + $0xc8] sm:$0xff] %v5711_v51  ;;  %v7343_v20 = vpop.f32.mrb[28].mxu1 }
 0x61c   : > { %v7458_v50 = vadd.f32 %v7443_v26, %v7343_v20  ;;  %v5639_v3 = vpop.f32.mrb[29].mxu1 }
 0x61d   : > { %v7460_v57 = vadd.f32 %v7443_v26, %v5639_v3  ;;  %v7344_v41 = vpop.f32.mrb[30].mxu1 }
 0x61e   : > { %v5716_v25 = vmax.f32 %v7458_v50, 0.0  ;;  %v7462_v44 = vadd.f32 %v7443_v26, %v7344_v41  ;;  %v5642_v6 = vpop.f32.mrb[31].mxu1 }
 0x61f   : > { %v5714_v47 = vmax.f32 %v7460_v57, 0.0  ;;  %v7464_v29 = vadd.f32 %v7443_v26, %v5642_v6 }
 0x620   : > { %5748 = vst [vmem:[%s9580_s25 + $0xf0] sm:$0xff] %v5716_v25  ;;  %v5717_v11 = vmax.f32 %v7462_v44, 0.0 }
 0x621   : > { %5746 = vst [vmem:[%s9580_s25 + $0xe0] sm:$0xff] %v5714_v47  ;;  %v5715_v19 = vmax.f32 %v7464_v29, 0.0 }
 0x622   : > { %5749 = vst [vmem:[%s9580_s25 + $0xf8] sm:$0xff] %v5717_v11 }
 0x623   : > { %5747 = vst [vmem:[%s9580_s25 + $0xe8] sm:$0xff] %v5715_v19 }
 0x624 PF: > { %s17_s24 = sadd.s32 1, %s8076_s24  }
 0x625   : > { %p14_p4 = scmp.ge.s32.totalorder %s17_s24, 4  }
 0x627   :  { %16 = sbr.rel (!%p14_p4) target bundleno = 1 (0x1), region = 96 }

</bundles_post_ra>
